<compile_context>
chip_gen: v5e
topology: v5e:2x2
jax: 0.10.0
libtpu: 0.0.40
codegen_flags: <defaults>
</compile_context>

<pallas_src>
import functools

import jax
import jax.numpy as jnp
import numpy as np
from jax.experimental import pallas as pl
from jax.experimental.pallas import tpu as pltpu


# ----------------------------------------------------------------------------
# Pallas kernel: one batch tile of the _ItemModel hot path.
# ----------------------------------------------------------------------------
def _item_model_kernel(
    pt_ref, er_ref, item_ref, mask_ref,
    # g_u = _MultiLayerPercep(2D, D)   (layer 1 split into user / rate halves)
    gw1u, gw1r, gb1, gw2, gb2, gw3, gb3,
    # item_users_att = _MultiLayerPercep(2D, 1)
    #   aw1q: q-half of layer 1; aw1fc = gw3 @ aw1f (pre-composed f-half)
    aw1q, aw1fc, ab1c, aw2, ab2, aw3r, ab3,
    # aggre_users = _Aggregation(D, D)  (last layer zero-padded to lane width)
    uw1, ub1, uw2p, ub2p,
    out_ref,
    *, TB, U, D, ew_dtype,
):
    f32 = jnp.float32
    bf16 = jnp.bfloat16

    def relu_e(x):
        # ReLU in the elementwise dtype (bf16 on chips with a bf16 VALU;
        # f32 on v5e and older).  Numerically identical to relu-then-cast.
        return jnp.maximum(x.astype(ew_dtype), 0.0)

    pt = pt_ref[...]                                   # (TB*U, D) bf16 user emb
    er = er_ref[...]                                   # (TB*U, D) bf16 rate emb
    item = item_ref[...]                               # (TB, D)   bf16 item emb
    mask_v = mask_ref[...].astype(f32)
    # fast path: (TB, U) lane-dense block; fallback path: (TB, U, 1) block.
    mask3 = mask_v if mask_v.ndim == 3 else mask_v[:, :, None]   # (TB, U, 1)

    # ---- g_u MLP on cat([p_t, rate_emb]); split-K first layer, f32 MXU accum --
    h = relu_e(jnp.dot(pt, gw1u[...], preferred_element_type=f32)
               + jnp.dot(er, gw1r[...], preferred_element_type=f32) + gb1[...])
    h2 = relu_e(jnp.dot(h.astype(bf16), gw2[...], preferred_element_type=f32)
                + gb2[...])
    f_jt = (jnp.dot(h2.astype(bf16), gw3[...], preferred_element_type=f32)
            + gb3[...])                                # (TB*U, D) f32 (kept f32)

    # ---- attention MLP on cat([f_jt, q_j]) ----
    # f-branch composed with g_u layer 3: f_jt @ aw1f == h2 @ (gw3@aw1f) + gb3@aw1f
    # q-branch: q_j = mask * item, but masked rows are excluded from the softmax
    # (masked max + masked exp below), so dot(q_j, Wq) collapses to one (TB, D)
    # matmul broadcast over U with no mask multiply.
    qa = jnp.dot(item, aw1q[...], preferred_element_type=f32)          # (TB, D)
    a1_pre = jnp.dot(h2.astype(bf16), aw1fc[...], preferred_element_type=f32)
    a1 = relu_e(a1_pre.reshape(TB, U, D) + qa[:, None, :] + ab1c[...])  # (TB,U,D)
    a2 = relu_e(jnp.dot(a1.reshape(TB * U, D).astype(bf16), aw2[...],
                        preferred_element_type=f32) + ab2[...])        # (TB*U, D//2)
    # N=1 output layer: VPU multiply + lane reduce (keeps the MXU free).
    logits = (jnp.sum(a2.astype(f32) * aw3r[...], axis=-1, keepdims=True)
              + ab3[...])                                              # (TB*U, 1)
    lg3 = logits.reshape(TB, U, 1)

    # ---- masked exp + normalization over the U (neighbor) axis, all f32 ----
    # row-max over *valid* neighbors only so padded logits cannot dominate.
    m = jnp.max(jnp.where(mask3 > 0.0, lg3, -1e30), axis=1, keepdims=True)
    e = jnp.exp(jnp.minimum(lg3 - m, 0.0)) * mask3
    denom = jnp.sum(e, axis=1, keepdims=True) + 1e-10
    miu = e * pl.reciprocal(denom, approx=True)                        # (TB, U, 1)

    # ---- weighted aggregation of f_jt over neighbors ----
    agg = jnp.sum(miu * f_jt.reshape(TB, U, D), axis=1)                # (TB, D)

    # ---- aggre_users: Linear+ReLU, Linear+ReLU (output width lane-padded) ----
    z = relu_e(jnp.dot(agg.astype(bf16), uw1[...], preferred_element_type=f32)
               + ub1[...])
    out_ref[...] = jnp.maximum(
        jnp.dot(z.astype(bf16), uw2p[...], preferred_element_type=f32)
        + ub2p[...], 0.0)                                              # (TB, OUTP)


# ----------------------------------------------------------------------------
# Generation-aware helpers
# ----------------------------------------------------------------------------
def _lane_pad(n):
    return ((n + 127) // 128) * 128


def _vmem_budget_bytes():
    """~75% of physical VMEM (~96 MiB on 128 MiB v5e/v6e, ~48 MiB on 64 MiB v7x)."""
    try:
        cap = int(pltpu.get_tpu_info().vmem_capacity_bytes)
    except Exception:
        cap = 64 * 1024 * 1024
    return max(16 * 1024 * 1024, int(cap * 0.75))


def _elementwise_dtype():
    """bf16 elementwise on chips with a bf16 VALU (v6e/v7x); f32 on v5e/older."""
    try:
        kind = jax.devices()[0].device_kind.lower()
    except Exception:
        return jnp.bfloat16
    if any(v in kind for v in ("v2", "v3", "v4", "v5")):
        return jnp.float32
    return jnp.bfloat16


def _pick_batch_tile(B, U, D, out_pad, vmem_budget):
    """Largest batch tile that (a) divides B, (b) keeps grid >= 2 (v7x megacore),
    (c) fits double-buffered activation streams + f32 intermediates in ~half the
    VMEM budget (weights / compiler scratch get the rest)."""
    lp_d, lp_h, lp_u = _lane_pad(D), _lane_pad(max(D // 2, 1)), _lane_pad(U)
    per_row = (
        2 * (2 * U * lp_d * 2 + lp_d * 2 + lp_u * 4)       # 2x-buffered p_t/er/item/mask
        + U * (4 * lp_d + 2 * lp_h) * 4                    # f32-ish h/h2/f_jt/a1/a2
        + 2 * _lane_pad(out_pad) * 4                       # 2x-buffered output tile
    )
    cap = max(8, (vmem_budget // 2) // max(per_row, 1))
    ladder = (512, 256, 128, 64, 32, 16, 8)
    for tb in ladder:                                      # prefer grid >= 2
        if tb <= cap and B % tb == 0 and B // tb >= 2:
            return tb
    for tb in ladder:
        if tb <= cap and B % tb == 0:
            return tb
    return B


# ----------------------------------------------------------------------------
# Wrapper: embedding lookups / bf16 prep (glue) + batch-tiled pallas_call
# ----------------------------------------------------------------------------
def item_model_forward(iids, i_user_pad, emb_tables, params, *, emb_dim,
                       batch_tile=None):
    user_tab, item_tab, rate_tab = emb_tables
    B, U, _ = i_user_pad.shape
    D = emb_dim

    # Keep the neighbor axis a multiple of 8 so the in-kernel reshapes fall on
    # vreg sublane boundaries (padded rows have uid == 0 -> fully masked).
    if U % 8 != 0:
        pad_u = 8 - U % 8
        i_user_pad = jnp.pad(i_user_pad, ((0, 0), (0, pad_u), (0, 0)))
        U += pad_u

    (gw1, gb1, gw2, gb2, gw3, gb3,
     aw1, ab1, aw2, ab2, aw3, ab3,
     uw1, ub1, uw2, ub2) = params

    uid = i_user_pad[:, :, 0]
    rid = i_user_pad[:, :, 1]

    # Embedding gathers + bf16 casts stay in plain-JAX glue; the two concat
    # halves are passed separately so the (B*U, 2D) concat never hits HBM.
    # TODO(synk): in-kernel embedding gather (scalar-prefetch uid/rid + manual
    # DMA from tables left in pl.ANY) not implemented; XLA fuses the gathers.
    p_t = user_tab[uid].reshape(B * U, D).astype(jnp.bfloat16)
    er = rate_tab[rid].reshape(B * U, D).astype(jnp.bfloat16)
    item_e = item_tab[iids].astype(jnp.bfloat16)               # (B, D)
    mask2d = (uid > 0).astype(jnp.float32)                     # (B, U) lane-dense

    # ---- weight prep: bf16 matrices, f32 (1, N) bias rows, algebraic folds ----
    bf = lambda w: w.astype(jnp.bfloat16)
    r2 = lambda b: b.reshape(1, -1).astype(jnp.float32)

    aw1f, aw1q = aw1[:D], aw1[D:]
    aw1fc = gw3 @ aw1f                                         # (D//2, D) composed
    ab1c = ab1 + gb3 @ aw1f                                    # bias fold

    out_pad = _lane_pad(D)                                     # lane-dense out width
    if out_pad != D:
        uw2p = jnp.zeros((D, out_pad), uw2.dtype).at[:, :D].set(uw2)
        ub2p = jnp.zeros((out_pad,), ub2.dtype).at[:D].set(ub2)
    else:
        uw2p, ub2p = uw2, ub2

    weight_args = (
        bf(gw1[:D]), bf(gw1[D:]), r2(gb1), bf(gw2), r2(gb2), bf(gw3), r2(gb3),
        bf(aw1q), bf(aw1fc), r2(ab1c), bf(aw2), r2(ab2),
        aw3.reshape(1, D // 2).astype(jnp.float32),
        ab3.reshape(1, 1).astype(jnp.float32),
        bf(uw1), r2(ub1), bf(uw2p), r2(ub2p),
    )

    vmem_budget = _vmem_budget_bytes()
    TB = (batch_tile if batch_tile is not None
          else _pick_batch_tile(B, U, D, out_pad, vmem_budget))
    assert B % TB == 0, "batch must be divisible by the batch tile"
    grid = (B // TB,)

    d2 = D // 2
    flops = int(
        B * U * (2 * (2 * D) * D + 2 * D * d2 + 2 * d2 * D      # g_u MLP
                 + 2 * d2 * D + 2 * D * d2 + 2 * d2)            # attention MLP
        + B * (2 * D * D + 2 * U * D + 2 * D * D + 2 * D * out_pad))
    bytes_accessed = int(
        p_t.size * 2 + er.size * 2 + item_e.size * 2 + mask2d.size * 4
        + B * out_pad * 4
        + sum(int(np.prod(w.shape)) * w.dtype.itemsize for w in weight_args))
    cost = pl.CostEstimate(flops=flops, transcendentals=int(B * U + B),
                           bytes_accessed=bytes_accessed)

    kern = functools.partial(_item_model_kernel, TB=TB, U=U, D=D,
                             ew_dtype=_elementwise_dtype())

    def run(fast):
        if fast:
            mask_arg = mask2d
            mask_spec = pl.BlockSpec((TB, U), lambda i: (i, 0))
            # Constant-index weights fetched once and single-buffered.
            wspecs = [pl.BlockSpec(w.shape, lambda i, nd=w.ndim: (0,) * nd,
                                   pipeline_mode=pl.Buffered(1))
                      for w in weight_args]
        else:
            # Conservative fallback: 3-D mask block + default double buffering.
            mask_arg = mask2d[:, :, None]
            mask_spec = pl.BlockSpec((TB, U, 1), lambda i: (i, 0, 0))
            wspecs = [pl.BlockSpec(w.shape, lambda i, nd=w.ndim: (0,) * nd)
                      for w in weight_args]

        data_specs = [
            pl.BlockSpec((TB * U, D), lambda i: (i, 0)),       # user embeddings
            pl.BlockSpec((TB * U, D), lambda i: (i, 0)),       # rating embeddings
            pl.BlockSpec((TB, D), lambda i: (i, 0)),           # item embeddings
            mask_spec,                                         # padding mask
        ]
        return pl.pallas_call(
            kern,
            out_shape=jax.ShapeDtypeStruct((B, out_pad), jnp.float32),
            grid=grid,
            in_specs=data_specs + wspecs,
            out_specs=pl.BlockSpec((TB, out_pad), lambda i: (i, 0)),
            compiler_params=pltpu.CompilerParams(
                dimension_semantics=("parallel",),             # megacore on v7x
                vmem_limit_bytes=vmem_budget,
            ),
            cost_estimate=cost,
        )(p_t, er, item_e, mask_arg, *weight_args)

    try:
        out = run(True)
    except Exception:
        # Fallback if pl.Buffered(1) / the 2-D-mask rank expansion is rejected
        # by this jax/libtpu combination.
        out = run(False)
    return out[:, :D]


# ----------------------------------------------------------------------------
# Pure-JAX reference (mirrors the PyTorch forward exactly, f32)
# ----------------------------------------------------------------------------
def ref_forward(iids, i_user_pad, emb_tables, params, *, emb_dim):
    user_tab, item_tab, rate_tab = emb_tables
    (gw1, gb1, gw2, gb2, gw3, gb3,
     aw1, ab1, aw2, ab2, aw3, ab3,
     uw1, ub1, uw2, ub2) = params
    B, U, _ = i_user_pad.shape
    D = emb_dim
    relu = lambda v: jnp.maximum(v, 0.0)

    uid = i_user_pad[:, :, 0]
    p_t = user_tab[uid]
    er = rate_tab[i_user_pad[:, :, 1]]
    mask = (uid > 0).astype(jnp.float32)

    x = jnp.concatenate([p_t, er], axis=2).reshape(-1, 2 * D)
    h = relu(x @ gw1 + gb1)
    h = relu(h @ gw2 + gb2)
    f_jt = (h @ gw3 + gb3).reshape(B, U, D)

    q_j = mask[:, :, None] * item_tab[iids][:, None, :]
    x2 = jnp.concatenate([f_jt, q_j], axis=2).reshape(-1, 2 * D)
    a = relu(x2 @ aw1 + ab1)
    a = relu(a @ aw2 + ab2)
    miu = (a @ aw3 + ab3).reshape(B, U)
    miu = jnp.exp(miu) * mask
    miu = miu / (jnp.sum(miu, axis=1, keepdims=True) + 1e-10)

    agg = jnp.sum(miu[:, :, None] * f_jt, axis=1)
    z = relu(agg @ uw1 + ub1)
    z = relu(z @ uw2 + ub2)
    return z


# ----------------------------------------------------------------------------
# Deterministic parameter construction (PyTorch Linear layout: (fin, fout))
# ----------------------------------------------------------------------------
def make_params(key, emb_dim):
    D = emb_dim
    ks = iter(jax.random.split(key, 32))

    def lin(k, fin, fout):
        return (1.0 / np.sqrt(fin)) * jax.random.normal(k, (fin, fout), jnp.float32)

    def bias(k, fout):
        return 0.1 * jax.random.normal(k, (fout,), jnp.float32)

    # g_u: Linear(2D, D), Linear(D, D//2), Linear(D//2, D)
    gw1 = lin(next(ks), 2 * D, D); gb1 = bias(next(ks), D)
    gw2 = lin(next(ks), D, D // 2); gb2 = bias(next(ks), D // 2)
    gw3 = lin(next(ks), D // 2, D); gb3 = bias(next(ks), D)
    # item_users_att: Linear(2D, D), Linear(D, D//2), Linear(D//2, 1)
    aw1 = lin(next(ks), 2 * D, D); ab1 = bias(next(ks), D)
    aw2 = lin(next(ks), D, D // 2); ab2 = bias(next(ks), D // 2)
    aw3 = lin(next(ks), D // 2, 1); ab3 = bias(next(ks), 1)
    # aggre_users: Linear(D, D) x2
    uw1 = lin(next(ks), D, D); ub1 = bias(next(ks), D)
    uw2 = lin(next(ks), D, D); ub2 = bias(next(ks), D)

    return (gw1, gb1, gw2, gb2, gw3, gb3,
            aw1, ab1, aw2, ab2, aw3, ab3,
            uw1, ub1, uw2, ub2)


if __name__ == "__main__":
    B, U, D = 16, 8, 32            # batch, padded users-per-item, emb_dim
    n_users, n_items, n_rates = 40, 12, 6

    key = jax.random.PRNGKey(0)
    k_emb_u, k_emb_i, k_emb_r, k_par, k_uid, k_rid, k_iid = jax.random.split(key, 7)

    user_tab = 0.5 * jax.random.normal(k_emb_u, (n_users, D), jnp.float32)
    item_tab = 0.5 * jax.random.normal(k_emb_i, (n_items, D), jnp.float32)
    rate_tab = 0.5 * jax.random.normal(k_emb_r, (n_rates, D), jnp.float32)
    emb_tables = (user_tab, item_tab, rate_tab)

    params = make_params(k_par, D)

    # i_user_pad: (B, U, 2), [:, :, 0] = user ids (0 == pad), [:, :, 1] = rating ids
    uid = jax.random.randint(k_uid, (B, U), 0, n_users, jnp.int32)
    rid = jax.random.randint(k_rid, (B, U), 0, n_rates, jnp.int32)
    i_user_pad = jnp.stack([uid, rid], axis=-1)
    iids = jax.random.randint(k_iid, (B,), 0, n_items, jnp.int32)

    # auto tile picker -> TB=8 here (2-step grid, so pipelining + megacore
    # sharding paths are exercised at demo size)
    z = item_model_forward(iids, i_user_pad, emb_tables, params, emb_dim=D)
    z = jax.block_until_ready(z)

    z_ref = ref_forward(iids, i_user_pad, emb_tables, params, emb_dim=D)
    # bf16 weights/activations with f32 accumulation -> bf16-level tolerance
    np.testing.assert_allclose(np.asarray(z), np.asarray(z_ref), rtol=5e-2, atol=5e-2)

    print("KERNEL_OK")
</pallas_src>

<mosaic_0001>
module attributes {stable_mosaic.version = 11 : i64} {
  func.func @_item_model_kernel(%arg0: i32, %arg1: memref<64x32xbf16, #tpu.memory_space<vmem>>, %arg2: memref<64x32xbf16, #tpu.memory_space<vmem>>, %arg3: memref<8x32xbf16, #tpu.memory_space<vmem>>, %arg4: memref<8x8xf32, #tpu.memory_space<vmem>>, %arg5: memref<32x32xbf16, #tpu.memory_space<vmem>>, %arg6: memref<32x32xbf16, #tpu.memory_space<vmem>>, %arg7: memref<1x32xf32, #tpu.memory_space<vmem>>, %arg8: memref<32x16xbf16, #tpu.memory_space<vmem>>, %arg9: memref<1x16xf32, #tpu.memory_space<vmem>>, %arg10: memref<16x32xbf16, #tpu.memory_space<vmem>>, %arg11: memref<1x32xf32, #tpu.memory_space<vmem>>, %arg12: memref<32x32xbf16, #tpu.memory_space<vmem>>, %arg13: memref<16x32xbf16, #tpu.memory_space<vmem>>, %arg14: memref<1x32xf32, #tpu.memory_space<vmem>>, %arg15: memref<32x16xbf16, #tpu.memory_space<vmem>>, %arg16: memref<1x16xf32, #tpu.memory_space<vmem>>, %arg17: memref<1x16xf32, #tpu.memory_space<vmem>>, %arg18: memref<1x1xf32, #tpu.memory_space<vmem>>, %arg19: memref<32x32xbf16, #tpu.memory_space<vmem>>, %arg20: memref<1x32xf32, #tpu.memory_space<vmem>>, %arg21: memref<32x128xbf16, #tpu.memory_space<vmem>>, %arg22: memref<1x128xf32, #tpu.memory_space<vmem>>, %arg23: memref<8x128xf32, #tpu.memory_space<vmem>>) attributes {dimension_semantics = [#tpu.dimension_semantics<parallel>], iteration_bounds = array<i64: 2>, scalar_prefetch = 0 : i64, scratch_operands = 0 : i64, tpu.core_type = #tpu.core_type<tc>, window_params = [{transform_indices = @transform_0, window_bounds = array<i64: 64, 32>}, {transform_indices = @transform_1, window_bounds = array<i64: 64, 32>}, {transform_indices = @transform_2, window_bounds = array<i64: 8, 32>}, {transform_indices = @transform_3, window_bounds = array<i64: 8, 8>}, {pipeline_mode = #tpu.pipeline_mode<synchronous>, transform_indices = @transform_4, window_bounds = array<i64: 32, 32>}, {pipeline_mode = #tpu.pipeline_mode<synchronous>, transform_indices = @transform_5, window_bounds = array<i64: 32, 32>}, {pipeline_mode = #tpu.pipeline_mode<synchronous>, transform_indices = @transform_6, window_bounds = array<i64: 1, 32>}, {pipeline_mode = #tpu.pipeline_mode<synchronous>, transform_indices = @transform_7, window_bounds = array<i64: 32, 16>}, {pipeline_mode = #tpu.pipeline_mode<synchronous>, transform_indices = @transform_8, window_bounds = array<i64: 1, 16>}, {pipeline_mode = #tpu.pipeline_mode<synchronous>, transform_indices = @transform_9, window_bounds = array<i64: 16, 32>}, {pipeline_mode = #tpu.pipeline_mode<synchronous>, transform_indices = @transform_10, window_bounds = array<i64: 1, 32>}, {pipeline_mode = #tpu.pipeline_mode<synchronous>, transform_indices = @transform_11, window_bounds = array<i64: 32, 32>}, {pipeline_mode = #tpu.pipeline_mode<synchronous>, transform_indices = @transform_12, window_bounds = array<i64: 16, 32>}, {pipeline_mode = #tpu.pipeline_mode<synchronous>, transform_indices = @transform_13, window_bounds = array<i64: 1, 32>}, {pipeline_mode = #tpu.pipeline_mode<synchronous>, transform_indices = @transform_14, window_bounds = array<i64: 32, 16>}, {pipeline_mode = #tpu.pipeline_mode<synchronous>, transform_indices = @transform_15, window_bounds = array<i64: 1, 16>}, {pipeline_mode = #tpu.pipeline_mode<synchronous>, transform_indices = @transform_16, window_bounds = array<i64: 1, 16>}, {pipeline_mode = #tpu.pipeline_mode<synchronous>, transform_indices = @transform_17, window_bounds = array<i64: 1, 1>}, {pipeline_mode = #tpu.pipeline_mode<synchronous>, transform_indices = @transform_18, window_bounds = array<i64: 32, 32>}, {pipeline_mode = #tpu.pipeline_mode<synchronous>, transform_indices = @transform_19, window_bounds = array<i64: 1, 32>}, {pipeline_mode = #tpu.pipeline_mode<synchronous>, transform_indices = @transform_20, window_bounds = array<i64: 32, 128>}, {pipeline_mode = #tpu.pipeline_mode<synchronous>, transform_indices = @transform_21, window_bounds = array<i64: 1, 128>}, {transform_indices = @transform_22, window_bounds = array<i64: 8, 128>}]} {
    %c0 = arith.constant 0 : index
    %c0_0 = arith.constant 0 : index
    %0 = vector.load %arg1[%c0, %c0_0] : memref<64x32xbf16, #tpu.memory_space<vmem>>, vector<64x32xbf16>
    %c0_1 = arith.constant 0 : index
    %c0_2 = arith.constant 0 : index
    %1 = vector.load %arg2[%c0_1, %c0_2] : memref<64x32xbf16, #tpu.memory_space<vmem>>, vector<64x32xbf16>
    %c0_3 = arith.constant 0 : index
    %c0_4 = arith.constant 0 : index
    %2 = vector.load %arg3[%c0_3, %c0_4] : memref<8x32xbf16, #tpu.memory_space<vmem>>, vector<8x32xbf16>
    %c0_5 = arith.constant 0 : index
    %c0_6 = arith.constant 0 : index
    %3 = vector.load %arg4[%c0_5, %c0_6] : memref<8x8xf32, #tpu.memory_space<vmem>>, vector<8x8xf32>
    %4 = vector.shape_cast %3 : vector<8x8xf32> to vector<8x8x1xf32>
    %c0_7 = arith.constant 0 : index
    %c0_8 = arith.constant 0 : index
    %5 = vector.load %arg5[%c0_7, %c0_8] : memref<32x32xbf16, #tpu.memory_space<vmem>>, vector<32x32xbf16>
    %cst = arith.constant dense<0.000000e+00> : vector<64x32xf32>
    %6 = tpu.matmul %0, %5, %cst {dimension_numbers = #tpu.dot_dimension_numbers<[1], [0], [0], [1], [0, 0, 1, 1], [], []>} : vector<64x32xbf16>, vector<32x32xbf16>, vector<64x32xf32> -> vector<64x32xf32>
    %c0_9 = arith.constant 0 : index
    %c0_10 = arith.constant 0 : index
    %7 = vector.load %arg6[%c0_9, %c0_10] : memref<32x32xbf16, #tpu.memory_space<vmem>>, vector<32x32xbf16>
    %cst_11 = arith.constant dense<0.000000e+00> : vector<64x32xf32>
    %8 = tpu.matmul %1, %7, %cst_11 {dimension_numbers = #tpu.dot_dimension_numbers<[1], [0], [0], [1], [0, 0, 1, 1], [], []>} : vector<64x32xbf16>, vector<32x32xbf16>, vector<64x32xf32> -> vector<64x32xf32>
    %9 = arith.addf %6, %8 : vector<64x32xf32>
    %c0_12 = arith.constant 0 : index
    %c0_13 = arith.constant 0 : index
    %10 = vector.load %arg7[%c0_12, %c0_13] : memref<1x32xf32, #tpu.memory_space<vmem>>, vector<1x32xf32>
    %11 = vector.broadcast %10 : vector<1x32xf32> to vector<64x32xf32>
    %12 = arith.addf %9, %11 : vector<64x32xf32>
    %13 = arith.truncf %12 : vector<64x32xf32> to vector<64x32xbf16>
    %cst_14 = arith.constant 0.000000e+00 : bf16
    %14 = vector.broadcast %cst_14 : bf16 to vector<64x32xbf16>
    %15 = arith.maximumf %13, %14 : vector<64x32xbf16>
    %c0_15 = arith.constant 0 : index
    %c0_16 = arith.constant 0 : index
    %16 = vector.load %arg8[%c0_15, %c0_16] : memref<32x16xbf16, #tpu.memory_space<vmem>>, vector<32x16xbf16>
    %cst_17 = arith.constant dense<0.000000e+00> : vector<64x16xf32>
    %17 = tpu.matmul %15, %16, %cst_17 {dimension_numbers = #tpu.dot_dimension_numbers<[1], [0], [0], [1], [0, 0, 1, 1], [], []>} : vector<64x32xbf16>, vector<32x16xbf16>, vector<64x16xf32> -> vector<64x16xf32>
    %c0_18 = arith.constant 0 : index
    %c0_19 = arith.constant 0 : index
    %18 = vector.load %arg9[%c0_18, %c0_19] : memref<1x16xf32, #tpu.memory_space<vmem>>, vector<1x16xf32>
    %19 = vector.broadcast %18 : vector<1x16xf32> to vector<64x16xf32>
    %20 = arith.addf %17, %19 : vector<64x16xf32>
    %21 = arith.truncf %20 : vector<64x16xf32> to vector<64x16xbf16>
    %cst_20 = arith.constant 0.000000e+00 : bf16
    %22 = vector.broadcast %cst_20 : bf16 to vector<64x16xbf16>
    %23 = arith.maximumf %21, %22 : vector<64x16xbf16>
    %c0_21 = arith.constant 0 : index
    %c0_22 = arith.constant 0 : index
    %24 = vector.load %arg10[%c0_21, %c0_22] : memref<16x32xbf16, #tpu.memory_space<vmem>>, vector<16x32xbf16>
    %cst_23 = arith.constant dense<0.000000e+00> : vector<64x32xf32>
    %25 = tpu.matmul %23, %24, %cst_23 {dimension_numbers = #tpu.dot_dimension_numbers<[1], [0], [0], [1], [0, 0, 1, 1], [], []>} : vector<64x16xbf16>, vector<16x32xbf16>, vector<64x32xf32> -> vector<64x32xf32>
    %c0_24 = arith.constant 0 : index
    %c0_25 = arith.constant 0 : index
    %26 = vector.load %arg11[%c0_24, %c0_25] : memref<1x32xf32, #tpu.memory_space<vmem>>, vector<1x32xf32>
    %27 = vector.broadcast %26 : vector<1x32xf32> to vector<64x32xf32>
    %28 = arith.addf %25, %27 : vector<64x32xf32>
    %c0_26 = arith.constant 0 : index
    %c0_27 = arith.constant 0 : index
    %29 = vector.load %arg12[%c0_26, %c0_27] : memref<32x32xbf16, #tpu.memory_space<vmem>>, vector<32x32xbf16>
    %cst_28 = arith.constant dense<0.000000e+00> : vector<8x32xf32>
    %30 = tpu.matmul %2, %29, %cst_28 {dimension_numbers = #tpu.dot_dimension_numbers<[1], [0], [0], [1], [0, 0, 1, 1], [], []>} : vector<8x32xbf16>, vector<32x32xbf16>, vector<8x32xf32> -> vector<8x32xf32>
    %c0_29 = arith.constant 0 : index
    %c0_30 = arith.constant 0 : index
    %31 = vector.load %arg13[%c0_29, %c0_30] : memref<16x32xbf16, #tpu.memory_space<vmem>>, vector<16x32xbf16>
    %cst_31 = arith.constant dense<0.000000e+00> : vector<64x32xf32>
    %32 = tpu.matmul %23, %31, %cst_31 {dimension_numbers = #tpu.dot_dimension_numbers<[1], [0], [0], [1], [0, 0, 1, 1], [], []>} : vector<64x16xbf16>, vector<16x32xbf16>, vector<64x32xf32> -> vector<64x32xf32>
    %33 = vector.shape_cast %32 : vector<64x32xf32> to vector<8x8x32xf32>
    %34 = vector.shape_cast %30 : vector<8x32xf32> to vector<8x1x32xf32>
    %35 = vector.broadcast %34 : vector<8x1x32xf32> to vector<8x8x32xf32>
    %36 = arith.addf %33, %35 : vector<8x8x32xf32>
    %c0_32 = arith.constant 0 : index
    %c0_33 = arith.constant 0 : index
    %37 = vector.load %arg14[%c0_32, %c0_33] : memref<1x32xf32, #tpu.memory_space<vmem>>, vector<1x32xf32>
    %38 = vector.shape_cast %37 : vector<1x32xf32> to vector<1x1x32xf32>
    %39 = vector.broadcast %38 : vector<1x1x32xf32> to vector<8x8x32xf32>
    %40 = arith.addf %36, %39 : vector<8x8x32xf32>
    %41 = arith.truncf %40 : vector<8x8x32xf32> to vector<8x8x32xbf16>
    %cst_34 = arith.constant 0.000000e+00 : bf16
    %42 = vector.broadcast %cst_34 : bf16 to vector<8x8x32xbf16>
    %43 = arith.maximumf %41, %42 : vector<8x8x32xbf16>
    %44 = vector.shape_cast %43 : vector<8x8x32xbf16> to vector<64x32xbf16>
    %c0_35 = arith.constant 0 : index
    %c0_36 = arith.constant 0 : index
    %45 = vector.load %arg15[%c0_35, %c0_36] : memref<32x16xbf16, #tpu.memory_space<vmem>>, vector<32x16xbf16>
    %cst_37 = arith.constant dense<0.000000e+00> : vector<64x16xf32>
    %46 = tpu.matmul %44, %45, %cst_37 {dimension_numbers = #tpu.dot_dimension_numbers<[1], [0], [0], [1], [0, 0, 1, 1], [], []>} : vector<64x32xbf16>, vector<32x16xbf16>, vector<64x16xf32> -> vector<64x16xf32>
    %c0_38 = arith.constant 0 : index
    %c0_39 = arith.constant 0 : index
    %47 = vector.load %arg16[%c0_38, %c0_39] : memref<1x16xf32, #tpu.memory_space<vmem>>, vector<1x16xf32>
    %48 = vector.broadcast %47 : vector<1x16xf32> to vector<64x16xf32>
    %49 = arith.addf %46, %48 : vector<64x16xf32>
    %50 = arith.truncf %49 : vector<64x16xf32> to vector<64x16xbf16>
    %cst_40 = arith.constant 0.000000e+00 : bf16
    %51 = vector.broadcast %cst_40 : bf16 to vector<64x16xbf16>
    %52 = arith.maximumf %50, %51 : vector<64x16xbf16>
    %53 = arith.extf %52 : vector<64x16xbf16> to vector<64x16xf32>
    %c0_41 = arith.constant 0 : index
    %c0_42 = arith.constant 0 : index
    %54 = vector.load %arg17[%c0_41, %c0_42] : memref<1x16xf32, #tpu.memory_space<vmem>>, vector<1x16xf32>
    %55 = vector.broadcast %54 : vector<1x16xf32> to vector<64x16xf32>
    %56 = arith.mulf %53, %55 : vector<64x16xf32>
    %cst_43 = arith.constant dense<0.000000e+00> : vector<64xf32>
    %57 = vector.multi_reduction <add>, %56, %cst_43 [1] : vector<64x16xf32> to vector<64xf32>
    %58 = vector.shape_cast %57 : vector<64xf32> to vector<64x1xf32>
    %c0_44 = arith.constant 0 : index
    %c0_45 = arith.constant 0 : index
    %59 = vector.load %arg18[%c0_44, %c0_45] : memref<1x1xf32, #tpu.memory_space<vmem>>, vector<1x1xf32>
    %60 = vector.broadcast %59 : vector<1x1xf32> to vector<64x1xf32>
    %61 = arith.addf %58, %60 : vector<64x1xf32>
    %62 = vector.shape_cast %61 : vector<64x1xf32> to vector<8x8x1xf32>
    %cst_46 = arith.constant 0.000000e+00 : f32
    %63 = vector.broadcast %cst_46 : f32 to vector<8x8x1xf32>
    %64 = arith.cmpf ogt, %4, %63 : vector<8x8x1xf32>
    %cst_47 = arith.constant -1.000000e+30 : f32
    %65 = vector.broadcast %cst_47 : f32 to vector<8x8x1xf32>
    %66 = arith.select %64, %62, %65 : vector<8x8x1xi1>, vector<8x8x1xf32>
    %cst_48 = arith.constant dense<0xFF800000> : vector<8x1xf32>
    %67 = vector.multi_reduction <maximumf>, %66, %cst_48 [1] : vector<8x8x1xf32> to vector<8x1xf32>
    %68 = vector.shape_cast %67 : vector<8x1xf32> to vector<8x1x1xf32>
    %69 = vector.broadcast %68 : vector<8x1x1xf32> to vector<8x8x1xf32>
    %70 = arith.subf %62, %69 : vector<8x8x1xf32>
    %cst_49 = arith.constant 0.000000e+00 : f32
    %71 = vector.broadcast %cst_49 : f32 to vector<8x8x1xf32>
    %72 = arith.minimumf %70, %71 : vector<8x8x1xf32>
    %73 = math.exp %72 : vector<8x8x1xf32>
    %74 = arith.mulf %73, %4 : vector<8x8x1xf32>
    %cst_50 = arith.constant dense<0.000000e+00> : vector<8x1xf32>
    %75 = vector.multi_reduction <add>, %74, %cst_50 [1] : vector<8x8x1xf32> to vector<8x1xf32>
    %76 = vector.shape_cast %75 : vector<8x1xf32> to vector<8x1x1xf32>
    %cst_51 = arith.constant 1.000000e-10 : f32
    %77 = vector.broadcast %cst_51 : f32 to vector<8x1x1xf32>
    %78 = arith.addf %76, %77 : vector<8x1x1xf32>
    %79 = tpu.reciprocal %78 {approx = true} : vector<8x1x1xf32> -> vector<8x1x1xf32>
    %80 = vector.broadcast %79 : vector<8x1x1xf32> to vector<8x8x1xf32>
    %81 = arith.mulf %74, %80 : vector<8x8x1xf32>
    %82 = vector.shape_cast %28 : vector<64x32xf32> to vector<8x8x32xf32>
    %83 = vector.broadcast %81 : vector<8x8x1xf32> to vector<8x8x32xf32>
    %84 = arith.mulf %83, %82 : vector<8x8x32xf32>
    %cst_52 = arith.constant dense<0.000000e+00> : vector<8x32xf32>
    %85 = vector.multi_reduction <add>, %84, %cst_52 [1] : vector<8x8x32xf32> to vector<8x32xf32>
    %86 = arith.truncf %85 : vector<8x32xf32> to vector<8x32xbf16>
    %c0_53 = arith.constant 0 : index
    %c0_54 = arith.constant 0 : index
    %87 = vector.load %arg19[%c0_53, %c0_54] : memref<32x32xbf16, #tpu.memory_space<vmem>>, vector<32x32xbf16>
    %cst_55 = arith.constant dense<0.000000e+00> : vector<8x32xf32>
    %88 = tpu.matmul %86, %87, %cst_55 {dimension_numbers = #tpu.dot_dimension_numbers<[1], [0], [0], [1], [0, 0, 1, 1], [], []>} : vector<8x32xbf16>, vector<32x32xbf16>, vector<8x32xf32> -> vector<8x32xf32>
    %c0_56 = arith.constant 0 : index
    %c0_57 = arith.constant 0 : index
    %89 = vector.load %arg20[%c0_56, %c0_57] : memref<1x32xf32, #tpu.memory_space<vmem>>, vector<1x32xf32>
    %90 = vector.broadcast %89 : vector<1x32xf32> to vector<8x32xf32>
    %91 = arith.addf %88, %90 : vector<8x32xf32>
    %92 = arith.truncf %91 : vector<8x32xf32> to vector<8x32xbf16>
    %cst_58 = arith.constant 0.000000e+00 : bf16
    %93 = vector.broadcast %cst_58 : bf16 to vector<8x32xbf16>
    %94 = arith.maximumf %92, %93 : vector<8x32xbf16>
    %c0_59 = arith.constant 0 : index
    %c0_60 = arith.constant 0 : index
    %95 = vector.load %arg21[%c0_59, %c0_60] : memref<32x128xbf16, #tpu.memory_space<vmem>>, vector<32x128xbf16>
    %cst_61 = arith.constant dense<0.000000e+00> : vector<8x128xf32>
    %96 = tpu.matmul %94, %95, %cst_61 {dimension_numbers = #tpu.dot_dimension_numbers<[1], [0], [0], [1], [0, 0, 1, 1], [], []>} : vector<8x32xbf16>, vector<32x128xbf16>, vector<8x128xf32> -> vector<8x128xf32>
    %c0_62 = arith.constant 0 : index
    %c0_63 = arith.constant 0 : index
    %97 = vector.load %arg22[%c0_62, %c0_63] : memref<1x128xf32, #tpu.memory_space<vmem>>, vector<1x128xf32>
    %98 = vector.broadcast %97 : vector<1x128xf32> to vector<8x128xf32>
    %99 = arith.addf %96, %98 : vector<8x128xf32>
    %cst_64 = arith.constant 0.000000e+00 : f32
    %100 = vector.broadcast %cst_64 : f32 to vector<8x128xf32>
    %101 = arith.maximumf %99, %100 : vector<8x128xf32>
    %c0_65 = arith.constant 0 : index
    %c0_66 = arith.constant 0 : index
    %102 = vector.load %arg23[%c0_65, %c0_66] : memref<8x128xf32, #tpu.memory_space<vmem>>, vector<8x128xf32>
    tpu.vector_store %arg23[%c0_65, %c0_66], %101 {strides = array<i32>} : memref<8x128xf32, #tpu.memory_space<vmem>>, vector<8x128xf32>,
    return
  }
  func.func @transform_0(%arg0: i32) -> (i32, i32) {
    %c0_i32 = arith.constant 0 : i32
    %c0_i32_0 = arith.constant 0 : i32
    return %arg0, %c0_i32 : i32, i32
  }
  func.func @transform_1(%arg0: i32) -> (i32, i32) {
    %c0_i32 = arith.constant 0 : i32
    %c0_i32_0 = arith.constant 0 : i32
    return %arg0, %c0_i32 : i32, i32
  }
  func.func @transform_2(%arg0: i32) -> (i32, i32) {
    %c0_i32 = arith.constant 0 : i32
    %c0_i32_0 = arith.constant 0 : i32
    return %arg0, %c0_i32 : i32, i32
  }
  func.func @transform_3(%arg0: i32) -> (i32, i32) {
    %c0_i32 = arith.constant 0 : i32
    %c0_i32_0 = arith.constant 0 : i32
    return %arg0, %c0_i32 : i32, i32
  }
  func.func @transform_4(%arg0: i32) -> (i32, i32) {
    %c0_i32 = arith.constant 0 : i32
    %c0_i32_0 = arith.constant 0 : i32
    %c0_i32_1 = arith.constant 0 : i32
    return %c0_i32, %c0_i32_0 : i32, i32
  }
  func.func @transform_5(%arg0: i32) -> (i32, i32) {
    %c0_i32 = arith.constant 0 : i32
    %c0_i32_0 = arith.constant 0 : i32
    %c0_i32_1 = arith.constant 0 : i32
    return %c0_i32, %c0_i32_0 : i32, i32
  }
  func.func @transform_6(%arg0: i32) -> (i32, i32) {
    %c0_i32 = arith.constant 0 : i32
    %c0_i32_0 = arith.constant 0 : i32
    %c0_i32_1 = arith.constant 0 : i32
    return %c0_i32, %c0_i32_0 : i32, i32
  }
  func.func @transform_7(%arg0: i32) -> (i32, i32) {
    %c0_i32 = arith.constant 0 : i32
    %c0_i32_0 = arith.constant 0 : i32
    %c0_i32_1 = arith.constant 0 : i32
    return %c0_i32, %c0_i32_0 : i32, i32
  }
  func.func @transform_8(%arg0: i32) -> (i32, i32) {
    %c0_i32 = arith.constant 0 : i32
    %c0_i32_0 = arith.constant 0 : i32
    %c0_i32_1 = arith.constant 0 : i32
    return %c0_i32, %c0_i32_0 : i32, i32
  }
  func.func @transform_9(%arg0: i32) -> (i32, i32) {
    %c0_i32 = arith.constant 0 : i32
    %c0_i32_0 = arith.constant 0 : i32
    %c0_i32_1 = arith.constant 0 : i32
    return %c0_i32, %c0_i32_0 : i32, i32
  }
  func.func @transform_10(%arg0: i32) -> (i32, i32) {
    %c0_i32 = arith.constant 0 : i32
    %c0_i32_0 = arith.constant 0 : i32
    %c0_i32_1 = arith.constant 0 : i32
    return %c0_i32, %c0_i32_0 : i32, i32
  }
  func.func @transform_11(%arg0: i32) -> (i32, i32) {
    %c0_i32 = arith.constant 0 : i32
    %c0_i32_0 = arith.constant 0 : i32
    %c0_i32_1 = arith.constant 0 : i32
    return %c0_i32, %c0_i32_0 : i32, i32
  }
  func.func @transform_12(%arg0: i32) -> (i32, i32) {
    %c0_i32 = arith.constant 0 : i32
    %c0_i32_0 = arith.constant 0 : i32
    %c0_i32_1 = arith.constant 0 : i32
    return %c0_i32, %c0_i32_0 : i32, i32
  }
  func.func @transform_13(%arg0: i32) -> (i32, i32) {
    %c0_i32 = arith.constant 0 : i32
    %c0_i32_0 = arith.constant 0 : i32
    %c0_i32_1 = arith.constant 0 : i32
    return %c0_i32, %c0_i32_0 : i32, i32
  }
  func.func @transform_14(%arg0: i32) -> (i32, i32) {
    %c0_i32 = arith.constant 0 : i32
    %c0_i32_0 = arith.constant 0 : i32
    %c0_i32_1 = arith.constant 0 : i32
    return %c0_i32, %c0_i32_0 : i32, i32
  }
  func.func @transform_15(%arg0: i32) -> (i32, i32) {
    %c0_i32 = arith.constant 0 : i32
    %c0_i32_0 = arith.constant 0 : i32
    %c0_i32_1 = arith.constant 0 : i32
    return %c0_i32, %c0_i32_0 : i32, i32
  }
  func.func @transform_16(%arg0: i32) -> (i32, i32) {
    %c0_i32 = arith.constant 0 : i32
    %c0_i32_0 = arith.constant 0 : i32
    %c0_i32_1 = arith.constant 0 : i32
    return %c0_i32, %c0_i32_0 : i32, i32
  }
  func.func @transform_17(%arg0: i32) -> (i32, i32) {
    %c0_i32 = arith.constant 0 : i32
    %c0_i32_0 = arith.constant 0 : i32
    %c0_i32_1 = arith.constant 0 : i32
    return %c0_i32, %c0_i32_0 : i32, i32
  }
  func.func @transform_18(%arg0: i32) -> (i32, i32) {
    %c0_i32 = arith.constant 0 : i32
    %c0_i32_0 = arith.constant 0 : i32
    %c0_i32_1 = arith.constant 0 : i32
    return %c0_i32, %c0_i32_0 : i32, i32
  }
  func.func @transform_19(%arg0: i32) -> (i32, i32) {
    %c0_i32 = arith.constant 0 : i32
    %c0_i32_0 = arith.constant 0 : i32
    %c0_i32_1 = arith.constant 0 : i32
    return %c0_i32, %c0_i32_0 : i32, i32
  }
  func.func @transform_20(%arg0: i32) -> (i32, i32) {
    %c0_i32 = arith.constant 0 : i32
    %c0_i32_0 = arith.constant 0 : i32
    %c0_i32_1 = arith.constant 0 : i32
    return %c0_i32, %c0_i32_0 : i32, i32
  }
  func.func @transform_21(%arg0: i32) -> (i32, i32) {
    %c0_i32 = arith.constant 0 : i32
    %c0_i32_0 = arith.constant 0 : i32
    %c0_i32_1 = arith.constant 0 : i32
    return %c0_i32, %c0_i32_0 : i32, i32
  }
  func.func @transform_22(%arg0: i32) -> (i32, i32) {
    %c0_i32 = arith.constant 0 : i32
    %c0_i32_0 = arith.constant 0 : i32
    return %arg0, %c0_i32 : i32, i32
  }
}

module attributes {stable_mosaic.version = 11 : i64} {
  func.func @_item_model_kernel(%arg0: i32, %arg1: memref<64x32xbf16, #tpu.memory_space<vmem>>, %arg2: memref<64x32xbf16, #tpu.memory_space<vmem>>, %arg3: memref<8x32xbf16, #tpu.memory_space<vmem>>, %arg4: memref<8x8x1xf32, #tpu.memory_space<vmem>>, %arg5: memref<32x32xbf16, #tpu.memory_space<vmem>>, %arg6: memref<32x32xbf16, #tpu.memory_space<vmem>>, %arg7: memref<1x32xf32, #tpu.memory_space<vmem>>, %arg8: memref<32x16xbf16, #tpu.memory_space<vmem>>, %arg9: memref<1x16xf32, #tpu.memory_space<vmem>>, %arg10: memref<16x32xbf16, #tpu.memory_space<vmem>>, %arg11: memref<1x32xf32, #tpu.memory_space<vmem>>, %arg12: memref<32x32xbf16, #tpu.memory_space<vmem>>, %arg13: memref<16x32xbf16, #tpu.memory_space<vmem>>, %arg14: memref<1x32xf32, #tpu.memory_space<vmem>>, %arg15: memref<32x16xbf16, #tpu.memory_space<vmem>>, %arg16: memref<1x16xf32, #tpu.memory_space<vmem>>, %arg17: memref<1x16xf32, #tpu.memory_space<vmem>>, %arg18: memref<1x1xf32, #tpu.memory_space<vmem>>, %arg19: memref<32x32xbf16, #tpu.memory_space<vmem>>, %arg20: memref<1x32xf32, #tpu.memory_space<vmem>>, %arg21: memref<32x128xbf16, #tpu.memory_space<vmem>>, %arg22: memref<1x128xf32, #tpu.memory_space<vmem>>, %arg23: memref<8x128xf32, #tpu.memory_space<vmem>>) attributes {dimension_semantics = [#tpu.dimension_semantics<parallel>], iteration_bounds = array<i64: 2>, scalar_prefetch = 0 : i64, scratch_operands = 0 : i64, tpu.core_type = #tpu.core_type<tc>, window_params = [{transform_indices = @transform_0, window_bounds = array<i64: 64, 32>}, {transform_indices = @transform_1, window_bounds = array<i64: 64, 32>}, {transform_indices = @transform_2, window_bounds = array<i64: 8, 32>}, {transform_indices = @transform_3, window_bounds = array<i64: 8, 8, 1>}, {pipeline_mode = #tpu.pipeline_mode<synchronous>, transform_indices = @transform_4, window_bounds = array<i64: 32, 32>}, {pipeline_mode = #tpu.pipeline_mode<synchronous>, transform_indices = @transform_5, window_bounds = array<i64: 32, 32>}, {pipeline_mode = #tpu.pipeline_mode<synchronous>, transform_indices = @transform_6, window_bounds = array<i64: 1, 32>}, {pipeline_mode = #tpu.pipeline_mode<synchronous>, transform_indices = @transform_7, window_bounds = array<i64: 32, 16>}, {pipeline_mode = #tpu.pipeline_mode<synchronous>, transform_indices = @transform_8, window_bounds = array<i64: 1, 16>}, {pipeline_mode = #tpu.pipeline_mode<synchronous>, transform_indices = @transform_9, window_bounds = array<i64: 16, 32>}, {pipeline_mode = #tpu.pipeline_mode<synchronous>, transform_indices = @transform_10, window_bounds = array<i64: 1, 32>}, {pipeline_mode = #tpu.pipeline_mode<synchronous>, transform_indices = @transform_11, window_bounds = array<i64: 32, 32>}, {pipeline_mode = #tpu.pipeline_mode<synchronous>, transform_indices = @transform_12, window_bounds = array<i64: 16, 32>}, {pipeline_mode = #tpu.pipeline_mode<synchronous>, transform_indices = @transform_13, window_bounds = array<i64: 1, 32>}, {pipeline_mode = #tpu.pipeline_mode<synchronous>, transform_indices = @transform_14, window_bounds = array<i64: 32, 16>}, {pipeline_mode = #tpu.pipeline_mode<synchronous>, transform_indices = @transform_15, window_bounds = array<i64: 1, 16>}, {pipeline_mode = #tpu.pipeline_mode<synchronous>, transform_indices = @transform_16, window_bounds = array<i64: 1, 16>}, {pipeline_mode = #tpu.pipeline_mode<synchronous>, transform_indices = @transform_17, window_bounds = array<i64: 1, 1>}, {pipeline_mode = #tpu.pipeline_mode<synchronous>, transform_indices = @transform_18, window_bounds = array<i64: 32, 32>}, {pipeline_mode = #tpu.pipeline_mode<synchronous>, transform_indices = @transform_19, window_bounds = array<i64: 1, 32>}, {pipeline_mode = #tpu.pipeline_mode<synchronous>, transform_indices = @transform_20, window_bounds = array<i64: 32, 128>}, {pipeline_mode = #tpu.pipeline_mode<synchronous>, transform_indices = @transform_21, window_bounds = array<i64: 1, 128>}, {transform_indices = @transform_22, window_bounds = array<i64: 8, 128>}]} {
    %c0 = arith.constant 0 : index
    %c0_0 = arith.constant 0 : index
    %0 = vector.load %arg1[%c0, %c0_0] : memref<64x32xbf16, #tpu.memory_space<vmem>>, vector<64x32xbf16>
    %c0_1 = arith.constant 0 : index
    %c0_2 = arith.constant 0 : index
    %1 = vector.load %arg2[%c0_1, %c0_2] : memref<64x32xbf16, #tpu.memory_space<vmem>>, vector<64x32xbf16>
    %c0_3 = arith.constant 0 : index
    %c0_4 = arith.constant 0 : index
    %2 = vector.load %arg3[%c0_3, %c0_4] : memref<8x32xbf16, #tpu.memory_space<vmem>>, vector<8x32xbf16>
    %c0_5 = arith.constant 0 : index
    %c0_6 = arith.constant 0 : index
    %c0_7 = arith.constant 0 : index
    %3 = vector.load %arg4[%c0_5, %c0_6, %c0_7] : memref<8x8x1xf32, #tpu.memory_space<vmem>>, vector<8x8x1xf32>
    %c0_8 = arith.constant 0 : index
    %c0_9 = arith.constant 0 : index
    %4 = vector.load %arg5[%c0_8, %c0_9] : memref<32x32xbf16, #tpu.memory_space<vmem>>, vector<32x32xbf16>
    %cst = arith.constant dense<0.000000e+00> : vector<64x32xf32>
    %5 = tpu.matmul %0, %4, %cst {dimension_numbers = #tpu.dot_dimension_numbers<[1], [0], [0], [1], [0, 0, 1, 1], [], []>} : vector<64x32xbf16>, vector<32x32xbf16>, vector<64x32xf32> -> vector<64x32xf32>
    %c0_10 = arith.constant 0 : index
    %c0_11 = arith.constant 0 : index
    %6 = vector.load %arg6[%c0_10, %c0_11] : memref<32x32xbf16, #tpu.memory_space<vmem>>, vector<32x32xbf16>
    %cst_12 = arith.constant dense<0.000000e+00> : vector<64x32xf32>
    %7 = tpu.matmul %1, %6, %cst_12 {dimension_numbers = #tpu.dot_dimension_numbers<[1], [0], [0], [1], [0, 0, 1, 1], [], []>} : vector<64x32xbf16>, vector<32x32xbf16>, vector<64x32xf32> -> vector<64x32xf32>
    %8 = arith.addf %5, %7 : vector<64x32xf32>
    %c0_13 = arith.constant 0 : index
    %c0_14 = arith.constant 0 : index
    %9 = vector.load %arg7[%c0_13, %c0_14] : memref<1x32xf32, #tpu.memory_space<vmem>>, vector<1x32xf32>
    %10 = vector.broadcast %9 : vector<1x32xf32> to vector<64x32xf32>
    %11 = arith.addf %8, %10 : vector<64x32xf32>
    %12 = arith.truncf %11 : vector<64x32xf32> to vector<64x32xbf16>
    %cst_15 = arith.constant 0.000000e+00 : bf16
    %13 = vector.broadcast %cst_15 : bf16 to vector<64x32xbf16>
    %14 = arith.maximumf %12, %13 : vector<64x32xbf16>
    %c0_16 = arith.constant 0 : index
    %c0_17 = arith.constant 0 : index
    %15 = vector.load %arg8[%c0_16, %c0_17] : memref<32x16xbf16, #tpu.memory_space<vmem>>, vector<32x16xbf16>
    %cst_18 = arith.constant dense<0.000000e+00> : vector<64x16xf32>
    %16 = tpu.matmul %14, %15, %cst_18 {dimension_numbers = #tpu.dot_dimension_numbers<[1], [0], [0], [1], [0, 0, 1, 1], [], []>} : vector<64x32xbf16>, vector<32x16xbf16>, vector<64x16xf32> -> vector<64x16xf32>
    %c0_19 = arith.constant 0 : index
    %c0_20 = arith.constant 0 : index
    %17 = vector.load %arg9[%c0_19, %c0_20] : memref<1x16xf32, #tpu.memory_space<vmem>>, vector<1x16xf32>
    %18 = vector.broadcast %17 : vector<1x16xf32> to vector<64x16xf32>
    %19 = arith.addf %16, %18 : vector<64x16xf32>
    %20 = arith.truncf %19 : vector<64x16xf32> to vector<64x16xbf16>
    %cst_21 = arith.constant 0.000000e+00 : bf16
    %21 = vector.broadcast %cst_21 : bf16 to vector<64x16xbf16>
    %22 = arith.maximumf %20, %21 : vector<64x16xbf16>
    %c0_22 = arith.constant 0 : index
    %c0_23 = arith.constant 0 : index
    %23 = vector.load %arg10[%c0_22, %c0_23] : memref<16x32xbf16, #tpu.memory_space<vmem>>, vector<16x32xbf16>
    %cst_24 = arith.constant dense<0.000000e+00> : vector<64x32xf32>
    %24 = tpu.matmul %22, %23, %cst_24 {dimension_numbers = #tpu.dot_dimension_numbers<[1], [0], [0], [1], [0, 0, 1, 1], [], []>} : vector<64x16xbf16>, vector<16x32xbf16>, vector<64x32xf32> -> vector<64x32xf32>
    %c0_25 = arith.constant 0 : index
    %c0_26 = arith.constant 0 : index
    %25 = vector.load %arg11[%c0_25, %c0_26] : memref<1x32xf32, #tpu.memory_space<vmem>>, vector<1x32xf32>
    %26 = vector.broadcast %25 : vector<1x32xf32> to vector<64x32xf32>
    %27 = arith.addf %24, %26 : vector<64x32xf32>
    %c0_27 = arith.constant 0 : index
    %c0_28 = arith.constant 0 : index
    %28 = vector.load %arg12[%c0_27, %c0_28] : memref<32x32xbf16, #tpu.memory_space<vmem>>, vector<32x32xbf16>
    %cst_29 = arith.constant dense<0.000000e+00> : vector<8x32xf32>
    %29 = tpu.matmul %2, %28, %cst_29 {dimension_numbers = #tpu.dot_dimension_numbers<[1], [0], [0], [1], [0, 0, 1, 1], [], []>} : vector<8x32xbf16>, vector<32x32xbf16>, vector<8x32xf32> -> vector<8x32xf32>
    %c0_30 = arith.constant 0 : index
    %c0_31 = arith.constant 0 : index
    %30 = vector.load %arg13[%c0_30, %c0_31] : memref<16x32xbf16, #tpu.memory_space<vmem>>, vector<16x32xbf16>
    %cst_32 = arith.constant dense<0.000000e+00> : vector<64x32xf32>
    %31 = tpu.matmul %22, %30, %cst_32 {dimension_numbers = #tpu.dot_dimension_numbers<[1], [0], [0], [1], [0, 0, 1, 1], [], []>} : vector<64x16xbf16>, vector<16x32xbf16>, vector<64x32xf32> -> vector<64x32xf32>
    %32 = vector.shape_cast %31 : vector<64x32xf32> to vector<8x8x32xf32>
    %33 = vector.shape_cast %29 : vector<8x32xf32> to vector<8x1x32xf32>
    %34 = vector.broadcast %33 : vector<8x1x32xf32> to vector<8x8x32xf32>
    %35 = arith.addf %32, %34 : vector<8x8x32xf32>
    %c0_33 = arith.constant 0 : index
    %c0_34 = arith.constant 0 : index
    %36 = vector.load %arg14[%c0_33, %c0_34] : memref<1x32xf32, #tpu.memory_space<vmem>>, vector<1x32xf32>
    %37 = vector.shape_cast %36 : vector<1x32xf32> to vector<1x1x32xf32>
    %38 = vector.broadcast %37 : vector<1x1x32xf32> to vector<8x8x32xf32>
    %39 = arith.addf %35, %38 : vector<8x8x32xf32>
    %40 = arith.truncf %39 : vector<8x8x32xf32> to vector<8x8x32xbf16>
    %cst_35 = arith.constant 0.000000e+00 : bf16
    %41 = vector.broadcast %cst_35 : bf16 to vector<8x8x32xbf16>
    %42 = arith.maximumf %40, %41 : vector<8x8x32xbf16>
    %43 = vector.shape_cast %42 : vector<8x8x32xbf16> to vector<64x32xbf16>
    %c0_36 = arith.constant 0 : index
    %c0_37 = arith.constant 0 : index
    %44 = vector.load %arg15[%c0_36, %c0_37] : memref<32x16xbf16, #tpu.memory_space<vmem>>, vector<32x16xbf16>
    %cst_38 = arith.constant dense<0.000000e+00> : vector<64x16xf32>
    %45 = tpu.matmul %43, %44, %cst_38 {dimension_numbers = #tpu.dot_dimension_numbers<[1], [0], [0], [1], [0, 0, 1, 1], [], []>} : vector<64x32xbf16>, vector<32x16xbf16>, vector<64x16xf32> -> vector<64x16xf32>
    %c0_39 = arith.constant 0 : index
    %c0_40 = arith.constant 0 : index
    %46 = vector.load %arg16[%c0_39, %c0_40] : memref<1x16xf32, #tpu.memory_space<vmem>>, vector<1x16xf32>
    %47 = vector.broadcast %46 : vector<1x16xf32> to vector<64x16xf32>
    %48 = arith.addf %45, %47 : vector<64x16xf32>
    %49 = arith.truncf %48 : vector<64x16xf32> to vector<64x16xbf16>
    %cst_41 = arith.constant 0.000000e+00 : bf16
    %50 = vector.broadcast %cst_41 : bf16 to vector<64x16xbf16>
    %51 = arith.maximumf %49, %50 : vector<64x16xbf16>
    %52 = arith.extf %51 : vector<64x16xbf16> to vector<64x16xf32>
    %c0_42 = arith.constant 0 : index
    %c0_43 = arith.constant 0 : index
    %53 = vector.load %arg17[%c0_42, %c0_43] : memref<1x16xf32, #tpu.memory_space<vmem>>, vector<1x16xf32>
    %54 = vector.broadcast %53 : vector<1x16xf32> to vector<64x16xf32>
    %55 = arith.mulf %52, %54 : vector<64x16xf32>
    %cst_44 = arith.constant dense<0.000000e+00> : vector<64xf32>
    %56 = vector.multi_reduction <add>, %55, %cst_44 [1] : vector<64x16xf32> to vector<64xf32>
    %57 = vector.shape_cast %56 : vector<64xf32> to vector<64x1xf32>
    %c0_45 = arith.constant 0 : index
    %c0_46 = arith.constant 0 : index
    %58 = vector.load %arg18[%c0_45, %c0_46] : memref<1x1xf32, #tpu.memory_space<vmem>>, vector<1x1xf32>
    %59 = vector.broadcast %58 : vector<1x1xf32> to vector<64x1xf32>
    %60 = arith.addf %57, %59 : vector<64x1xf32>
    %61 = vector.shape_cast %60 : vector<64x1xf32> to vector<8x8x1xf32>
    %cst_47 = arith.constant 0.000000e+00 : f32
    %62 = vector.broadcast %cst_47 : f32 to vector<8x8x1xf32>
    %63 = arith.cmpf ogt, %3, %62 : vector<8x8x1xf32>
    %cst_48 = arith.constant -1.000000e+30 : f32
    %64 = vector.broadcast %cst_48 : f32 to vector<8x8x1xf32>
    %65 = arith.select %63, %61, %64 : vector<8x8x1xi1>, vector<8x8x1xf32>
    %cst_49 = arith.constant dense<0xFF800000> : vector<8x1xf32>
    %66 = vector.multi_reduction <maximumf>, %65, %cst_49 [1] : vector<8x8x1xf32> to vector<8x1xf32>
    %67 = vector.shape_cast %66 : vector<8x1xf32> to vector<8x1x1xf32>
    %68 = vector.broadcast %67 : vector<8x1x1xf32> to vector<8x8x1xf32>
    %69 = arith.subf %61, %68 : vector<8x8x1xf32>
    %cst_50 = arith.constant 0.000000e+00 : f32
    %70 = vector.broadcast %cst_50 : f32 to vector<8x8x1xf32>
    %71 = arith.minimumf %69, %70 : vector<8x8x1xf32>
    %72 = math.exp %71 : vector<8x8x1xf32>
    %73 = arith.mulf %72, %3 : vector<8x8x1xf32>
    %cst_51 = arith.constant dense<0.000000e+00> : vector<8x1xf32>
    %74 = vector.multi_reduction <add>, %73, %cst_51 [1] : vector<8x8x1xf32> to vector<8x1xf32>
    %75 = vector.shape_cast %74 : vector<8x1xf32> to vector<8x1x1xf32>
    %cst_52 = arith.constant 1.000000e-10 : f32
    %76 = vector.broadcast %cst_52 : f32 to vector<8x1x1xf32>
    %77 = arith.addf %75, %76 : vector<8x1x1xf32>
    %78 = tpu.reciprocal %77 {approx = true} : vector<8x1x1xf32> -> vector<8x1x1xf32>
    %79 = vector.broadcast %78 : vector<8x1x1xf32> to vector<8x8x1xf32>
    %80 = arith.mulf %73, %79 : vector<8x8x1xf32>
    %81 = vector.shape_cast %27 : vector<64x32xf32> to vector<8x8x32xf32>
    %82 = vector.broadcast %80 : vector<8x8x1xf32> to vector<8x8x32xf32>
    %83 = arith.mulf %82, %81 : vector<8x8x32xf32>
    %cst_53 = arith.constant dense<0.000000e+00> : vector<8x32xf32>
    %84 = vector.multi_reduction <add>, %83, %cst_53 [1] : vector<8x8x32xf32> to vector<8x32xf32>
    %85 = arith.truncf %84 : vector<8x32xf32> to vector<8x32xbf16>
    %c0_54 = arith.constant 0 : index
    %c0_55 = arith.constant 0 : index
    %86 = vector.load %arg19[%c0_54, %c0_55] : memref<32x32xbf16, #tpu.memory_space<vmem>>, vector<32x32xbf16>
    %cst_56 = arith.constant dense<0.000000e+00> : vector<8x32xf32>
    %87 = tpu.matmul %85, %86, %cst_56 {dimension_numbers = #tpu.dot_dimension_numbers<[1], [0], [0], [1], [0, 0, 1, 1], [], []>} : vector<8x32xbf16>, vector<32x32xbf16>, vector<8x32xf32> -> vector<8x32xf32>
    %c0_57 = arith.constant 0 : index
    %c0_58 = arith.constant 0 : index
    %88 = vector.load %arg20[%c0_57, %c0_58] : memref<1x32xf32, #tpu.memory_space<vmem>>, vector<1x32xf32>
    %89 = vector.broadcast %88 : vector<1x32xf32> to vector<8x32xf32>
    %90 = arith.addf %87, %89 : vector<8x32xf32>
    %91 = arith.truncf %90 : vector<8x32xf32> to vector<8x32xbf16>
    %cst_59 = arith.constant 0.000000e+00 : bf16
    %92 = vector.broadcast %cst_59 : bf16 to vector<8x32xbf16>
    %93 = arith.maximumf %91, %92 : vector<8x32xbf16>
    %c0_60 = arith.constant 0 : index
    %c0_61 = arith.constant 0 : index
    %94 = vector.load %arg21[%c0_60, %c0_61] : memref<32x128xbf16, #tpu.memory_space<vmem>>, vector<32x128xbf16>
    %cst_62 = arith.constant dense<0.000000e+00> : vector<8x128xf32>
    %95 = tpu.matmul %93, %94, %cst_62 {dimension_numbers = #tpu.dot_dimension_numbers<[1], [0], [0], [1], [0, 0, 1, 1], [], []>} : vector<8x32xbf16>, vector<32x128xbf16>, vector<8x128xf32> -> vector<8x128xf32>
    %c0_63 = arith.constant 0 : index
    %c0_64 = arith.constant 0 : index
    %96 = vector.load %arg22[%c0_63, %c0_64] : memref<1x128xf32, #tpu.memory_space<vmem>>, vector<1x128xf32>
    %97 = vector.broadcast %96 : vector<1x128xf32> to vector<8x128xf32>
    %98 = arith.addf %95, %97 : vector<8x128xf32>
    %cst_65 = arith.constant 0.000000e+00 : f32
    %99 = vector.broadcast %cst_65 : f32 to vector<8x128xf32>
    %100 = arith.maximumf %98, %99 : vector<8x128xf32>
    %c0_66 = arith.constant 0 : index
    %c0_67 = arith.constant 0 : index
    %101 = vector.load %arg23[%c0_66, %c0_67] : memref<8x128xf32, #tpu.memory_space<vmem>>, vector<8x128xf32>
    tpu.vector_store %arg23[%c0_66, %c0_67], %100 {strides = array<i32>} : memref<8x128xf32, #tpu.memory_space<vmem>>, vector<8x128xf32>,
    return
  }
  func.func @transform_0(%arg0: i32) -> (i32, i32) {
    %c0_i32 = arith.constant 0 : i32
    %c0_i32_0 = arith.constant 0 : i32
    return %arg0, %c0_i32 : i32, i32
  }
  func.func @transform_1(%arg0: i32) -> (i32, i32) {
    %c0_i32 = arith.constant 0 : i32
    %c0_i32_0 = arith.constant 0 : i32
    return %arg0, %c0_i32 : i32, i32
  }
  func.func @transform_2(%arg0: i32) -> (i32, i32) {
    %c0_i32 = arith.constant 0 : i32
    %c0_i32_0 = arith.constant 0 : i32
    return %arg0, %c0_i32 : i32, i32
  }
  func.func @transform_3(%arg0: i32) -> (i32, i32, i32) {
    %c0_i32 = arith.constant 0 : i32
    %c0_i32_0 = arith.constant 0 : i32
    %c0_i32_1 = arith.constant 0 : i32
    return %arg0, %c0_i32, %c0_i32_0 : i32, i32, i32
  }
  func.func @transform_4(%arg0: i32) -> (i32, i32) {
    %c0_i32 = arith.constant 0 : i32
    %c0_i32_0 = arith.constant 0 : i32
    %c0_i32_1 = arith.constant 0 : i32
    return %c0_i32, %c0_i32_0 : i32, i32
  }
  func.func @transform_5(%arg0: i32) -> (i32, i32) {
    %c0_i32 = arith.constant 0 : i32
    %c0_i32_0 = arith.constant 0 : i32
    %c0_i32_1 = arith.constant 0 : i32
    return %c0_i32, %c0_i32_0 : i32, i32
  }
  func.func @transform_6(%arg0: i32) -> (i32, i32) {
    %c0_i32 = arith.constant 0 : i32
    %c0_i32_0 = arith.constant 0 : i32
    %c0_i32_1 = arith.constant 0 : i32
    return %c0_i32, %c0_i32_0 : i32, i32
  }
  func.func @transform_7(%arg0: i32) -> (i32, i32) {
    %c0_i32 = arith.constant 0 : i32
    %c0_i32_0 = arith.constant 0 : i32
    %c0_i32_1 = arith.constant 0 : i32
    return %c0_i32, %c0_i32_0 : i32, i32
  }
  func.func @transform_8(%arg0: i32) -> (i32, i32) {
    %c0_i32 = arith.constant 0 : i32
    %c0_i32_0 = arith.constant 0 : i32
    %c0_i32_1 = arith.constant 0 : i32
    return %c0_i32, %c0_i32_0 : i32, i32
  }
  func.func @transform_9(%arg0: i32) -> (i32, i32) {
    %c0_i32 = arith.constant 0 : i32
    %c0_i32_0 = arith.constant 0 : i32
    %c0_i32_1 = arith.constant 0 : i32
    return %c0_i32, %c0_i32_0 : i32, i32
  }
  func.func @transform_10(%arg0: i32) -> (i32, i32) {
    %c0_i32 = arith.constant 0 : i32
    %c0_i32_0 = arith.constant 0 : i32
    %c0_i32_1 = arith.constant 0 : i32
    return %c0_i32, %c0_i32_0 : i32, i32
  }
  func.func @transform_11(%arg0: i32) -> (i32, i32) {
    %c0_i32 = arith.constant 0 : i32
    %c0_i32_0 = arith.constant 0 : i32
    %c0_i32_1 = arith.constant 0 : i32
    return %c0_i32, %c0_i32_0 : i32, i32
  }
  func.func @transform_12(%arg0: i32) -> (i32, i32) {
    %c0_i32 = arith.constant 0 : i32
    %c0_i32_0 = arith.constant 0 : i32
    %c0_i32_1 = arith.constant 0 : i32
    return %c0_i32, %c0_i32_0 : i32, i32
  }
  func.func @transform_13(%arg0: i32) -> (i32, i32) {
    %c0_i32 = arith.constant 0 : i32
    %c0_i32_0 = arith.constant 0 : i32
    %c0_i32_1 = arith.constant 0 : i32
    return %c0_i32, %c0_i32_0 : i32, i32
  }
  func.func @transform_14(%arg0: i32) -> (i32, i32) {
    %c0_i32 = arith.constant 0 : i32
    %c0_i32_0 = arith.constant 0 : i32
    %c0_i32_1 = arith.constant 0 : i32
    return %c0_i32, %c0_i32_0 : i32, i32
  }
  func.func @transform_15(%arg0: i32) -> (i32, i32) {
    %c0_i32 = arith.constant 0 : i32
    %c0_i32_0 = arith.constant 0 : i32
    %c0_i32_1 = arith.constant 0 : i32
    return %c0_i32, %c0_i32_0 : i32, i32
  }
  func.func @transform_16(%arg0: i32) -> (i32, i32) {
    %c0_i32 = arith.constant 0 : i32
    %c0_i32_0 = arith.constant 0 : i32
    %c0_i32_1 = arith.constant 0 : i32
    return %c0_i32, %c0_i32_0 : i32, i32
  }
  func.func @transform_17(%arg0: i32) -> (i32, i32) {
    %c0_i32 = arith.constant 0 : i32
    %c0_i32_0 = arith.constant 0 : i32
    %c0_i32_1 = arith.constant 0 : i32
    return %c0_i32, %c0_i32_0 : i32, i32
  }
  func.func @transform_18(%arg0: i32) -> (i32, i32) {
    %c0_i32 = arith.constant 0 : i32
    %c0_i32_0 = arith.constant 0 : i32
    %c0_i32_1 = arith.constant 0 : i32
    return %c0_i32, %c0_i32_0 : i32, i32
  }
  func.func @transform_19(%arg0: i32) -> (i32, i32) {
    %c0_i32 = arith.constant 0 : i32
    %c0_i32_0 = arith.constant 0 : i32
    %c0_i32_1 = arith.constant 0 : i32
    return %c0_i32, %c0_i32_0 : i32, i32
  }
  func.func @transform_20(%arg0: i32) -> (i32, i32) {
    %c0_i32 = arith.constant 0 : i32
    %c0_i32_0 = arith.constant 0 : i32
    %c0_i32_1 = arith.constant 0 : i32
    return %c0_i32, %c0_i32_0 : i32, i32
  }
  func.func @transform_21(%arg0: i32) -> (i32, i32) {
    %c0_i32 = arith.constant 0 : i32
    %c0_i32_0 = arith.constant 0 : i32
    %c0_i32_1 = arith.constant 0 : i32
    return %c0_i32, %c0_i32_0 : i32, i32
  }
  func.func @transform_22(%arg0: i32) -> (i32, i32) {
    %c0_i32 = arith.constant 0 : i32
    %c0_i32_0 = arith.constant 0 : i32
    return %arg0, %c0_i32 : i32, i32
  }
}

</mosaic_0001>

<bundles_post_ra>
// kernel: tpu_custom_call.1
= control target key start
LH: loop header
LB: loop body
LE: loop exit
PB: predicated region body
PF: predicated region fallthrough
CT: control target
= control target key end

     0   :  { %s2764_s0 = inlined_call_operand.vmem [shape: bf16[128,32], index: 0, kind: input, shape index: {}]   ;;  %s2765_s1 = inlined_call_operand.vmem [shape: bf16[128,32], index: 1, kind: input, shape index: {}]   ;;  %s2766_s2 = inlined_call_operand.vmem [shape: bf16[16,32], index: 2, kind: input, shape index: {}]   ;;  %s2767_s3 = inlined_call_operand.vmem [shape: f32[16,8], index: 3, kind: input, shape index: {}]   ;;  %s2768_s4 = inlined_call_operand.vmem [shape: bf16[32,32], index: 4, kind: input, shape index: {}]   ;;  %s2769_s5 = inlined_call_operand.vmem [shape: bf16[32,32], index: 5, kind: input, shape index: {}]   ;;  %s2770_s6 = inlined_call_operand.vmem [shape: f32[1,32], index: 6, kind: input, shape index: {}]   ;;  %s2771_s7 = inlined_call_operand.vmem [shape: bf16[32,16], index: 7, kind: input, shape index: {}]   ;;  %s2772_s8 = inlined_call_operand.vmem [shape: f32[1,16], index: 8, kind: input, shape index: {}]   ;;  %s2773_s9 = inlined_call_operand.vmem [shape: bf16[16,32], index: 9, kind: input, shape index: {}]   ;;  %s2774_s10 = inlined_call_operand.vmem [shape: f32[1,32], index: 10, kind: input, shape index: {}]   ;;  %s2775_s11 = inlined_call_operand.vmem [shape: bf16[32,32], index: 11, kind: input, shape index: {}]   ;;  %s2776_s12 = inlined_call_operand.vmem [shape: bf16[16,32], index: 12, kind: input, shape index: {}]   ;;  %s2777_s13 = inlined_call_operand.vmem [shape: f32[1,32], index: 13, kind: input, shape index: {}]   ;;  %s2778_s14 = inlined_call_operand.vmem [shape: bf16[32,16], index: 14, kind: input, shape index: {}]   ;;  %s2779_s15 = inlined_call_operand.vmem [shape: f32[1,16], index: 15, kind: input, shape index: {}]   ;;  %s2780_s16 = inlined_call_operand.vmem [shape: f32[1,16], index: 16, kind: input, shape index: {}]   ;;  %s2781_s17 = inlined_call_operand.<no memory space> [shape: f32[1,1], index: 17, kind: input, shape index: {}]   ;;  %s2782_s18 = inlined_call_operand.vmem [shape: bf16[32,32], index: 18, kind: input, shape index: {}]   ;;  %s2783_s19 = inlined_call_operand.vmem [shape: f32[1,32], index: 19, kind: input, shape index: {}]   ;;  %s2784_s20 = inlined_call_operand.vmem [shape: bf16[32,128], index: 20, kind: input, shape index: {}]   ;;  %s2785_s21 = inlined_call_operand.vmem [shape: f32[1,128], index: 21, kind: input, shape index: {}]   ;;  %s2786_s22 = inlined_call_operand.hbm [shape: f32[16,128], index: 22, kind: output, shape index: {}]  }
   0x1   :  { %2796 = sst [smem:[#allocation11_spill]] %s2764_s0  ;;  %v27_v0 = vstv %s2781_s17 }
   0x2   :  { %2797 = sst [smem:[#allocation12_spill]] %s2765_s1  ;;  %28 = vst [vmem:[#allocation2] sm:$0x1] %v27_v0 }
   0x3   :  { %2798 = sst [smem:[#allocation13_spill]] %s2766_s2 }
   0x4   :  { %2799 = sst [smem:[#allocation14_spill]] %s2767_s3 }
   0x5   :  { %2800 = sst [smem:[#allocation15_spill]] %s2768_s4 }
   0x6   :  { %2801 = sst [smem:[#allocation16_spill]] %s2769_s5 }
   0x7   :  { %2802 = sst [smem:[#allocation17_spill]] %s2770_s6 }
   0x8   :  { %2803 = sst [smem:[#allocation18_spill]] %s2771_s7 }
   0x9   :  { %29 = vsyncpa [#allocation4], 0 }
   0xa   :  { %31 = vsyncpa [#allocation4 + $0x1], 0  ;;  %s2430_s29 = smov 0   ;;  %s2432_s30 = smov 0  }
   0xb   :  { %s2434_s4 = smov 0   ;;  %s2436_s0 = smov 0  }
   0xc LB: > { %2804 = sst [smem:[#allocation6_spill]] %s2297_s29  ;;  %s2451_s17 = sadd.s32 4294967295, %s2309_s0   ;;  %s2309_s0 = sphi %s2436_s0, %s2821_s0   ;;  %s2305_s4 = sphi %s2434_s4, %s2823_s4   ;;  %s2301_s30 = sphi %s2432_s30, %s2825_s30   ;;  %s2297_s29 = sphi %s2430_s29, %s2824_s29  }
   0xd   : > { %2805 = sst [smem:[#allocation7_spill]] %s2305_s4  ;;  %s1994_s23 = sadd.s32 4294967294, %s2309_s0  }
   0xe   : > { %s2455_s1 = sadd.s32 1, %s2309_s0   ;;  %s526_s5 = sadd.s32 1, %s2305_s4 }
   0xf   : > { %2806 = sst [smem:[#allocation8_spill]] %s2455_s1  ;;  %s523_s24 = ssub.s32 %s2309_s0, %s2455_s1 }
  0x10   : > { %p536_p0 = scmp.ne.s32.totalorder %s2305_s4, %s2301_s30  ;;  %p524_p1 = scmp.eq.s32.totalorder %s523_s24, 0 }
  0x11   : > { %p537_p2 = scmp.eq.s32.totalorder %s2451_s17, 1  ;;  %p542_p3 = scmp.ne.s32.totalorder %s2301_s30, %s2297_s29 }
  0x12   : > { %p543_p4 = scmp.eq.s32.totalorder %s1994_s23, 1  ;;  %p1997_p7 = scmp.ge.s32.totalorder %s2309_s0, 1 }
  0x13   : > { %s2466_s6 = scalar_select %p524_p1, %s2305_s4, %s526_s5  }
  0x14   : > { %p2468_p5 = por %p537_p2, %p536_p0  ;;  %p2472_p6 = por %p543_p4, %p542_p3 }
  0x15   : > { %2807 = sst [smem:[#allocation9_spill]] %s2466_s6  ;;  %p647_p8 = scmp.lt.s32.totalorder %s2309_s0, 3 }
  0x16   : > { %s2809_s26 = scalar_select %p2472_p6, 1, 0 }
  0x17   : > { %p648_p9 = pnand %p1997_p7, %p647_p8 }
  0x18   : > { %2810 = sst [smem:[#allocation10_spill]] %s2809_s26  ;;  %s2488_s4 = sshll.u32 (!%p648_p9), %s2451_s17, 3 }
  0x19   : > { %651 = sbr.rel (%p648_p9) target bundleno = 1318 (0x526), region = 108  ;;  %s2811_s3 = sld [smem:[#allocation16_spill]] (!%p648_p9) }
  0x1a   : > { %s2812_s5 = sld [smem:[#allocation15_spill]] (!%p648_p9)  ;;  %p723_p10 = scmp.lt.s32.totalorder (!%p648_p9), %s2488_s4, 15 }
  0x1b   : > { %s2813_s23 = sld [smem:[#allocation12_spill]] (!%p648_p9)  ;;  %p734_p11 = scmp.lt.s32.totalorder (!%p648_p9), %s2451_s17, 1 }
  0x1c   : > { %s2814_s1 = sld [smem:[#allocation11_spill]] (!%p648_p9) }
  0x1d   : > { %s2815_s7 = sld [smem:[#allocation18_spill]] (!%p648_p9) }
  0x1e   : > { %s724_s2 = scalar_select %p723_p10, %s2488_s4, 15  ;;  %vm857_vm0 = vcmask 261120   ;;  %v2146_v40 = vld [vmem:[%s2773_s9] sm:$0xff]  ;;  %v2148_v62 = vld [vmem:[%s2775_s11 + $0x8] sm:$0xff]  ;;  %vm1113_vm1 = vcmask 130048   ;;  %vm1485_vm2 = vcmask 7168  }
  0x1f   : > { %v2143_v1 = vld [vmem:[%s2811_s3 + $0x8] sm:$0xff]  ;;  %v2142_v3 = vld [vmem:[%s2811_s3] sm:$0xff]  ;;  %s2827_s17 = smov (!%p734_p11, %s2451_s17), 1  ;;  %s2817_s29 = sld [smem:[#allocation13_spill]]  ;;  %vm1798_vm11 = vcmask 1041409   ;;  %vm1800_vm12 = vcmask 1042434  }
  0x20   : > { %v2141_v2 = vld [vmem:[%s2812_s5 + $0x8] sm:$0xff]  ;;  %v2140_v4 = vld [vmem:[%s2812_s5] sm:$0xff]  ;;  %876 = vmatpush.bf16.msra.mxu0 %v2143_v1  ;;  %2156 = vmatpush.bf16.msra.mxu2 %v2143_v1  ;;  %s2000_s27 = sshll.u32 %s724_s2, 2  ;;  %vm1802_vm13 = vcmask 1043459   ;;  %vm1804_vm14 = vcmask 1044484   ;;  %vm1806_vm15 = vcmask 1045509  }
  0x21   : > { %949 = vmatpush.bf16.msra.mxu1 %v2141_v2  ;;  %2158 = vmatpush.bf16.msra.mxu3 %v2141_v2  ;;  %s732_s24 = scalar_lea.vmem %s2813_s23, %s2000_s27  ;;  %s2816_s23 = sld [smem:[#allocation17_spill]]  ;;  %v2149_v61 = vld [vmem:[%s2776_s12] sm:$0xff] }
  0x22   : > { %s726_s26 = scalar_lea.vmem %s2814_s1, %s2000_s27  ;;  %v2136_v5 = vld [vmem:[%s732_s24] sm:$0xff]  ;;  %v2139_v7 = vld [vmem:[%s732_s24 + $0x18] sm:$0xff]  ;;  %v2137_v9 = vld [vmem:[%s732_s24 + $0x8] sm:$0xff]  ;;  %s2004_s1 = sshll.u32 %s2827_s17, 3 }
  0x23   : > { %v2132_v6 = vld [vmem:[%s726_s26] sm:$0xff]  ;;  %v2135_v8 = vld [vmem:[%s726_s26 + $0x18] sm:$0xff]  ;;  %v2133_v10 = vld [vmem:[%s726_s26 + $0x8] sm:$0xff] }
  0x24   : > { %877 = vmatpush.bf16.msra.mxu0 %v2142_v3  ;;  %2157 = vmatpush.bf16.msra.mxu2 %v2142_v3  ;;  %v2138_v11 = vld [vmem:[%s732_s24 + $0x10] sm:$0xff]  ;;  %v2145_v13 = vld [vmem:[%s2815_s7 + $0x8] sm:$0xff]  ;;  %v2144_v14 = vld [vmem:[%s2815_s7] sm:$0xff]  ;;  %s2003_s24 = sshll.u32 %s2827_s17, 2  ;;  %s1894_s17 = scalar_lea.hbm %s2786_s22, %s2488_s4 }
  0x25   : > { %950 = vmatpush.bf16.msra.mxu1 %v2140_v4  ;;  %2159 = vmatpush.bf16.msra.mxu3 %v2140_v4  ;;  %v2134_v12 = vld [vmem:[%s726_s26 + $0x10] sm:$0xff]  ;;  %v2207_v0 = vld [vmem:[%s2772_s8] ss:$0 sm:$0xff]  ;;  %s737_s3 = scalar_lea.vmem %s2817_s29, %s2003_s24  ;;  %s719_s24 = sand.u32 1, %s2301_s30  }
  0x26   : > { %s1898_s6 = sshll.u32 %s1894_s17, 4  ;;  %s2267_s4 = scalar_lea.hbm %s2786_s22, 16  ;;  %s1899_s6 = int_to_ptr.hbm [resolvable:$true] %s1898_s6 }
  0x27   : > { %2029 = vmatmul.msk.bf16.vlgmr.msra.gmra.mxu0 %vm857_vm0, %v2136_v5  ;;  %2032 = vmatmul.msk.bf16.vlgmr.msra.gmra.mxu2 %vm857_vm0, %v2139_v7  ;;  %v2206_v18 = vld [vmem:[%s2816_s23] ss:$0 sm:$0xff]  ;;  %s1884_s23 = scalar_lea.sflag [#allocation4], %s719_s24  ;;  %s2261_s5 = sshra.s32 %s1899_s6, 4  ;;  %s2262_s5 = int_to_ptr.hbm [resolvable:$true] %s2261_s5 }
  0x28   : > { %2057 = vmatmul.msk.bf16.vlgmr.msra.gmra.mxu1 %vm857_vm0, %v2132_v6  ;;  %2060 = vmatmul.msk.bf16.vlgmr.msra.gmra.mxu3 %vm857_vm0, %v2135_v8  ;;  %v2147_v7 = vld [vmem:[%s2775_s11] sm:$0xff]  ;;  %s2263_s7 = scalar_lea.hbm %s2262_s5, 8  ;;  %p2268_p1 = scmp.lt.s32.totalorder %s2262_s5, %s2786_s22 }
  0x29   : > { %1050 = vmatpush.bf16.msrb.mxu2 %v2145_v13  ;;  %1133 = vmatpush.bf16.msrb.mxu3 %v2146_v40  ;;  %p2264_p12 = scmp.ne.s32.totalorder %s2262_s5, %s2263_s7  ;;  %p2269_p2 = scmp.lt.s32.totalorder %s2267_s4, %s2263_s7 }
  0x2a   : > { %1202 = vmatpush.bf16.msrb.mxu0 %v2149_v61 }
  0x2b   : > { %p2265_p13 = pnand %p2264_p12, %p2468_p5  ;;  %p2270_p3 = por %p2269_p2, %p2268_p1 }
  0x2d   : > { %1051 = vmatpush.bf16.msrb.mxu2 %v2144_v14  ;;  %1180 = vmatpush.bf16.msra.mxu3 %v2148_v62  ;;  %p2266_p0 = pneg %p2265_p13 }
  0x2f   : > { %p2271_p4 = pnand %p2270_p3, %p2266_p0 }
  0x31   : > { %1181 = vmatpush.bf16.msra.mxu3 %v2147_v7 }
  0x37   : > { %2030 = vmatmul.msk.bf16.gmra.mxu0 %vm857_vm0, %v2137_v9 }
  0x38   : > { %2058 = vmatmul.msk.bf16.gmra.mxu1 %vm857_vm0, %v2133_v10 }
  0x47   : > { %2031 = vmatmul.msk.bf16.gmra.mxu0 %vm857_vm0, %v2138_v11 }
  0x48   : > { %2059 = vmatmul.msk.bf16.gmra.mxu1 %vm857_vm0, %v2134_v12 }
  0xa4   : > { %v879_v15 = vpop.f32.mrf.mxu0 }
  0xa5   : > { %v952_v16 = vpop.f32.mrf.mxu1 }
  0xa6   : > { %v953_v17 = vadd.f32 %v952_v16, %v879_v15 }
  0xa8   : > { %v976_v21 = vadd.f32 %v2206_v18, %v953_v17 }
  0xaa   : > { %v1000_v24 = vmax.f32 %v976_v21, 0.0  ;;  %v894_v42 = vpop.f32.mrf.mxu2 }
  0xab   : > { %v967_v43 = vpop.f32.mrf.mxu3 }
  0xac   : > { %v881_v19 = vpop.f32.mrf.mxu0  ;;  %v968_v54 = vadd.f32 %v967_v43, %v894_v42 }
  0xad   : > { %v954_v20 = vpop.f32.mrf.mxu1 }
  0xae   : > { %v955_v22 = vadd.f32 %v954_v20, %v881_v19  ;;  %v982_v56 = vadd.f32 %v2206_v18, %v968_v54 }
  0xb0   : > { %v977_v23 = vadd.f32 %v2206_v18, %v955_v22  ;;  %v1006_v58 = vmax.f32 %v982_v56, 0.0 }
  0xb2   : > { %v1001_v25 = vmax.f32 %v977_v23, 0.0  ;;  %v896_v52 = vpop.f32.mrf.mxu2 }
  0xb3   : > { %v969_v53 = vpop.f32.mrf.mxu3 }
  0xb4   : > { %v1008_v26 = vpack.c.bf16 %v1001_v25, %v1000_v24  ;;  %v884_v27 = vpop.f32.mrf.mxu0  ;;  %v970_v55 = vadd.f32 %v969_v53, %v896_v52 }
  0xb5   : > { %v957_v28 = vpop.f32.mrf.mxu1 }
  0xb6   : > { %2069 = vmatmul.msk.bf16.vlgmr.msrb.gmra.mxu2 %vm857_vm0, %v1008_v26  ;;  %v958_v29 = vadd.f32 %v957_v28, %v884_v27  ;;  %v983_v57 = vadd.f32 %v2206_v18, %v970_v55 }
  0xb8   : > { %v978_v32 = vadd.f32 %v2206_v18, %v958_v29  ;;  %v1007_v59 = vmax.f32 %v983_v57, 0.0  ;;  %v759_v29 = vld [vmem:[%s737_s3] sm:$0xf]  ;;  %s2818_s3 = sld [smem:[#allocation14_spill]] }
  0xba   : > { %v1002_v35 = vmax.f32 %v978_v32, 0.0  ;;  %v1011_v60 = vpack.c.bf16 %v1007_v59, %v1006_v58 }
  0xbc   : > { %v886_v30 = vpop.f32.mrf.mxu0 }
  0xbd   : > { %v959_v31 = vpop.f32.mrf.mxu1 }
  0xbe   : > { %v960_v33 = vadd.f32 %v959_v31, %v886_v30  ;;  %v2151_v31 = vld [vmem:[%s2778_s14 + $0x8] sm:$0xff]  ;;  %s741_s2 = scalar_lea.vmem %s2818_s3, %s2004_s1  ;;  %s1998_s1 = sshll.u32 %s719_s24, 3 }
  0xbf   : > { %1358 = vmatpush.bf16.msrb.mxu1 %v2151_v31  ;;  %s721_s27 = scalar_lea.vmem [#allocation3], %s1998_s1 }
  0xc0   : > { %v979_v34 = vadd.f32 %v2206_v18, %v960_v33  ;;  %s1896_s28 = sshll.u32 %s721_s27, 4  ;;  %s1897_s28 = int_to_ptr.vmem [resolvable:$true] %s1896_s28 }
  0xc2   : > { %v1003_v36 = vmax.f32 %v979_v34, 0.0 }
  0xc4   : > { %v1009_v37 = vpack.c.bf16 %v1003_v36, %v1002_v35  ;;  %v889_v38 = vpop.f32.mrf.mxu0  ;;  %v2150_v35 = vld [vmem:[%s2778_s14] sm:$0xff] }
  0xc5   : > { %v962_v39 = vpop.f32.mrf.mxu1  ;;  %1359 = vmatpush.bf16.msrb.mxu1 %v2150_v35 }
  0xc6   : > { %2070 = vmatmul.msk.bf16.gmra.mxu2 %vm857_vm0, %v1009_v37  ;;  %v963_v41 = vadd.f32 %v962_v39, %v889_v38 }
  0xc8   : > { %v980_v46 = vadd.f32 %v2206_v18, %v963_v41 }
  0xca   : > { %v1004_v49 = vmax.f32 %v980_v46, 0.0  ;;  %v2579_v46 = vld [vmem:[%s2777_s13] ss:$0 sm:$0xff] }
  0xcc   : > { %v891_v44 = vpop.f32.mrf.mxu0 }
  0xcd   : > { %v964_v45 = vpop.f32.mrf.mxu1 }
  0xce   : > { %v965_v47 = vadd.f32 %v964_v45, %v891_v44 }
  0xd0   : > { %v981_v48 = vadd.f32 %v2206_v18, %v965_v47 }
  0xd2   : > { %v1005_v50 = vmax.f32 %v981_v48, 0.0 }
  0xd4   : > { %v1010_v51 = vpack.c.bf16 %v1005_v50, %v1004_v49 }
  0xd6   : > { %2071 = vmatmul.msk.bf16.gmra.mxu2 %vm857_vm0, %v1010_v51 }
  0xe6   : > { %2072 = vmatmul.msk.bf16.gmra.mxu2 %vm857_vm0, %v1011_v60 }
 0x139   : > { %v1053_v63 = vpop.f32.mrf.mxu2 }
 0x13a   : > { %v1054_v1 = vadd.f32 %v2207_v0, %v1053_v63 }
 0x13c   : > { %v1089_v4 = vmax.f32 %v1054_v1, 0.0 }
 0x141   : > { %v1055_v2 = vpop.f32.mrf.mxu2 }
 0x142   : > { %v1056_v3 = vadd.f32 %v2207_v0, %v1055_v2 }
 0x144   : > { %v1090_v5 = vmax.f32 %v1056_v3, 0.0 }
 0x146   : > { %v1097_v6 = vpack.c.bf16 %v1090_v5, %v1089_v4 }
 0x148   : > { %2077 = vmatmul.msk.bf16.vlgmr.msrb.gmra.mxu3 %vm1113_vm1, %v1097_v6  ;;  %2094 = vmatmul.msk.bf16.vlgmr.msrb.gmra.mxu0 %vm1113_vm1, %v1097_v6 }
 0x149   : > { %v1058_v8 = vpop.f32.mrf.mxu2 }
 0x14a   : > { %v1059_v9 = vadd.f32 %v2207_v0, %v1058_v8 }
 0x14c   : > { %v1091_v12 = vmax.f32 %v1059_v9, 0.0 }
 0x151   : > { %v1060_v10 = vpop.f32.mrf.mxu2 }
 0x152   : > { %v1061_v11 = vadd.f32 %v2207_v0, %v1060_v10 }
 0x154   : > { %v1092_v13 = vmax.f32 %v1061_v11, 0.0 }
 0x156   : > { %v1098_v14 = vpack.c.bf16 %v1092_v13, %v1091_v12 }
 0x158   : > { %2078 = vmatmul.msk.bf16.gmra.mxu3 %vm1113_vm1, %v1098_v14  ;;  %2095 = vmatmul.msk.bf16.gmra.mxu0 %vm1113_vm1, %v1098_v14 }
 0x159   : > { %v1063_v15 = vpop.f32.mrf.mxu2 }
 0x15a   : > { %v1064_v16 = vadd.f32 %v2207_v0, %v1063_v15 }
 0x15c   : > { %v1093_v19 = vmax.f32 %v1064_v16, 0.0 }
 0x161   : > { %v1065_v17 = vpop.f32.mrf.mxu2 }
 0x162   : > { %v1066_v18 = vadd.f32 %v2207_v0, %v1065_v17 }
 0x164   : > { %v1094_v20 = vmax.f32 %v1066_v18, 0.0 }
 0x166   : > { %v1099_v21 = vpack.c.bf16 %v1094_v20, %v1093_v19 }
 0x168   : > { %2079 = vmatmul.msk.bf16.gmra.mxu3 %vm1113_vm1, %v1099_v21  ;;  %2096 = vmatmul.msk.bf16.gmra.mxu0 %vm1113_vm1, %v1099_v21 }
 0x169   : > { %v1068_v22 = vpop.f32.mrf.mxu2 }
 0x16a   : > { %v1069_v23 = vadd.f32 %v2207_v0, %v1068_v22 }
 0x16c   : > { %v1095_v26 = vmax.f32 %v1069_v23, 0.0  ;;  %v762_v23 = vlaneseq }
 0x171   : > { %v1070_v24 = vpop.f32.mrf.mxu2 }
 0x172   : > { %v1071_v25 = vadd.f32 %v2207_v0, %v1070_v24 }
 0x174   : > { %v1096_v27 = vmax.f32 %v1071_v25, 0.0 }
 0x176   : > { %v1100_v28 = vpack.c.bf16 %v1096_v27, %v1095_v26 }
 0x178   : > { %2080 = vmatmul.msk.bf16.gmra.mxu3 %vm1113_vm1, %v1100_v28  ;;  %2097 = vmatmul.msk.bf16.gmra.mxu0 %vm1113_vm1, %v1100_v28  ;;  %v763_v28 = vshrl.u32 %v762_v23, 7 }
 0x17a   : > { %2202 = vset.pattern.permute.xlu0 %v763_v28  ;;  %2201 = vset.pattern.permute.xlu2 %v763_v28 }
 0x17b   : > { %2200 = vset.pattern.permute.xlu1 %v763_v28 }
 0x188   : > { %2089 = vmatmul.msk.bf16.vlgmr.msra.gmra.mxu3 %vm857_vm0, %v759_v29  ;;  %v2593_v29 = vld [vmem:[%s741_s2] sm:$0xff] }
 0x1c5   : > { %v1204_v37 = vpop.f32.mrf.mxu0 }
 0x1cb   : > { %v2554_v30 = vpop.f32.mrf.mxu3 }
 0x1cd   : > { %v1206_v39 = vpop.f32.mrf.mxu0 }
 0x1d3   : > { %v2559_v32 = vpop.f32.mrf.mxu3 }
 0x1d5   : > { %v1209_v41 = vpop.f32.mrf.mxu0 }
 0x1db   : > { %v2561_v33 = vpop.f32.mrf.mxu3 }
 0x1dd   : > { %v1211_v47 = vpop.f32.mrf.mxu0 }
 0x1e3   : > { %v2563_v34 = vpop.f32.mrf.mxu3 }
 0x1e5   : > { %v1214_v0 = vpop.f32.mrf.mxu0 }
 0x1eb   : > { %v2568_v36 = vpop.f32.mrf.mxu3 }
 0x1ed   : > { %v1216_v10 = vpop.f32.mrf.mxu0 }
 0x1f3   : > { %v2570_v38 = vpop.f32.mrf.mxu3 }
 0x1f5   : > { %v1219_v22 = vpop.f32.mrf.mxu0 }
 0x1fb   : > { %v2572_v40 = vpop.f32.mrf.mxu3 }
 0x203   : > { %v2574_v42 = vpop.f32.mrf.mxu3 }
 0x20b   : > { %v1183_v43 = vpop.f32.mrf.mxu3 }
 0x20c   : > { %v1225_v44 = vrot.slane %v1183_v43, 1  ;;  %v1232_v45 = vperm.slane %v1183_v43, 0  ;;  %v1226_v50 = vrot.slane %v1183_v43, 2  ;;  %v1227_v51 = vrot.slane %v1183_v43, 3 }
 0x20d   : > { %v1228_v8 = vrot.slane %v1183_v43, 4  ;;  %v1229_v9 = vrot.slane %v1183_v43, 5  ;;  %v1230_v24 = vrot.slane %v1183_v43, 6  ;;  %v1231_v27 = vrot.slane %v1183_v43, 7 }
 0x20e   : > { %v1233_v48 = vperm.slane %v1225_v44, 0  ;;  %v1248_v49 = vadd.f32 %v1232_v45, %v1204_v37  ;;  %v1234_v56 = vperm.slane %v1226_v50, 0  ;;  %v1235_v57 = vperm.slane %v1227_v51, 0  ;;  %v1221_v45 = vpop.f32.mrf.mxu0 }
 0x20f   : > { %v1236_v13 = vperm.slane %v1228_v8, 0  ;;  %v1237_v14 = vperm.slane %v1229_v9, 0  ;;  %v1238_v37 = vperm.slane %v1230_v24, 0  ;;  %v768_v44 = vperm.slane %v2593_v29, 1 }
 0x210   : > { %v1249_v52 = vadd.f32 %v1233_v48, %v1206_v39  ;;  %v1260_v53 = vadd.f32 %v2579_v46, %v1248_v49  ;;  %v1250_v62 = vadd.f32 %v1234_v56, %v1209_v41  ;;  %v1251_v63 = vadd.f32 %v1235_v57, %v1211_v47 }
 0x211   : > { %v1252_v17 = vadd.f32 %v1236_v13, %v1214_v0  ;;  %v1253_v18 = vadd.f32 %v1237_v14, %v1216_v10  ;;  %v1239_v39 = vperm.slane %v1231_v27, 0  ;;  %v775_v41 = vperm.slane %v2593_v29, 2  ;;  %773 = vperm.xlu2 %2201, %v768_v44  }
 0x212   : > { %v1261_v54 = vadd.f32 %v2579_v46, %v1249_v52  ;;  %v1284_v55 = vmax.f32 %v1260_v53, 0.0  ;;  %v1262_v4 = vadd.f32 %v2579_v46, %v1250_v62  ;;  %v1263_v5 = vadd.f32 %v2579_v46, %v1251_v63  ;;  %v2210_v62 = vld [vmem:[%s2779_s15] ss:$0 sm:$0xff] }
 0x213   : > { %v1185_v58 = vpop.f32.mrf.mxu3  ;;  %v1264_v20 = vadd.f32 %v2579_v46, %v1252_v17  ;;  %v1265_v21 = vadd.f32 %v2579_v46, %v1253_v18  ;;  %v761_v47 = vperm.slane %v2593_v29, 0  ;;  %v1254_v43 = vadd.f32 %v1238_v37, %v1219_v22  ;;  %780 = vperm.xlu0 %2202, %v775_v41  }
 0x214   : > { %v1285_v59 = vmax.f32 %v1261_v54, 0.0  ;;  %v1292_v60 = vpack.c.bf16 %v1284_v55, %v1284_v55  ;;  %v1286_v6 = vmax.f32 %v1262_v4, 0.0  ;;  %v1287_v7 = vmax.f32 %v1263_v5, 0.0 }
 0x215   : > { %v1288_v25 = vmax.f32 %v1264_v20, 0.0  ;;  %v1289_v26 = vmax.f32 %v1265_v21, 0.0  ;;  %v1255_v50 = vadd.f32 %v1239_v39, %v1221_v45  ;;  %766 = vperm.xlu1 %2200, %v761_v47   ;;  %v1266_v52 = vadd.f32 %v2579_v46, %v1254_v43 }
 0x216   : > { %v1293_v61 = vpack.c.bf16 %v1285_v59, %v1285_v59  ;;  %v1316_v1 = vunpack.c.l.b16 %v1292_v60  ;;  %v1294_v11 = vpack.c.bf16 %v1286_v6, %v1286_v6  ;;  %v1295_v12 = vpack.c.bf16 %v1287_v7, %v1287_v7 }
 0x217   : > { %v1296_v31 = vpack.c.bf16 %v1288_v25, %v1288_v25  ;;  %v1297_v35 = vpack.c.bf16 %v1289_v26, %v1289_v26  ;;  %v1267_v53 = vadd.f32 %v2579_v46, %v1255_v50  ;;  %v782_v54 = vperm.slane %v2593_v29, 3 }
 0x218   : > { %v1317_v2 = vunpack.c.l.b16 %v1293_v61  ;;  %v1318_v15 = vunpack.c.l.b16 %v1294_v11  ;;  %v1319_v16 = vunpack.c.l.b16 %v1295_v12  ;;  %v1290_v55 = vmax.f32 %v1266_v52, 0.0 }
 0x219   : > { %v1320_v48 = vunpack.c.l.b16 %v1296_v31  ;;  %v1321_v49 = vunpack.c.l.b16 %v1297_v35  ;;  %v1291_v56 = vmax.f32 %v1267_v53, 0.0  ;;  %787 = vperm.xlu2 %2201, %v782_v54  }
 0x21a   : > { %v1324_v3 = vpack.c.b16 %v1317_v2, %v1316_v1  ;;  %v1325_v19 = vpack.c.b16 %v1319_v16, %v1318_v15  ;;  %v1298_v57 = vpack.c.bf16 %v1290_v55, %v1290_v55  ;;  %v2211_v2 = vld [vmem:[%s2780_s16] ss:$0 sm:$0xff] }
 0x21b   : > { %v1326_v51 = vpack.c.b16 %v1321_v49, %v1320_v48  ;;  %v1299_v58 = vpack.c.bf16 %v1291_v56, %v1291_v56 }
 0x21c   : > { %2106 = vmatmul.msk.bf16.vlgmr.msrb.gmra.mxu1 %vm857_vm0, %v1324_v3  ;;  %v1322_v59 = vunpack.c.l.b16 %v1298_v57  ;;  %v789_v57 = vperm.slane %v2593_v29, 4 }
 0x21d   : > { %v1323_v60 = vunpack.c.l.b16 %v1299_v58 }
 0x21f   : > { %v1327_v61 = vpack.c.b16 %v1323_v60, %v1322_v59 }
 0x22c   : > { %2107 = vmatmul.msk.bf16.gmra.mxu1 %vm857_vm0, %v1325_v19 }
 0x23c   : > { %2108 = vmatmul.msk.bf16.gmra.mxu1 %vm857_vm0, %v1326_v51 }
 0x24c   : > { %2109 = vmatmul.msk.bf16.gmra.mxu1 %vm857_vm0, %v1327_v61 }
 0x299   : > { %v1361_v63 = vpop.f32.mrf.mxu1 }
 0x29a   : > { %v1362_v46 = vadd.f32 %v2210_v62, %v1361_v63 }
 0x29c   : > { %v1397_v0 = vmax.f32 %v1362_v46, 0.0 }
 0x29e   : > { %v1405_v1 = vpack.c.bf16 %v1397_v0, %v1397_v0  ;;  %v796_v0 = vperm.slane %v2593_v29, 5 }
 0x2a0   : > { %v1413_v3 = vunpack.c.l.bf16 %v1405_v1 }
 0x2a1   : > { %v1363_v4 = vpop.f32.mrf.mxu1 }
 0x2a2   : > { %v1364_v5 = vadd.f32 %v2210_v62, %v1363_v4  ;;  %v1425_v6 = vmul.f32 %v2211_v2, %v1413_v3  ;;  %v803_v4 = vperm.slane %v2593_v29, 6 }
 0x2a4   : > { %v1398_v7 = vmax.f32 %v1364_v5, 0.0  ;;  %v1433_v8 = vsel %vm1113_vm1, %v1425_v6, 0.0  ;;  %v2621_v5 = vpop.permute.xlu0 %780  ;;  %v2623_v6 = vld [vmem:[#allocation2] ss:$0 sm:$0xff] }
 0x2a5   : > { %1434 = vadd.xlane.f32.xlu0 %v1433_v8  ;;  %vm1471_vm5 = vcmp.gt.f32.partialorder %v2621_v5, 0.0 }
 0x2a6   : > { %v1406_v9 = vpack.c.bf16 %v1398_v7, %v1398_v7  ;;  %v767_v7 = vpop.permute.xlu1 %766 }
 0x2a7   : > { %vm1469_vm3 = vcmp.gt.f32.partialorder %v767_v7, 0.0 }
 0x2a8   : > { %v1414_v10 = vunpack.c.l.bf16 %v1406_v9 }
 0x2a9   : > { %v1366_v11 = vpop.f32.mrf.mxu1 }
 0x2aa   : > { %v1367_v12 = vadd.f32 %v2210_v62, %v1366_v11  ;;  %v1426_v13 = vmul.f32 %v2211_v2, %v1414_v10 }
 0x2ac   : > { %v1399_v14 = vmax.f32 %v1367_v12, 0.0  ;;  %v1436_v15 = vsel %vm1113_vm1, %v1426_v13, 0.0  ;;  %v2627_v12 = vpop.permute.xlu2 %773 }
 0x2ad   : > { %1437 = vadd.xlane.f32.xlu0 %v1436_v15  ;;  %vm1470_vm4 = vcmp.gt.f32.partialorder %v2627_v12, 0.0 }
 0x2ae   : > { %v1407_v16 = vpack.c.bf16 %v1399_v14, %v1399_v14 }
 0x2b0   : > { %v1415_v17 = vunpack.c.l.bf16 %v1407_v16 }
 0x2b1   : > { %v1368_v18 = vpop.f32.mrf.mxu1 }
 0x2b2   : > { %v1369_v19 = vadd.f32 %v2210_v62, %v1368_v18  ;;  %v1427_v20 = vmul.f32 %v2211_v2, %v1415_v17 }
 0x2b4   : > { %v1400_v21 = vmax.f32 %v1369_v19, 0.0  ;;  %v1439_v22 = vsel %vm1113_vm1, %v1427_v20, 0.0 }
 0x2b5   : > { %1440 = vadd.xlane.f32.xlu1 %v1439_v22 }
 0x2b6   : > { %v1408_v23 = vpack.c.bf16 %v1400_v21, %v1400_v21 }
 0x2b8   : > { %v1416_v24 = vunpack.c.l.bf16 %v1408_v23  ;;  %v2632_v23 = vpop.permute.xlu2 %787 }
 0x2b9   : > { %v1371_v25 = vpop.f32.mrf.mxu1  ;;  %vm1472_vm6 = vcmp.gt.f32.partialorder %v2632_v23, 0.0 }
 0x2ba   : > { %v1372_v26 = vadd.f32 %v2210_v62, %v1371_v25  ;;  %v1428_v27 = vmul.f32 %v2211_v2, %v1416_v24 }
 0x2bc   : > { %v1401_v28 = vmax.f32 %v1372_v26, 0.0  ;;  %v1442_v31 = vsel %vm1113_vm1, %v1428_v27, 0.0 }
 0x2bd   : > { %1443 = vadd.xlane.f32.xlu2 %v1442_v31 }
 0x2be   : > { %v1409_v35 = vpack.c.bf16 %v1401_v28, %v1401_v28 }
 0x2c0   : > { %v1417_v37 = vunpack.c.l.bf16 %v1409_v35 }
 0x2c1   : > { %v1373_v39 = vpop.f32.mrf.mxu1 }
 0x2c2   : > { %v1374_v41 = vadd.f32 %v2210_v62, %v1373_v39  ;;  %v1429_v44 = vmul.f32 %v2211_v2, %v1417_v37 }
 0x2c4   : > { %v1402_v45 = vmax.f32 %v1374_v41, 0.0  ;;  %v1445_v47 = vsel %vm1113_vm1, %v1429_v44, 0.0 }
 0x2c5   : > { %1446 = vadd.xlane.f32.xlu1 %v1445_v47 }
 0x2c6   : > { %v1410_v48 = vpack.c.bf16 %v1402_v45, %v1402_v45 }
 0x2c8   : > { %v1418_v49 = vunpack.c.l.bf16 %v1410_v48 }
 0x2c9   : > { %v1376_v43 = vpop.f32.mrf.mxu1 }
 0x2ca   : > { %v1377_v50 = vadd.f32 %v2210_v62, %v1376_v43  ;;  %v1430_v51 = vmul.f32 %v2211_v2, %v1418_v49  ;;  %v2311_v49 = vmov 0  }
 0x2cb   : > { %2204 = vset.pattern.permute.xlu0 %v2311_v49 }
 0x2cc   : > { %v1403_v52 = vmax.f32 %v1377_v50, 0.0  ;;  %v1448_v53 = vsel %vm1113_vm1, %v1430_v51, 0.0 }
 0x2cd   : > { %1449 = vadd.xlane.f32.xlu0 %v1448_v53 }
 0x2ce   : > { %v1411_v54 = vpack.c.bf16 %v1403_v52, %v1403_v52 }
 0x2d0   : > { %v1419_v55 = vunpack.c.l.bf16 %v1411_v54 }
 0x2d1   : > { %v1378_v56 = vpop.f32.mrf.mxu1 }
 0x2d2   : > { %v1379_v58 = vadd.f32 %v2210_v62, %v1378_v56  ;;  %v1431_v59 = vmul.f32 %v2211_v2, %v1419_v55  ;;  %v810_v62 = vperm.slane %v2593_v29, 7 }
 0x2d4   : > { %v1404_v60 = vmax.f32 %v1379_v58, 0.0  ;;  %v1451_v61 = vsel %vm1113_vm1, %v1431_v59, 0.0 }
 0x2d5   : > { %794 = vperm.xlu2 %2201, %v789_v57   ;;  %1452 = vadd.xlane.f32.xlu1 %v1451_v61 }
 0x2d6   : > { %v1412_v63 = vpack.c.bf16 %v1404_v60, %v1404_v60 }
 0x2d8   : > { %v1420_v46 = vunpack.c.l.bf16 %v1412_v63 }
 0x2da   : > { %v1432_v1 = vmul.f32 %v2211_v2, %v1420_v46 }
 0x2dc   : > { %v1454_v3 = vsel %vm1113_vm1, %v1432_v1, 0.0  ;;  %vm1808_vm1 = vcmask 1046534  }
 0x2dd   : > { %801 = vperm.xlu2 %2201, %v796_v0   ;;  %1455 = vadd.xlane.f32.xlu1 %v1454_v3 }
 0x2e5   : > { %808 = vperm.xlu2 %2201, %v803_v4  }
 0x2ed   : > { %2203 = vset.pattern.permute.xlu2 %v2311_v49 }
 0x2f6   : > { %815 = vperm.xlu1 %2200, %v810_v62  }
 0x2fe   : > { %2205 = vset.pattern.permute.xlu1 %v2311_v49 }
 0x318   : > { %v1435_v8 = vpop.xlane.xlu0 %1434 }
 0x319   : > { %v1461_v9 = vadd.f32 %v2623_v6, %v1435_v8 }
 0x31b   : > { %v1477_v2 = vsel %vm1469_vm3, %v1461_v9, -1e+30 }
 0x31c   : > { %v1486_v10 = vsel %vm1485_vm2, %v1477_v2, -inf }
 0x31d   : > { %v1487_v11 = vrot.slane %v1486_v10, 4 }
 0x31f   : > { %v1488_v13 = vmax.f32 %v1486_v10, %v1487_v11 }
 0x320   : > { %v1438_v14 = vpop.xlane.xlu0 %1437 }
 0x321   : > { %v1489_v29 = vrot.slane %v1488_v13, 2  ;;  %v1462_v15 = vadd.f32 %v2623_v6, %v1438_v14 }
 0x323   : > { %v1490_v16 = vmax.f32 %v1488_v13, %v1489_v29  ;;  %v1478_v17 = vsel %vm1470_vm4, %v1462_v15, -1e+30 }
 0x324   : > { %v1493_v18 = vsel %vm1485_vm2, %v1478_v17, -inf }
 0x325   : > { %v1491_v19 = vrot.slane %v1490_v16, 1  ;;  %v1494_v20 = vrot.slane %v1493_v18, 4 }
 0x327   : > { %v1492_v21 = vmax.f32 %v1490_v16, %v1491_v19  ;;  %v1495_v22 = vmax.f32 %v1493_v18, %v1494_v20 }
 0x328   : > { %v1441_v24 = vpop.xlane.xlu1 %1440 }
 0x329   : > { %v1542_v25 = vsub.f32 %v1461_v9, %v1492_v21  ;;  %v1496_v26 = vrot.slane %v1495_v22, 2  ;;  %v1463_v27 = vadd.f32 %v2623_v6, %v1441_v24 }
 0x32b   : > { %v1550_v28 = vmin.f32 %v1542_v25, 0.0  ;;  %v1497_v31 = vmax.f32 %v1495_v22, %v1496_v26  ;;  %v1479_v35 = vsel %vm1471_vm5, %v1463_v27, -1e+30 }
 0x32c   : > { %v1500_v37 = vsel %vm1485_vm2, %v1479_v35, -inf }
 0x32d   : > { %v1558_v39 = vmul.f32 1.442695, %v1550_v28  ;;  %v1498_v41 = vrot.slane %v1497_v31, 1  ;;  %v1501_v44 = vrot.slane %v1500_v37, 4 }
 0x32f   : > { %2215 = vpow2.f32 %v1558_v39  ;;  %v1499_v45 = vmax.f32 %v1497_v31, %v1498_v41  ;;  %v1502_v47 = vmax.f32 %v1500_v37, %v1501_v44 }
 0x330   : > { %v1444_v48 = vpop.xlane.xlu2 %1443 }
 0x331   : > { %v1543_v43 = vsub.f32 %v1462_v15, %v1499_v45  ;;  %v1503_v50 = vrot.slane %v1502_v47, 2  ;;  %v1464_v51 = vadd.f32 %v2623_v6, %v1444_v48 }
 0x333   : > { %v1551_v52 = vmin.f32 %v1543_v43, 0.0  ;;  %v1504_v53 = vmax.f32 %v1502_v47, %v1503_v50  ;;  %v1480_v54 = vsel %vm1472_vm6, %v1464_v51, -1e+30 }
 0x334   : > { %v1507_v55 = vsel %vm1485_vm2, %v1480_v54, -inf }
 0x335   : > { %v2216_v56 = vpop.eup %2215  ;;  %v1560_v57 = vmul.f32 1.442695, %v1551_v52  ;;  %v1505_v58 = vrot.slane %v1504_v53, 1  ;;  %v1508_v59 = vrot.slane %v1507_v55, 4 }
 0x336   : > { %v2640_v60 = vmul.f32 %v2216_v56, %v767_v7 }
 0x337   : > { %2217 = vpow2.f32 %v1560_v57  ;;  %v1506_v61 = vmax.f32 %v1504_v53, %v1505_v58  ;;  %v1509_v63 = vmax.f32 %v1507_v55, %v1508_v59 }
 0x338   : > { %v2642_v46 = vpop.permute.xlu2 %794  ;;  %v1447_v0 = vpop.xlane.xlu1 %1446  ;;  %v1582_v1 = vsel %vm1485_vm2, %v2640_v60, 0.0 }
 0x339   : > { %v1544_v3 = vsub.f32 %v1463_v27, %v1506_v61  ;;  %v1510_v4 = vrot.slane %v1509_v63, 2  ;;  %vm1473_vm7 = vcmp.gt.f32.partialorder %v2642_v46, 0.0  ;;  %v1465_v62 = vadd.f32 %v2623_v6, %v1447_v0 }
 0x33a   : > { %v1583_v8 = vrot.slane %v1582_v1, 4 }
 0x33b   : > { %v1552_v9 = vmin.f32 %v1544_v3, 0.0  ;;  %v1511_v2 = vmax.f32 %v1509_v63, %v1510_v4  ;;  %v1481_v7 = vsel %vm1473_vm7, %v1465_v62, -1e+30 }
 0x33c   : > { %v1514_v10 = vsel %vm1485_vm2, %v1481_v7, -inf  ;;  %v1584_v11 = vadd.f32 %v1583_v8, %v1582_v1 }
 0x33d   : > { %v2218_v13 = vpop.eup %2217  ;;  %v1562_v14 = vmul.f32 1.442695, %v1552_v9  ;;  %v1512_v29 = vrot.slane %v1511_v2, 1  ;;  %v1515_v15 = vrot.slane %v1514_v10, 4 }
 0x33e   : > { %v1585_v16 = vrot.slane %v1584_v11, 2  ;;  %v2650_v17 = vmul.f32 %v2218_v13, %v2627_v12 }
 0x33f   : > { %2219 = vpow2.f32 %v1562_v14  ;;  %v1513_v18 = vmax.f32 %v1511_v2, %v1512_v29  ;;  %v1516_v19 = vmax.f32 %v1514_v10, %v1515_v15 }
 0x340   : > { %v2652_v20 = vpop.permute.xlu2 %801  ;;  %v1450_v21 = vpop.xlane.xlu0 %1449  ;;  %v1586_v22 = vadd.f32 %v1585_v16, %v1584_v11  ;;  %v1589_v24 = vsel %vm1485_vm2, %v2650_v17, 0.0 }
 0x341   : > { %v1545_v25 = vsub.f32 %v1464_v51, %v1513_v18  ;;  %v1517_v26 = vrot.slane %v1516_v19, 2  ;;  %vm1474_vm8 = vcmp.gt.f32.partialorder %v2652_v20, 0.0  ;;  %v1466_v27 = vadd.f32 %v2623_v6, %v1450_v21 }
 0x342   : > { %v1587_v28 = vrot.slane %v1586_v22, 1  ;;  %v1590_v31 = vrot.slane %v1589_v24, 4 }
 0x343   : > { %v1553_v12 = vmin.f32 %v1545_v25, 0.0  ;;  %v1518_v35 = vmax.f32 %v1516_v19, %v1517_v26  ;;  %v1482_v37 = vsel %vm1474_vm8, %v1466_v27, -1e+30 }
 0x344   : > { %v1521_v39 = vsel %vm1485_vm2, %v1482_v37, -inf  ;;  %v1588_v41 = vadd.f32 %v1587_v28, %v1586_v22  ;;  %v1591_v44 = vadd.f32 %v1590_v31, %v1589_v24 }
 0x345   : > { %v2220_v45 = vpop.eup %2219  ;;  %v1564_v47 = vmul.f32 1.442695, %v1553_v12  ;;  %v1519_v48 = vrot.slane %v1518_v35, 1  ;;  %v1522_v49 = vrot.slane %v1521_v39, 4 }
 0x346   : > { %v1638_v43 = vadd.f32 1e-10, %v1588_v41  ;;  %v1592_v50 = vrot.slane %v1591_v44, 2  ;;  %v2660_v51 = vmul.f32 %v2220_v45, %v2621_v5 }
 0x347   : > { %2221 = vpow2.f32 %v1564_v47  ;;  %v1520_v52 = vmax.f32 %v1518_v35, %v1519_v48  ;;  %v1523_v53 = vmax.f32 %v1521_v39, %v1522_v49 }
 0x348   : > { %v2662_v54 = vpop.permute.xlu2 %808  ;;  %v1453_v55 = vpop.xlane.xlu1 %1452  ;;  %2223 = vrcp.f32 %v1638_v43  ;;  %v1593_v56 = vadd.f32 %v1592_v50, %v1591_v44  ;;  %v1596_v57 = vsel %vm1485_vm2, %v2660_v51, 0.0 }
 0x349   : > { %v1546_v58 = vsub.f32 %v1465_v62, %v1520_v52  ;;  %v1524_v59 = vrot.slane %v1523_v53, 2  ;;  %vm1475_vm9 = vcmp.gt.f32.partialorder %v2662_v54, 0.0  ;;  %v1467_v61 = vadd.f32 %v2623_v6, %v1453_v55 }
 0x34a   : > { %v1594_v63 = vrot.slane %v1593_v56, 1  ;;  %v1597_v5 = vrot.slane %v1596_v57, 4 }
 0x34b   : > { %v1554_v0 = vmin.f32 %v1546_v58, 0.0  ;;  %v1525_v1 = vmax.f32 %v1523_v53, %v1524_v59  ;;  %v1483_v3 = vsel %vm1475_vm9, %v1467_v61, -1e+30 }
 0x34c   : > { %v1528_v4 = vsel %vm1485_vm2, %v1483_v3, -inf  ;;  %v1595_v8 = vadd.f32 %v1594_v63, %v1593_v56  ;;  %v1598_v9 = vadd.f32 %v1597_v5, %v1596_v57 }
 0x34d   : > { %v2222_v2 = vpop.eup %2221  ;;  %v1566_v7 = vmul.f32 1.442695, %v1554_v0  ;;  %v1526_v10 = vrot.slane %v1525_v1, 1  ;;  %v1529_v11 = vrot.slane %v1528_v4, 4 }
 0x34e   : > { %v2224_v13 = vpop.eup %2223  ;;  %v1639_v62 = vadd.f32 1e-10, %v1595_v8  ;;  %v1599_v14 = vrot.slane %v1598_v9, 2  ;;  %v1577_v29 = vmul.f32 %v2222_v2, %v2632_v23 }
 0x34f   : > { %2225 = vpow2.f32 %v1566_v7  ;;  %v1527_v15 = vmax.f32 %v1525_v1, %v1526_v10  ;;  %v1530_v16 = vmax.f32 %v1528_v4, %v1529_v11  ;;  %v1654_v18 = vmul.f32 %v2224_v13, %v2640_v60 }
 0x350   : > { %2227 = vrcp.f32 %v1639_v62  ;;  %v1600_v19 = vadd.f32 %v1599_v14, %v1598_v9  ;;  %v1603_v21 = vsel %vm1485_vm2, %v1577_v29, 0.0  ;;  %v1456_v1 = vpop.xlane.xlu1 %1455 }
 0x351   : > { %v1547_v22 = vsub.f32 %v1466_v27, %v1527_v15  ;;  %v1531_v24 = vrot.slane %v1530_v16, 2  ;;  %1664 = vperm.xlu2 %2203, %v1654_v18   ;;  %v1604_v25 = vrot.slane %v1603_v21, 4 }
 0x352   : > { %v1601_v26 = vrot.slane %v1600_v19, 1 }
 0x353   : > { %v1555_v28 = vmin.f32 %v1547_v22, 0.0  ;;  %v1532_v31 = vmax.f32 %v1530_v16, %v1531_v24  ;;  %v1605_v12 = vadd.f32 %v1604_v25, %v1603_v21 }
 0x354   : > { %v1602_v35 = vadd.f32 %v1601_v26, %v1600_v19 }
 0x355   : > { %v2226_v37 = vpop.eup %2225  ;;  %v1568_v23 = vmul.f32 1.442695, %v1555_v28  ;;  %v1533_v39 = vrot.slane %v1532_v31, 1  ;;  %v1606_v41 = vrot.slane %v1605_v12, 2 }
 0x356   : > { %v2228_v44 = vpop.eup %2227  ;;  %v1640_v45 = vadd.f32 1e-10, %v1602_v35  ;;  %v1578_v60 = vmul.f32 %v2226_v37, %v2642_v46 }
 0x357   : > { %2229 = vpow2.f32 %v1568_v23  ;;  %v1534_v47 = vmax.f32 %v1532_v31, %v1533_v39  ;;  %v1655_v27 = vmul.f32 %v2228_v44, %v2650_v17  ;;  %v1607_v48 = vadd.f32 %v1606_v41, %v1605_v12 }
 0x358   : > { %2231 = vrcp.f32 %v1640_v45  ;;  %v1610_v49 = vsel %vm1485_vm2, %v1578_v60, 0.0 }
 0x359   : > { %v1548_v43 = vsub.f32 %v1467_v61, %v1534_v47  ;;  %1669 = vperm.xlu0 %2204, %v1655_v27   ;;  %v1608_v50 = vrot.slane %v1607_v48, 1  ;;  %v1611_v52 = vrot.slane %v1610_v49, 4 }
 0x35b   : > { %v1556_v53 = vmin.f32 %v1548_v43, 0.0  ;;  %v1609_v55 = vadd.f32 %v1608_v50, %v1607_v48  ;;  %v1612_v56 = vadd.f32 %v1611_v52, %v1610_v49 }
 0x35d   : > { %v2230_v57 = vpop.eup %2229  ;;  %v1570_v58 = vmul.f32 1.442695, %v1556_v53  ;;  %v1641_v59 = vadd.f32 1e-10, %v1609_v55  ;;  %v1613_v63 = vrot.slane %v1612_v56, 2 }
 0x35e   : > { %v2232_v46 = vpop.eup %2231  ;;  %v1579_v5 = vmul.f32 %v2230_v57, %v2652_v20 }
 0x35f   : > { %2233 = vpow2.f32 %v1570_v58  ;;  %v1656_v17 = vmul.f32 %v2232_v46, %v2660_v51  ;;  %v1614_v0 = vadd.f32 %v1613_v63, %v1612_v56  ;;  %v1468_v51 = vadd.f32 %v2623_v6, %v1456_v1  ;;  %v2686_v1 = vld [vmem:[%s2774_s10] ss:$0 sm:$0xff] }
 0x360   : > { %2235 = vrcp.f32 %v1641_v59  ;;  %v1617_v61 = vsel %vm1485_vm2, %v1579_v5, 0.0 }
 0x361   : > { %1674 = vperm.xlu2 %2203, %v1656_v17   ;;  %v1615_v3 = vrot.slane %v1614_v0, 1  ;;  %v1618_v4 = vrot.slane %v1617_v61, 4 }
 0x363   : > { %v1616_v8 = vadd.f32 %v1615_v3, %v1614_v0  ;;  %v1619_v9 = vadd.f32 %v1618_v4, %v1617_v61  ;;  %v1136_v61 = vadd.f32 %v2686_v1, %v2554_v30  ;;  %v1141_v3 = vadd.f32 %v2686_v1, %v2561_v33 }
 0x365   : > { %v2234_v2 = vpop.eup %2233  ;;  %v1642_v7 = vadd.f32 1e-10, %v1616_v8  ;;  %v1620_v10 = vrot.slane %v1619_v9, 2 }
 0x366   : > { %v2236_v11 = vpop.eup %2235  ;;  %v1580_v13 = vmul.f32 %v2234_v2, %v2662_v54 }
 0x367   : > { %v1657_v20 = vmul.f32 %v2236_v11, %v1577_v29  ;;  %2237 = vrcp.f32 %v1642_v7  ;;  %v1621_v62 = vadd.f32 %v1620_v10, %v1619_v9  ;;  %v2153_v10 = vld [vmem:[%s2782_s18 + $0x8] sm:$0xff] }
 0x368   : > { %v816_v14 = vpop.permute.xlu1 %815  ;;  %v1624_v15 = vsel %vm1485_vm2, %v1580_v13, 0.0  ;;  %1834 = vmatpush.bf16.msra.mxu2 %v2153_v10 }
 0x369   : > { %vm1476_vm10 = vcmp.gt.f32.partialorder %v816_v14, 0.0  ;;  %1679 = vperm.xlu2 %2203, %v1657_v20   ;;  %v1622_v16 = vrot.slane %v1621_v62, 1  ;;  %v1625_v18 = vrot.slane %v1624_v15, 4 }
 0x36a   : > { %v1484_v19 = vsel %vm1476_vm10, %v1468_v51, -1e+30 }
 0x36b   : > { %v1535_v21 = vsel %vm1485_vm2, %v1484_v19, -inf  ;;  %v1623_v22 = vadd.f32 %v1622_v16, %v1621_v62  ;;  %v1626_v24 = vadd.f32 %v1625_v18, %v1624_v15  ;;  %v1138_v19 = vadd.f32 %v2686_v1, %v2559_v32 }
 0x36c   : > { %v1536_v25 = vrot.slane %v1535_v21, 4 }
 0x36d   : > { %v2238_v26 = vpop.eup %2237  ;;  %v1643_v54 = vadd.f32 1e-10, %v1623_v22  ;;  %v1627_v29 = vrot.slane %v1626_v24, 2 }
 0x36e   : > { %v1537_v28 = vmax.f32 %v1535_v21, %v1536_v25  ;;  %v1658_v31 = vmul.f32 %v2238_v26, %v1578_v60 }
 0x36f   : > { %2239 = vrcp.f32 %v1643_v54  ;;  %v1628_v6 = vadd.f32 %v1627_v29, %v1626_v24 }
 0x370   : > { %v1538_v12 = vrot.slane %v1537_v28, 2  ;;  %1684 = vperm.xlu1 %2205, %v1658_v31   ;;  %v1148_v31 = vadd.f32 %v2686_v1, %v2570_v38 }
 0x371   : > { %v1629_v35 = vrot.slane %v1628_v6, 1 }
 0x372   : > { %v1539_v37 = vmax.f32 %v1537_v28, %v1538_v12 }
 0x373   : > { %v1630_v23 = vadd.f32 %v1629_v35, %v1628_v6 }
 0x374   : > { %v1540_v39 = vrot.slane %v1539_v37, 1 }
 0x375   : > { %v2240_v41 = vpop.eup %2239  ;;  %v1644_v44 = vadd.f32 1e-10, %v1630_v23 }
 0x376   : > { %v1541_v45 = vmax.f32 %v1539_v37, %v1540_v39  ;;  %v1659_v47 = vmul.f32 %v2240_v41, %v1579_v5 }
 0x377   : > { %2241 = vrcp.f32 %v1644_v44 }
 0x378   : > { %v1549_v27 = vsub.f32 %v1468_v51, %v1541_v45  ;;  %1689 = vperm.xlu2 %2203, %v1659_v47  }
 0x37a   : > { %v1557_v48 = vmin.f32 %v1549_v27, 0.0  ;;  %v2152_v27 = vld [vmem:[%s2782_s18] sm:$0xff] }
 0x37b   : > { %1835 = vmatpush.bf16.msra.mxu2 %v2152_v27 }
 0x37c   : > { %v1572_v49 = vmul.f32 1.442695, %v1557_v48 }
 0x37d   : > { %v2242_v43 = vpop.eup %2241 }
 0x37e   : > { %2243 = vpow2.f32 %v1572_v49  ;;  %v1660_v60 = vmul.f32 %v2242_v43, %v1580_v13  ;;  %v1143_v13 = vadd.f32 %v2686_v1, %v2563_v34 }
 0x380   : > { %1694 = vperm.xlu1 %2205, %v1660_v60  }
 0x384   : > { %v2244_v50 = vpop.eup %2243 }
 0x385   : > { %v1581_v52 = vmul.f32 %v2244_v50, %v816_v14 }
 0x387   : > { %v1631_v53 = vsel %vm1485_vm2, %v1581_v52, 0.0  ;;  %vm1810_vm2 = vcmask 1047559  }
 0x388   : > { %v1632_v55 = vrot.slane %v1631_v53, 4 }
 0x38a   : > { %v1633_v56 = vadd.f32 %v1632_v55, %v1631_v53 }
 0x38c   : > { %v1634_v57 = vrot.slane %v1633_v56, 2 }
 0x38e   : > { %v1635_v58 = vadd.f32 %v1634_v57, %v1633_v56 }
 0x390   : > { %v1636_v59 = vrot.slane %v1635_v58, 1 }
 0x392   : > { %v1637_v63 = vadd.f32 %v1636_v59, %v1635_v58 }
 0x394   : > { %v1645_v46 = vadd.f32 1e-10, %v1637_v63 }
 0x396   : > { %2245 = vrcp.f32 %v1645_v46 }
 0x39c   : > { %v2246_v5 = vpop.eup %2245 }
 0x39d   : > { %v1661_v17 = vmul.f32 %v2246_v5, %v1581_v52  ;;  %v1146_v5 = vadd.f32 %v2686_v1, %v2568_v36  ;;  %v1151_v36 = vadd.f32 %v2686_v1, %v2572_v40  ;;  %v1153_v40 = vadd.f32 %v2686_v1, %v2574_v42 }
 0x39f   : > { %1699 = vperm.xlu2 %2203, %v1661_v17  }
 0x3ab   : > { %v1665_v0 = vpop.permute.xlu2 %1664 }
 0x3ac   : > { %v1702_v4 = vmul.f32 %v1665_v0, %v1136_v61 }
 0x3ae   : > { %v1710_v2 = vsel %vm857_vm0, %v1702_v4, 0.0 }
 0x3af   : > { %v1711_v11 = vrot.slane %v1710_v2, 4 }
 0x3b1   : > { %v1712_v33 = vadd.f32 %v1711_v11, %v1710_v2 }
 0x3b3   : > { %v1713_v16 = vrot.slane %v1712_v33, 2 }
 0x3b5   : > { %v1714_v26 = vadd.f32 %v1713_v16, %v1712_v33 }
 0x3b7   : > { %v1715_v6 = vrot.slane %v1714_v26, 1 }
 0x3b9   : > { %v1716_v41 = vadd.f32 %v1715_v6, %v1714_v26 }
 0x3bb   : > { %v1675_v8 = vpop.permute.xlu2 %1674  ;;  %v1766_v38 = vpack.c.bf16 %v1716_v41, %v1716_v41 }
 0x3bc   : > { %v1704_v9 = vmul.f32 %v1675_v8, %v1141_v3 }
 0x3bd   : > { %v1790_v55 = vunpack.c.l.b16 %v1766_v38 }
 0x3be   : > { %v1724_v7 = vsel %vm857_vm0, %v1704_v9, 0.0 }
 0x3bf   : > { %v1725_v20 = vrot.slane %v1724_v7, 4 }
 0x3c1   : > { %v1726_v51 = vadd.f32 %v1725_v20, %v1724_v7 }
 0x3c3   : > { %v1680_v30 = vpop.permute.xlu2 %1679  ;;  %v1727_v21 = vrot.slane %v1726_v51, 2 }
 0x3c4   : > { %v1705_v62 = vmul.f32 %v1680_v30, %v1143_v13 }
 0x3c5   : > { %v1728_v34 = vadd.f32 %v1727_v21, %v1726_v51 }
 0x3c6   : > { %v1731_v14 = vsel %vm857_vm0, %v1705_v62, 0.0  ;;  %v2155_v62 = vld [vmem:[%s2784_s20 + $0x8] sm:$0xff] }
 0x3c7   : > { %v1732_v15 = vrot.slane %v1731_v14, 4  ;;  %v1729_v35 = vrot.slane %v1728_v34, 1  ;;  %1874 = vmatpush.bf16.msrb.mxu3 %v2155_v62 }
 0x3c9   : > { %v1733_v18 = vadd.f32 %v1732_v15, %v1731_v14  ;;  %v1730_v45 = vadd.f32 %v1729_v35, %v1728_v34  ;;  %v2154_v15 = vld [vmem:[%s2784_s20] sm:$0xff] }
 0x3cb   : > { %v1734_v22 = vrot.slane %v1733_v18, 2  ;;  %v1670_v24 = vpop.permute.xlu0 %1669  ;;  %v1768_v50 = vpack.c.bf16 %v1730_v45, %v1730_v45  ;;  %1875 = vmatpush.bf16.msrb.mxu3 %v2154_v15 }
 0x3cc   : > { %v1703_v25 = vmul.f32 %v1670_v24, %v1138_v19 }
 0x3cd   : > { %v1735_v29 = vadd.f32 %v1734_v22, %v1733_v18  ;;  %v1792_v58 = vunpack.c.l.b16 %v1768_v50 }
 0x3ce   : > { %v1717_v54 = vsel %vm857_vm0, %v1703_v25, 0.0 }
 0x3cf   : > { %v1718_v28 = vrot.slane %v1717_v54, 4  ;;  %v1736_v23 = vrot.slane %v1735_v29, 1 }
 0x3d1   : > { %v1719_v12 = vadd.f32 %v1718_v28, %v1717_v54  ;;  %v1737_v48 = vadd.f32 %v1736_v23, %v1735_v29 }
 0x3d2   : > { %v1690_v37 = vpop.permute.xlu2 %1689 }
 0x3d3   : > { %v1720_v39 = vrot.slane %v1719_v12, 2  ;;  %v1707_v32 = vmul.f32 %v1690_v37, %v1148_v31  ;;  %v1769_v52 = vpack.c.bf16 %v1737_v48, %v1737_v48 }
 0x3d5   : > { %v1721_v44 = vadd.f32 %v1720_v39, %v1719_v12  ;;  %v1745_v47 = vsel %vm857_vm0, %v1707_v32, 0.0  ;;  %v1793_v59 = vunpack.c.l.b16 %v1769_v52 }
 0x3d6   : > { %v1746_v60 = vrot.slane %v1745_v47, 4 }
 0x3d7   : > { %v1722_v49 = vrot.slane %v1721_v44, 1 }
 0x3d8   : > { %v1747_v57 = vadd.f32 %v1746_v60, %v1745_v47 }
 0x3d9   : > { %v1723_v43 = vadd.f32 %v1722_v49, %v1721_v44  ;;  %v2213_v49 = vld [vmem:[%s2783_s19] ss:$0 sm:$0xff] }
 0x3da   : > { %v1748_v17 = vrot.slane %v1747_v57, 2 }
 0x3db   : > { %v1767_v53 = vpack.c.bf16 %v1723_v43, %v1723_v43 }
 0x3dc   : > { %v1749_v4 = vadd.f32 %v1748_v17, %v1747_v57 }
 0x3dd   : > { %v1791_v56 = vunpack.c.l.b16 %v1767_v53  ;;  %v2214_v53 = vld [vmem:[%s2785_s21] ss:$0 sm:$0xff] }
 0x3de   : > { %v1750_v7 = vrot.slane %v1749_v4, 1 }
 0x3df   : > { %v1799_v63 = vsel %vm1798_vm11, %v1791_v56, %v1790_v55 }
 0x3e0   : > { %v1801_v46 = vsel %vm1800_vm12, %v1792_v58, %v1799_v63  ;;  %v1751_v13 = vadd.f32 %v1750_v7, %v1749_v4 }
 0x3e1   : > { %v1803_v0 = vsel %vm1802_vm13, %v1793_v59, %v1801_v46 }
 0x3e2   : > { %v1685_v61 = vpop.permute.xlu1 %1684  ;;  %v1771_v33 = vpack.c.bf16 %v1751_v13, %v1751_v13 }
 0x3e3   : > { %v1706_v3 = vmul.f32 %v1685_v61, %v1146_v5 }
 0x3e4   : > { %v1795_v19 = vunpack.c.l.b16 %v1771_v33 }
 0x3e5   : > { %v1738_v8 = vsel %vm857_vm0, %v1706_v3, 0.0 }
 0x3e6   : > { %v1739_v9 = vrot.slane %v1738_v8, 4 }
 0x3e8   : > { %v1740_v2 = vadd.f32 %v1739_v9, %v1738_v8 }
 0x3ea   : > { %v1741_v10 = vrot.slane %v1740_v2, 2 }
 0x3ec   : > { %v1742_v11 = vadd.f32 %v1741_v10, %v1740_v2 }
 0x3ee   : > { %v1743_v20 = vrot.slane %v1742_v11, 1 }
 0x3f0   : > { %v1744_v30 = vadd.f32 %v1743_v20, %v1742_v11 }
 0x3f2   : > { %v1770_v51 = vpack.c.bf16 %v1744_v30, %v1744_v30  ;;  %v1695_v14 = vpop.permute.xlu1 %1694 }
 0x3f3   : > { %v1708_v16 = vmul.f32 %v1695_v14, %v1151_v36 }
 0x3f4   : > { %v1794_v18 = vunpack.c.l.b16 %v1770_v51 }
 0x3f5   : > { %v1752_v21 = vsel %vm857_vm0, %v1708_v16, 0.0 }
 0x3f6   : > { %v1805_v22 = vsel %vm1804_vm14, %v1794_v18, %v1803_v0  ;;  %v1753_v24 = vrot.slane %v1752_v21, 4 }
 0x3f7   : > { %v1807_v25 = vsel %vm1806_vm15, %v1795_v19, %v1805_v22 }
 0x3f8   : > { %v1754_v26 = vadd.f32 %v1753_v24, %v1752_v21 }
 0x3f9   : > { %v1700_v34 = vpop.permute.xlu2 %1699 }
 0x3fa   : > { %v1755_v54 = vrot.slane %v1754_v26, 2  ;;  %v1709_v29 = vmul.f32 %v1700_v34, %v1153_v40 }
 0x3fc   : > { %v1756_v28 = vadd.f32 %v1755_v54, %v1754_v26  ;;  %v1759_v31 = vsel %vm857_vm0, %v1709_v29, 0.0 }
 0x3fd   : > { %v1760_v6 = vrot.slane %v1759_v31, 4 }
 0x3fe   : > { %v1757_v12 = vrot.slane %v1756_v28, 1 }
 0x3ff   : > { %v1761_v35 = vadd.f32 %v1760_v6, %v1759_v31 }
 0x400   : > { %v1758_v37 = vadd.f32 %v1757_v12, %v1756_v28 }
 0x401   : > { %v1762_v23 = vrot.slane %v1761_v35, 2 }
 0x402   : > { %v1772_v39 = vpack.c.bf16 %v1758_v37, %v1758_v37 }
 0x403   : > { %v1763_v32 = vadd.f32 %v1762_v23, %v1761_v35 }
 0x404   : > { %v1796_v41 = vunpack.c.l.b16 %v1772_v39 }
 0x405   : > { %v1764_v44 = vrot.slane %v1763_v32, 1 }
 0x406   : > { %v1809_v45 = vsel %vm1808_vm1, %v1796_v41, %v1807_v25 }
 0x407   : > { %v1765_v42 = vadd.f32 %v1764_v44, %v1763_v32 }
 0x409   : > { %v1773_v1 = vpack.c.bf16 %v1765_v42, %v1765_v42 }
 0x40b   : > { %v1797_v47 = vunpack.c.l.b16 %v1773_v1 }
 0x40d   : > { %v1811_v27 = vsel %vm1810_vm2, %v1797_v47, %v1809_v45 }
 0x40e   : > { %v1812_v48 = vpack.c.b16 %v1811_v27, %v1811_v27 }
 0x410   : > { %2118 = vmatmul.msk.bf16.vlgmr.msra.gmra.mxu2 %vm857_vm0, %v1812_v48 }
 0x493   : > { %v1837_v38 = vpop.f32.mrf.mxu2 }
 0x494   : > { %v1838_v43 = vadd.f32 %v2213_v49, %v1837_v38 }
 0x496   : > { %v1843_v60 = vmax.f32 %v1838_v43, 0.0 }
 0x498   : > { %v1844_v50 = vpack.c.bf16 %v1843_v60, %v1843_v60 }
 0x49a   : > { %2127 = vmatmul.msk.bf16.vlgmr.msrb.gmra.mxu3 %vm857_vm0, %v1844_v50 }
 0x49b   : > { %v1839_v52 = vpop.f32.mrf.mxu2 }
 0x51d   : > { %v1877_v55 = vpop.f32.mrf.mxu3 }
 0x51e   : > { %v1878_v56 = vadd.f32 %v2214_v53, %v1877_v55 }
 0x520   : > { %v1881_v57 = vmax.f32 %v1878_v56, 0.0 }
 0x522   : > { %1882 = vst [vmem:[%s721_s27] sm:$0xff] %v1881_v57 }
 0x523   : > { %2274 = shalt.err (!%p2271_p4)
}
 0x524   : > { %2160 = dma.vmem_to_hbm [thread:$0]  (%p2468_p5), %s1897_s28, 128, %s1899_s6, %s1884_s23  }
 0x525   : > { %v1879_v58 = vpop.f32.mrf.mxu3 }
 0x526 PF: > { %s2819_s24 = sld [smem:[#allocation6_spill]]  ;;  %p2166_p7 = scmp.ge.s32.totalorder %s2309_s0, 2 }
 0x528   : > { %p2163_p8 = pnand %p2166_p7, %p2472_p6 }
 0x52a   : > { %p2164_p9 = pneg %p2163_p8 }
 0x52c   : > { %s1910_s17 = sand.u32 1, %s2819_s24  }
 0x52d   : > { %s1911_s27 = scalar_lea.sflag [#allocation4], %s1910_s17 }
 0x52e   : > { %2292 = dma.done.wait (%p2164_p9), %s1911_s27, 128  }
 0x52f   : > { %2294 = vsyncadd (%p2164_p9), %s1911_s27, 4294967168  ;;  %s2821_s0 = sld [smem:[#allocation8_spill]]  ;;  %s2824_s29 = smov %s2301_s30 }
 0x530   : > { %s2822_s7 = sld [smem:[#allocation7_spill]] }
 0x531   : > { %s2823_s4 = sld [smem:[#allocation9_spill]] }
 0x535   : > { %p34_p10 = scmp.ge.s32.totalorder %s2821_s0, 4  }
 0x536   : > { %s2825_s30 = smov %s2822_s7 }
 0x537   :  { %36 = sbr.rel (!%p34_p10) target bundleno = 12 (0xc), region = 152 }
 0x53c   :  { %1917 = vsyncpa [#allocation4], 1 }
 0x53d   :  { %1919 = vsyncpa [#allocation4 + $0x1], 1 }

// kernel: tpu_custom_call.1
= control target key start
LH: loop header
LB: loop body
LE: loop exit
PB: predicated region body
PF: predicated region fallthrough
CT: control target
= control target key end

     0   :  { %s2716_s0 = inlined_call_operand.vmem [shape: bf16[128,32], index: 0, kind: input, shape index: {}]   ;;  %s2717_s1 = inlined_call_operand.vmem [shape: bf16[128,32], index: 1, kind: input, shape index: {}]   ;;  %s2718_s2 = inlined_call_operand.vmem [shape: bf16[16,32], index: 2, kind: input, shape index: {}]   ;;  %s2719_s3 = inlined_call_operand.vmem [shape: f32[16,8,1], index: 3, kind: input, shape index: {}]   ;;  %s2720_s4 = inlined_call_operand.vmem [shape: bf16[32,32], index: 4, kind: input, shape index: {}]   ;;  %s2721_s5 = inlined_call_operand.vmem [shape: bf16[32,32], index: 5, kind: input, shape index: {}]   ;;  %s2722_s6 = inlined_call_operand.vmem [shape: f32[1,32], index: 6, kind: input, shape index: {}]   ;;  %s2723_s7 = inlined_call_operand.vmem [shape: bf16[32,16], index: 7, kind: input, shape index: {}]   ;;  %s2724_s8 = inlined_call_operand.vmem [shape: f32[1,16], index: 8, kind: input, shape index: {}]   ;;  %s2725_s9 = inlined_call_operand.vmem [shape: bf16[16,32], index: 9, kind: input, shape index: {}]   ;;  %s2726_s10 = inlined_call_operand.vmem [shape: f32[1,32], index: 10, kind: input, shape index: {}]   ;;  %s2727_s11 = inlined_call_operand.vmem [shape: bf16[32,32], index: 11, kind: input, shape index: {}]   ;;  %s2728_s12 = inlined_call_operand.vmem [shape: bf16[16,32], index: 12, kind: input, shape index: {}]   ;;  %s2729_s13 = inlined_call_operand.vmem [shape: f32[1,32], index: 13, kind: input, shape index: {}]   ;;  %s2730_s14 = inlined_call_operand.vmem [shape: bf16[32,16], index: 14, kind: input, shape index: {}]   ;;  %s2731_s15 = inlined_call_operand.vmem [shape: f32[1,16], index: 15, kind: input, shape index: {}]   ;;  %s2732_s16 = inlined_call_operand.vmem [shape: f32[1,16], index: 16, kind: input, shape index: {}]   ;;  %s2733_s17 = inlined_call_operand.<no memory space> [shape: f32[1,1], index: 17, kind: input, shape index: {}]   ;;  %s2734_s18 = inlined_call_operand.vmem [shape: bf16[32,32], index: 18, kind: input, shape index: {}]   ;;  %s2735_s19 = inlined_call_operand.vmem [shape: f32[1,32], index: 19, kind: input, shape index: {}]   ;;  %s2736_s20 = inlined_call_operand.vmem [shape: bf16[32,128], index: 20, kind: input, shape index: {}]   ;;  %s2737_s21 = inlined_call_operand.vmem [shape: f32[1,128], index: 21, kind: input, shape index: {}]   ;;  %s2738_s22 = inlined_call_operand.hbm [shape: f32[16,128], index: 22, kind: output, shape index: {}]  }
   0x1   :  { %2747 = sst [smem:[#allocation10_spill]] %s2716_s0  ;;  %v27_v0 = vstv %s2733_s17 }
   0x2   :  { %2748 = sst [smem:[#allocation11_spill]] %s2717_s1  ;;  %28 = vst [vmem:[#allocation2] sm:$0x1] %v27_v0 }
   0x3   :  { %2749 = sst [smem:[#allocation12_spill]] %s2718_s2 }
   0x4   :  { %2750 = sst [smem:[#allocation13_spill]] %s2719_s3 }
   0x5   :  { %2751 = sst [smem:[#allocation14_spill]] %s2720_s4 }
   0x6   :  { %2752 = sst [smem:[#allocation15_spill]] %s2721_s5 }
   0x7   :  { %2753 = sst [smem:[#allocation16_spill]] %s2722_s6 }
   0x8   :  { %2754 = sst [smem:[#allocation17_spill]] %s2723_s7 }
   0x9   :  { %2755 = sst [smem:[#allocation18_spill]] %s2724_s8 }
   0xa   :  { %29 = vsyncpa [#allocation4], 0 }
   0xb   :  { %31 = vsyncpa [#allocation4 + $0x1], 0  ;;  %s2384_s29 = smov 0   ;;  %s2386_s30 = smov 0  }
   0xc   :  { %s2388_s4 = smov 0   ;;  %s2390_s0 = smov 0  }
   0xd LB: > { %2756 = sst [smem:[#allocation6_spill]] %s2259_s4  ;;  %s2405_s17 = sadd.s32 4294967295, %s2263_s0   ;;  %s2263_s0 = sphi %s2390_s0, %s2772_s0   ;;  %s2259_s4 = sphi %s2388_s4, %s2774_s4   ;;  %s2255_s30 = sphi %s2386_s30, %s2776_s30   ;;  %s2251_s29 = sphi %s2384_s29, %s2775_s29  }
   0xe   : > { %s1950_s23 = sadd.s32 4294967294, %s2263_s0   ;;  %s2409_s1 = sadd.s32 1, %s2263_s0  }
   0xf   : > { %2757 = sst [smem:[#allocation7_spill]] %s2409_s1  ;;  %s526_s5 = sadd.s32 1, %s2259_s4 }
  0x10   : > { %s523_s24 = ssub.s32 %s2263_s0, %s2409_s1  ;;  %p536_p0 = scmp.ne.s32.totalorder %s2259_s4, %s2255_s30 }
  0x11   : > { %p524_p1 = scmp.eq.s32.totalorder %s523_s24, 0  ;;  %p537_p2 = scmp.eq.s32.totalorder %s2405_s17, 1 }
  0x12   : > { %p542_p3 = scmp.ne.s32.totalorder %s2255_s30, %s2251_s29  ;;  %p543_p4 = scmp.eq.s32.totalorder %s1950_s23, 1 }
  0x13   : > { %s2420_s6 = scalar_select %p524_p1, %s2259_s4, %s526_s5  }
  0x14   : > { %p2422_p5 = por %p537_p2, %p536_p0  ;;  %p2426_p6 = por %p543_p4, %p542_p3 }
  0x15   : > { %2758 = sst [smem:[#allocation8_spill]] %s2420_s6  ;;  %p1953_p7 = scmp.ge.s32.totalorder %s2263_s0, 1 }
  0x16   : > { %s2760_s26 = scalar_select %p2426_p6, 1, 0 }
  0x17   : > { %p649_p8 = scmp.lt.s32.totalorder %s2263_s0, 3 }
  0x18   : > { %2761 = sst [smem:[#allocation9_spill]] %s2760_s26 }
  0x19   : > { %p650_p9 = pnand %p1953_p7, %p649_p8 }
  0x1a   : > { %s2762_s3 = sld [smem:[#allocation15_spill]] (!%p650_p9)  ;;  %s2442_s4 = sshll.u32 (!%p650_p9), %s2405_s17, 3 }
  0x1b   : > { %653 = sbr.rel (%p650_p9) target bundleno = 1320 (0x528), region = 108  ;;  %s2763_s5 = sld [smem:[#allocation14_spill]] (!%p650_p9) }
  0x1c   : > { %p726_p10 = scmp.lt.s32.totalorder (!%p650_p9), %s2442_s4, 15  ;;  %s2764_s23 = sld [smem:[#allocation11_spill]] (!%p650_p9) }
  0x1d   : > { %s2766_s7 = sld [smem:[#allocation17_spill]] (!%p650_p9)  ;;  %p737_p11 = scmp.lt.s32.totalorder (!%p650_p9), %s2405_s17, 1 }
  0x1e   : > { %s2768_s8 = sld [smem:[#allocation18_spill]] (!%p650_p9) }
  0x1f   : > { %s2769_s6 = sld [smem:[#allocation12_spill]] (!%p650_p9) }
  0x20   : > { %v2100_v1 = vld [vmem:[%s2762_s3 + $0x8] sm:$0xff]  ;;  %v2099_v3 = vld [vmem:[%s2762_s3] sm:$0xff]  ;;  %s2449_s2 = scalar_select %p726_p10, %s2442_s4, 15  ;;  %vm813_vm0 = vcmask 261120   ;;  %vm1069_vm1 = vcmask 130048   ;;  %vm1441_vm3 = vcmask 7168  }
  0x21   : > { %v2098_v2 = vld [vmem:[%s2763_s5 + $0x8] sm:$0xff]  ;;  %v2097_v4 = vld [vmem:[%s2763_s5] sm:$0xff]  ;;  %832 = vmatpush.bf16.msra.mxu0 %v2100_v1  ;;  %2113 = vmatpush.bf16.msra.mxu2 %v2100_v1  ;;  %s2765_s3 = sld [smem:[#allocation10_spill]]  ;;  %s2778_s17 = smov (!%p737_p11, %s2405_s17), 1  ;;  %vm1754_vm11 = vcmask 1041409   ;;  %vm1756_vm12 = vcmask 1042434  }
  0x22   : > { %905 = vmatpush.bf16.msra.mxu1 %v2098_v2  ;;  %2115 = vmatpush.bf16.msra.mxu3 %v2098_v2  ;;  %s1956_s27 = sshll.u32 %s2449_s2, 2  ;;  %v2103_v40 = vld [vmem:[%s2725_s9] sm:$0xff]  ;;  %v2105_v62 = vld [vmem:[%s2727_s11 + $0x8] sm:$0xff]  ;;  %s1959_s26 = sshll.u32 %s2778_s17, 2  ;;  %vm1758_vm13 = vcmask 1043459   ;;  %vm1760_vm14 = vcmask 1044484  }
  0x23   : > { %s735_s24 = scalar_lea.vmem %s2764_s23, %s1956_s27  ;;  %v2102_v13 = vld [vmem:[%s2766_s7 + $0x8] sm:$0xff]  ;;  %v2101_v14 = vld [vmem:[%s2766_s7] sm:$0xff]  ;;  %s1961_s23 = sshll.u32 %s2449_s2, 3  ;;  %vm1762_vm15 = vcmask 1045509  }
  0x24   : > { %v2093_v5 = vld [vmem:[%s735_s24] sm:$0xff]  ;;  %v2096_v7 = vld [vmem:[%s735_s24 + $0x18] sm:$0xff]  ;;  %v2094_v9 = vld [vmem:[%s735_s24 + $0x8] sm:$0xff] }
  0x25   : > { %833 = vmatpush.bf16.msra.mxu0 %v2099_v3  ;;  %2114 = vmatpush.bf16.msra.mxu2 %v2099_v3  ;;  %v2095_v11 = vld [vmem:[%s735_s24 + $0x10] sm:$0xff]  ;;  %v2106_v61 = vld [vmem:[%s2728_s12] sm:$0xff]  ;;  %s740_s28 = scalar_lea.vmem %s2769_s6, %s1959_s26  ;;  %s722_s26 = sand.u32 1, %s2255_s30  }
  0x26   : > { %906 = vmatpush.bf16.msra.mxu1 %v2097_v4  ;;  %2116 = vmatpush.bf16.msra.mxu3 %v2097_v4  ;;  %v2161_v0 = vld [vmem:[%s2768_s8] ss:$0 sm:$0xff]  ;;  %s1850_s24 = scalar_lea.hbm %s2738_s22, %s2442_s4  ;;  %s1840_s2 = scalar_lea.sflag [#allocation4], %s722_s26 }
  0x27   : > { %s729_s5 = scalar_lea.vmem %s2765_s3, %s1956_s27  ;;  %s1954_s3 = sshll.u32 %s722_s26, 3 }
  0x28   : > { %v2089_v6 = vld [vmem:[%s729_s5] sm:$0xff]  ;;  %1986 = vmatmul.msk.bf16.vlgmr.msra.gmra.mxu0 %vm813_vm0, %v2093_v5  ;;  %v2092_v8 = vld [vmem:[%s729_s5 + $0x18] sm:$0xff]  ;;  %1989 = vmatmul.msk.bf16.vlgmr.msra.gmra.mxu2 %vm813_vm0, %v2096_v7  ;;  %v2090_v10 = vld [vmem:[%s729_s5 + $0x8] sm:$0xff]  ;;  %s724_s17 = scalar_lea.vmem [#allocation3], %s1954_s3  ;;  %s2221_s4 = scalar_lea.hbm %s2738_s22, 16 }
  0x29   : > { %2014 = vmatmul.msk.bf16.vlgmr.msra.gmra.mxu1 %vm813_vm0, %v2089_v6  ;;  %2017 = vmatmul.msk.bf16.vlgmr.msra.gmra.mxu3 %vm813_vm0, %v2092_v8  ;;  %v2091_v12 = vld [vmem:[%s729_s5 + $0x10] sm:$0xff]  ;;  %s2767_s5 = sld [smem:[#allocation16_spill]]  ;;  %v2104_v7 = vld [vmem:[%s2727_s11] sm:$0xff] }
  0x2a   : > { %1006 = vmatpush.bf16.msrb.mxu2 %v2102_v13  ;;  %1089 = vmatpush.bf16.msrb.mxu3 %v2103_v40 }
  0x2b   : > { %1158 = vmatpush.bf16.msrb.mxu0 %v2106_v61 }
  0x2e   : > { %1007 = vmatpush.bf16.msrb.mxu2 %v2101_v14  ;;  %1136 = vmatpush.bf16.msra.mxu3 %v2105_v62 }
  0x2f   : > { %v2160_v18 = vld [vmem:[%s2767_s5] ss:$0 sm:$0xff]  ;;  %s2770_s5 = sld [smem:[#allocation13_spill]] }
  0x32   : > { %1137 = vmatpush.bf16.msra.mxu3 %v2104_v7 }
  0x35   : > { %s2555_s1 = scalar_lea.vmem %s2770_s5, %s1961_s23  ;;  %s1852_s5 = sshll.u32 %s724_s17, 4  ;;  %s1853_s5 = int_to_ptr.vmem [resolvable:$true] %s1852_s5 }
  0x38   : > { %1987 = vmatmul.msk.bf16.gmra.mxu0 %vm813_vm0, %v2094_v9 }
  0x39   : > { %2015 = vmatmul.msk.bf16.gmra.mxu1 %vm813_vm0, %v2090_v10 }
  0x48   : > { %1988 = vmatmul.msk.bf16.gmra.mxu0 %vm813_vm0, %v2095_v11 }
  0x49   : > { %2016 = vmatmul.msk.bf16.gmra.mxu1 %vm813_vm0, %v2091_v12 }
  0xa5   : > { %v835_v15 = vpop.f32.mrf.mxu0 }
  0xa6   : > { %v908_v16 = vpop.f32.mrf.mxu1 }
  0xa7   : > { %v909_v17 = vadd.f32 %v908_v16, %v835_v15 }
  0xa9   : > { %v932_v21 = vadd.f32 %v2160_v18, %v909_v17 }
  0xab   : > { %v956_v24 = vmax.f32 %v932_v21, 0.0  ;;  %v850_v42 = vpop.f32.mrf.mxu2 }
  0xac   : > { %v923_v43 = vpop.f32.mrf.mxu3 }
  0xad   : > { %v837_v19 = vpop.f32.mrf.mxu0  ;;  %v924_v54 = vadd.f32 %v923_v43, %v850_v42 }
  0xae   : > { %v910_v20 = vpop.f32.mrf.mxu1 }
  0xaf   : > { %v911_v22 = vadd.f32 %v910_v20, %v837_v19  ;;  %v938_v56 = vadd.f32 %v2160_v18, %v924_v54 }
  0xb1   : > { %v933_v23 = vadd.f32 %v2160_v18, %v911_v22  ;;  %v962_v58 = vmax.f32 %v938_v56, 0.0 }
  0xb3   : > { %v957_v25 = vmax.f32 %v933_v23, 0.0  ;;  %v852_v52 = vpop.f32.mrf.mxu2 }
  0xb4   : > { %v925_v53 = vpop.f32.mrf.mxu3 }
  0xb5   : > { %v964_v26 = vpack.c.bf16 %v957_v25, %v956_v24  ;;  %v840_v27 = vpop.f32.mrf.mxu0  ;;  %v926_v55 = vadd.f32 %v925_v53, %v852_v52 }
  0xb6   : > { %v913_v28 = vpop.f32.mrf.mxu1 }
  0xb7   : > { %2026 = vmatmul.msk.bf16.vlgmr.msrb.gmra.mxu2 %vm813_vm0, %v964_v26  ;;  %v914_v29 = vadd.f32 %v913_v28, %v840_v27  ;;  %v939_v57 = vadd.f32 %v2160_v18, %v926_v55 }
  0xb9   : > { %v934_v32 = vadd.f32 %v2160_v18, %v914_v29  ;;  %v963_v59 = vmax.f32 %v939_v57, 0.0  ;;  %v764_v29 = vld [vmem:[%s740_s28] sm:$0xf] }
  0xbb   : > { %v958_v35 = vmax.f32 %v934_v32, 0.0  ;;  %v967_v60 = vpack.c.bf16 %v963_v59, %v962_v58 }
  0xbd   : > { %v842_v30 = vpop.f32.mrf.mxu0 }
  0xbe   : > { %v915_v31 = vpop.f32.mrf.mxu1 }
  0xbf   : > { %v916_v33 = vadd.f32 %v915_v31, %v842_v30  ;;  %v2108_v31 = vld [vmem:[%s2730_s14 + $0x8] sm:$0xff] }
  0xc0   : > { %1314 = vmatpush.bf16.msrb.mxu1 %v2108_v31 }
  0xc1   : > { %v935_v34 = vadd.f32 %v2160_v18, %v916_v33 }
  0xc3   : > { %v959_v36 = vmax.f32 %v935_v34, 0.0 }
  0xc5   : > { %v965_v37 = vpack.c.bf16 %v959_v36, %v958_v35  ;;  %v845_v38 = vpop.f32.mrf.mxu0  ;;  %v2107_v35 = vld [vmem:[%s2730_s14] sm:$0xff] }
  0xc6   : > { %v918_v39 = vpop.f32.mrf.mxu1  ;;  %1315 = vmatpush.bf16.msrb.mxu1 %v2107_v35 }
  0xc7   : > { %2027 = vmatmul.msk.bf16.gmra.mxu2 %vm813_vm0, %v965_v37  ;;  %v919_v41 = vadd.f32 %v918_v39, %v845_v38 }
  0xc9   : > { %v936_v46 = vadd.f32 %v2160_v18, %v919_v41 }
  0xcb   : > { %v960_v49 = vmax.f32 %v936_v46, 0.0  ;;  %v2163_v46 = vld [vmem:[%s2729_s13] ss:$0 sm:$0xff] }
  0xcd   : > { %v847_v44 = vpop.f32.mrf.mxu0 }
  0xce   : > { %v920_v45 = vpop.f32.mrf.mxu1 }
  0xcf   : > { %v921_v47 = vadd.f32 %v920_v45, %v847_v44 }
  0xd1   : > { %v937_v48 = vadd.f32 %v2160_v18, %v921_v47 }
  0xd3   : > { %v961_v50 = vmax.f32 %v937_v48, 0.0 }
  0xd5   : > { %v966_v51 = vpack.c.bf16 %v961_v50, %v960_v49 }
  0xd7   : > { %2028 = vmatmul.msk.bf16.gmra.mxu2 %vm813_vm0, %v966_v51 }
  0xe7   : > { %2029 = vmatmul.msk.bf16.gmra.mxu2 %vm813_vm0, %v967_v60 }
 0x13a   : > { %v1009_v63 = vpop.f32.mrf.mxu2 }
 0x13b   : > { %v1010_v1 = vadd.f32 %v2161_v0, %v1009_v63 }
 0x13d   : > { %v1045_v4 = vmax.f32 %v1010_v1, 0.0 }
 0x142   : > { %v1011_v2 = vpop.f32.mrf.mxu2 }
 0x143   : > { %v1012_v3 = vadd.f32 %v2161_v0, %v1011_v2 }
 0x145   : > { %v1046_v5 = vmax.f32 %v1012_v3, 0.0 }
 0x147   : > { %v1053_v6 = vpack.c.bf16 %v1046_v5, %v1045_v4 }
 0x149   : > { %2034 = vmatmul.msk.bf16.vlgmr.msrb.gmra.mxu3 %vm1069_vm1, %v1053_v6  ;;  %2051 = vmatmul.msk.bf16.vlgmr.msrb.gmra.mxu0 %vm1069_vm1, %v1053_v6 }
 0x14a   : > { %v1014_v8 = vpop.f32.mrf.mxu2 }
 0x14b   : > { %v1015_v9 = vadd.f32 %v2161_v0, %v1014_v8 }
 0x14d   : > { %v1047_v12 = vmax.f32 %v1015_v9, 0.0 }
 0x152   : > { %v1016_v10 = vpop.f32.mrf.mxu2 }
 0x153   : > { %v1017_v11 = vadd.f32 %v2161_v0, %v1016_v10 }
 0x155   : > { %v1048_v13 = vmax.f32 %v1017_v11, 0.0 }
 0x157   : > { %v1054_v14 = vpack.c.bf16 %v1048_v13, %v1047_v12 }
 0x159   : > { %2035 = vmatmul.msk.bf16.gmra.mxu3 %vm1069_vm1, %v1054_v14  ;;  %2052 = vmatmul.msk.bf16.gmra.mxu0 %vm1069_vm1, %v1054_v14 }
 0x15a   : > { %v1019_v15 = vpop.f32.mrf.mxu2 }
 0x15b   : > { %v1020_v16 = vadd.f32 %v2161_v0, %v1019_v15 }
 0x15d   : > { %v1049_v19 = vmax.f32 %v1020_v16, 0.0 }
 0x162   : > { %v1021_v17 = vpop.f32.mrf.mxu2 }
 0x163   : > { %v1022_v18 = vadd.f32 %v2161_v0, %v1021_v17 }
 0x165   : > { %v1050_v20 = vmax.f32 %v1022_v18, 0.0 }
 0x167   : > { %v1055_v21 = vpack.c.bf16 %v1050_v20, %v1049_v19 }
 0x169   : > { %2036 = vmatmul.msk.bf16.gmra.mxu3 %vm1069_vm1, %v1055_v21  ;;  %2053 = vmatmul.msk.bf16.gmra.mxu0 %vm1069_vm1, %v1055_v21 }
 0x16a   : > { %v1024_v22 = vpop.f32.mrf.mxu2 }
 0x16b   : > { %v1025_v23 = vadd.f32 %v2161_v0, %v1024_v22 }
 0x16d   : > { %v1051_v26 = vmax.f32 %v1025_v23, 0.0 }
 0x172   : > { %v1026_v24 = vpop.f32.mrf.mxu2 }
 0x173   : > { %v1027_v25 = vadd.f32 %v2161_v0, %v1026_v24 }
 0x175   : > { %v1052_v27 = vmax.f32 %v1027_v25, 0.0 }
 0x177   : > { %v1056_v28 = vpack.c.bf16 %v1052_v27, %v1051_v26 }
 0x179   : > { %2037 = vmatmul.msk.bf16.gmra.mxu3 %vm1069_vm1, %v1056_v28  ;;  %2054 = vmatmul.msk.bf16.gmra.mxu0 %vm1069_vm1, %v1056_v28 }
 0x189   : > { %2046 = vmatmul.msk.bf16.vlgmr.msra.gmra.mxu3 %vm813_vm0, %v764_v29 }
 0x1c6   : > { %v1160_v37 = vpop.f32.mrf.mxu0 }
 0x1cc   : > { %v2508_v30 = vpop.f32.mrf.mxu3 }
 0x1ce   : > { %v1162_v39 = vpop.f32.mrf.mxu0 }
 0x1d4   : > { %v2513_v32 = vpop.f32.mrf.mxu3 }
 0x1d6   : > { %v1165_v41 = vpop.f32.mrf.mxu0 }
 0x1dc   : > { %v2515_v33 = vpop.f32.mrf.mxu3 }
 0x1de   : > { %v1167_v47 = vpop.f32.mrf.mxu0 }
 0x1e4   : > { %v2517_v34 = vpop.f32.mrf.mxu3 }
 0x1e6   : > { %v1170_v0 = vpop.f32.mrf.mxu0 }
 0x1ec   : > { %v2522_v36 = vpop.f32.mrf.mxu3 }
 0x1ee   : > { %v1172_v10 = vpop.f32.mrf.mxu0 }
 0x1f4   : > { %v2524_v38 = vpop.f32.mrf.mxu3 }
 0x1f6   : > { %v1175_v22 = vpop.f32.mrf.mxu0 }
 0x1fc   : > { %v2526_v40 = vpop.f32.mrf.mxu3 }
 0x1fe   : > { %v1177_v35 = vpop.f32.mrf.mxu0 }
 0x204   : > { %v2528_v42 = vpop.f32.mrf.mxu3 }
 0x20c   : > { %v1139_v43 = vpop.f32.mrf.mxu3 }
 0x20d   : > { %v1181_v44 = vrot.slane %v1139_v43, 1  ;;  %v1188_v45 = vperm.slane %v1139_v43, 0  ;;  %v1182_v50 = vrot.slane %v1139_v43, 2  ;;  %v1183_v51 = vrot.slane %v1139_v43, 3 }
 0x20e   : > { %v1184_v8 = vrot.slane %v1139_v43, 4  ;;  %v1185_v9 = vrot.slane %v1139_v43, 5  ;;  %v1186_v25 = vrot.slane %v1139_v43, 6  ;;  %v1187_v26 = vrot.slane %v1139_v43, 7 }
 0x20f   : > { %v1189_v48 = vperm.slane %v1181_v44, 0  ;;  %v1204_v49 = vadd.f32 %v1188_v45, %v1160_v37  ;;  %v1190_v56 = vperm.slane %v1182_v50, 0  ;;  %v1191_v57 = vperm.slane %v1183_v51, 0 }
 0x210   : > { %v1192_v13 = vperm.slane %v1184_v8, 0  ;;  %v1193_v14 = vperm.slane %v1185_v9, 0  ;;  %v1194_v29 = vperm.slane %v1186_v25, 0  ;;  %v1195_v31 = vperm.slane %v1187_v26, 0 }
 0x211   : > { %v1205_v52 = vadd.f32 %v1189_v48, %v1162_v39  ;;  %v1216_v53 = vadd.f32 %v2163_v46, %v1204_v49  ;;  %v1206_v62 = vadd.f32 %v1190_v56, %v1165_v41  ;;  %v1207_v63 = vadd.f32 %v1191_v57, %v1167_v47 }
 0x212   : > { %v1208_v17 = vadd.f32 %v1192_v13, %v1170_v0  ;;  %v1209_v18 = vadd.f32 %v1193_v14, %v1172_v10  ;;  %v1210_v41 = vadd.f32 %v1194_v29, %v1175_v22  ;;  %v1211_v44 = vadd.f32 %v1195_v31, %v1177_v35 }
 0x213   : > { %v1217_v54 = vadd.f32 %v2163_v46, %v1205_v52  ;;  %v1240_v55 = vmax.f32 %v1216_v53, 0.0  ;;  %v1218_v4 = vadd.f32 %v2163_v46, %v1206_v62  ;;  %v1219_v5 = vadd.f32 %v2163_v46, %v1207_v63 }
 0x214   : > { %v1141_v58 = vpop.f32.mrf.mxu3  ;;  %v1220_v20 = vadd.f32 %v2163_v46, %v1208_v17  ;;  %v1221_v21 = vadd.f32 %v2163_v46, %v1209_v18  ;;  %v1222_v47 = vadd.f32 %v2163_v46, %v1210_v41  ;;  %v1223_v48 = vadd.f32 %v2163_v46, %v1211_v44  ;;  %v2165_v46 = vld [vmem:[%s2732_s16] ss:$0 sm:$0xff] }
 0x215   : > { %v1241_v59 = vmax.f32 %v1217_v54, 0.0  ;;  %v1248_v60 = vpack.c.bf16 %v1240_v55, %v1240_v55  ;;  %v1242_v6 = vmax.f32 %v1218_v4, 0.0  ;;  %v1243_v7 = vmax.f32 %v1219_v5, 0.0  ;;  %v2164_v55 = vld [vmem:[%s2731_s15] ss:$0 sm:$0xff] }
 0x216   : > { %v1244_v23 = vmax.f32 %v1220_v20, 0.0  ;;  %v1245_v24 = vmax.f32 %v1221_v21, 0.0  ;;  %v1246_v49 = vmax.f32 %v1222_v47, 0.0  ;;  %v1247_v50 = vmax.f32 %v1223_v48, 0.0 }
 0x217   : > { %v1249_v61 = vpack.c.bf16 %v1241_v59, %v1241_v59  ;;  %v1272_v1 = vunpack.c.l.b16 %v1248_v60  ;;  %v1250_v11 = vpack.c.bf16 %v1242_v6, %v1242_v6  ;;  %v1251_v12 = vpack.c.bf16 %v1243_v7, %v1243_v7 }
 0x218   : > { %v1252_v27 = vpack.c.bf16 %v1244_v23, %v1244_v23  ;;  %v1253_v28 = vpack.c.bf16 %v1245_v24, %v1245_v24  ;;  %v1254_v51 = vpack.c.bf16 %v1246_v49, %v1246_v49  ;;  %v1255_v52 = vpack.c.bf16 %v1247_v50, %v1247_v50 }
 0x219   : > { %v1273_v2 = vunpack.c.l.b16 %v1249_v61  ;;  %v1274_v15 = vunpack.c.l.b16 %v1250_v11  ;;  %v1275_v16 = vunpack.c.l.b16 %v1251_v12 }
 0x21a   : > { %v1276_v37 = vunpack.c.l.b16 %v1252_v27  ;;  %v1277_v39 = vunpack.c.l.b16 %v1253_v28  ;;  %v1278_v53 = vunpack.c.l.b16 %v1254_v51  ;;  %v1279_v43 = vunpack.c.l.b16 %v1255_v52 }
 0x21b   : > { %v1280_v3 = vpack.c.b16 %v1273_v2, %v1272_v1  ;;  %v1281_v19 = vpack.c.b16 %v1275_v16, %v1274_v15 }
 0x21c   : > { %v1282_v45 = vpack.c.b16 %v1277_v39, %v1276_v37  ;;  %v1283_v54 = vpack.c.b16 %v1279_v43, %v1278_v53 }
 0x21d   : > { %2063 = vmatmul.msk.bf16.vlgmr.msrb.gmra.mxu1 %vm813_vm0, %v1280_v3 }
 0x22d   : > { %2064 = vmatmul.msk.bf16.gmra.mxu1 %vm813_vm0, %v1281_v19 }
 0x23d   : > { %2065 = vmatmul.msk.bf16.gmra.mxu1 %vm813_vm0, %v1282_v45 }
 0x24d   : > { %2066 = vmatmul.msk.bf16.gmra.mxu1 %vm813_vm0, %v1283_v54 }
 0x29a   : > { %v1317_v56 = vpop.f32.mrf.mxu1 }
 0x29b   : > { %v1318_v57 = vadd.f32 %v2164_v55, %v1317_v56 }
 0x29d   : > { %v1353_v58 = vmax.f32 %v1318_v57, 0.0 }
 0x29f   : > { %v1361_v59 = vpack.c.bf16 %v1353_v58, %v1353_v58  ;;  %v2558_v58 = vld [vmem:[#allocation2] ss:$0 sm:$0xff] }
 0x2a1   : > { %v1369_v60 = vunpack.c.l.bf16 %v1361_v59 }
 0x2a2   : > { %v1319_v61 = vpop.f32.mrf.mxu1 }
 0x2a3   : > { %v1320_v62 = vadd.f32 %v2164_v55, %v1319_v61  ;;  %v1381_v63 = vmul.f32 %v2165_v46, %v1369_v60 }
 0x2a5   : > { %v1354_v0 = vmax.f32 %v1320_v62, 0.0  ;;  %v1389_v1 = vsel %vm1069_vm1, %v1381_v63, 0.0  ;;  %v2563_v63 = vld [vmem:[%s2555_s1 + $0x8] sm:$0xff] }
 0x2a6   : > { %1390 = vadd.xlane.f32.xlu0 %v1389_v1  ;;  %vm1426_vm4 = vcmp.gt.f32.partialorder %v2563_v63, 0.0 }
 0x2a7   : > { %v1362_v2 = vpack.c.bf16 %v1354_v0, %v1354_v0 }
 0x2a9   : > { %v1370_v3 = vunpack.c.l.bf16 %v1362_v2 }
 0x2aa   : > { %v1322_v4 = vpop.f32.mrf.mxu1 }
 0x2ab   : > { %v1323_v5 = vadd.f32 %v2164_v55, %v1322_v4  ;;  %v1382_v6 = vmul.f32 %v2165_v46, %v1370_v3 }
 0x2ad   : > { %v1355_v7 = vmax.f32 %v1323_v5, 0.0  ;;  %v1392_v8 = vsel %vm1069_vm1, %v1382_v6, 0.0 }
 0x2ae   : > { %1393 = vadd.xlane.f32.xlu0 %v1392_v8 }
 0x2af   : > { %v1363_v9 = vpack.c.bf16 %v1355_v7, %v1355_v7 }
 0x2b1   : > { %v1371_v10 = vunpack.c.l.bf16 %v1363_v9  ;;  %v2569_v9 = vld [vmem:[%s2555_s1 + $0x10] sm:$0xff] }
 0x2b2   : > { %v1324_v11 = vpop.f32.mrf.mxu1  ;;  %vm1427_vm5 = vcmp.gt.f32.partialorder %v2569_v9, 0.0 }
 0x2b3   : > { %v1325_v12 = vadd.f32 %v2164_v55, %v1324_v11  ;;  %v1383_v13 = vmul.f32 %v2165_v46, %v1371_v10 }
 0x2b5   : > { %v1356_v14 = vmax.f32 %v1325_v12, 0.0  ;;  %v1395_v15 = vsel %vm1069_vm1, %v1383_v13, 0.0 }
 0x2b6   : > { %1396 = vadd.xlane.f32.xlu1 %v1395_v15 }
 0x2b7   : > { %v1364_v16 = vpack.c.bf16 %v1356_v14, %v1356_v14 }
 0x2b9   : > { %v1372_v17 = vunpack.c.l.bf16 %v1364_v16 }
 0x2ba   : > { %v1327_v18 = vpop.f32.mrf.mxu1 }
 0x2bb   : > { %v1328_v19 = vadd.f32 %v2164_v55, %v1327_v18  ;;  %v1384_v20 = vmul.f32 %v2165_v46, %v1372_v17 }
 0x2bd   : > { %v1357_v21 = vmax.f32 %v1328_v19, 0.0  ;;  %v1398_v22 = vsel %vm1069_vm1, %v1384_v20, 0.0 }
 0x2be   : > { %1399 = vadd.xlane.f32.xlu1 %v1398_v22 }
 0x2bf   : > { %v1365_v23 = vpack.c.bf16 %v1357_v21, %v1357_v21 }
 0x2c1   : > { %v1373_v24 = vunpack.c.l.bf16 %v1365_v23  ;;  %v2575_v23 = vld [vmem:[%s2555_s1 + $0x18] sm:$0xff] }
 0x2c2   : > { %v1329_v25 = vpop.f32.mrf.mxu1  ;;  %vm1428_vm6 = vcmp.gt.f32.partialorder %v2575_v23, 0.0 }
 0x2c3   : > { %v1330_v26 = vadd.f32 %v2164_v55, %v1329_v25  ;;  %v1385_v27 = vmul.f32 %v2165_v46, %v1373_v24 }
 0x2c5   : > { %v1358_v28 = vmax.f32 %v1330_v26, 0.0  ;;  %v1401_v29 = vsel %vm1069_vm1, %v1385_v27, 0.0  ;;  %v2265_v27 = vmov 0  }
 0x2c6   : > { %1402 = vadd.xlane.f32.xlu2 %v1401_v29  ;;  %2158 = vset.pattern.permute.xlu0 %v2265_v27 }
 0x2c7   : > { %v1366_v31 = vpack.c.bf16 %v1358_v28, %v1358_v28  ;;  %2157 = vset.pattern.permute.xlu2 %v2265_v27  ;;  %2159 = vset.pattern.permute.xlu1 %v2265_v27 }
 0x2c9   : > { %v1374_v35 = vunpack.c.l.bf16 %v1366_v31 }
 0x2ca   : > { %v1332_v37 = vpop.f32.mrf.mxu1 }
 0x2cb   : > { %v1333_v39 = vadd.f32 %v2164_v55, %v1332_v37  ;;  %v1386_v41 = vmul.f32 %v2165_v46, %v1374_v35 }
 0x2cd   : > { %v1359_v44 = vmax.f32 %v1333_v39, 0.0  ;;  %v1404_v45 = vsel %vm1069_vm1, %v1386_v41, 0.0 }
 0x2ce   : > { %1405 = vadd.xlane.f32.xlu2 %v1404_v45 }
 0x2cf   : > { %v1367_v47 = vpack.c.bf16 %v1359_v44, %v1359_v44 }
 0x2d1   : > { %v1375_v48 = vunpack.c.l.bf16 %v1367_v47 }
 0x2d2   : > { %v1334_v49 = vpop.f32.mrf.mxu1 }
 0x2d3   : > { %v1335_v50 = vadd.f32 %v2164_v55, %v1334_v49  ;;  %v1387_v51 = vmul.f32 %v2165_v46, %v1375_v48  ;;  %v765_v55 = vld [vmem:[%s2555_s1] sm:$0xff] }
 0x2d4   : > { %vm1425_vm2 = vcmp.gt.f32.partialorder %v765_v55, 0.0  ;;  %v2581_v49 = vld [vmem:[%s2555_s1 + $0x20] sm:$0xff] }
 0x2d5   : > { %v1360_v52 = vmax.f32 %v1335_v50, 0.0  ;;  %v1407_v53 = vsel %vm1069_vm1, %v1387_v51, 0.0  ;;  %vm1429_vm7 = vcmp.gt.f32.partialorder %v2581_v49, 0.0 }
 0x2d6   : > { %1408 = vadd.xlane.f32.xlu0 %v1407_v53 }
 0x2d7   : > { %v1368_v43 = vpack.c.bf16 %v1360_v52, %v1360_v52 }
 0x2d9   : > { %v1376_v54 = vunpack.c.l.bf16 %v1368_v43 }
 0x2db   : > { %v1388_v56 = vmul.f32 %v2165_v46, %v1376_v54 }
 0x2dd   : > { %v1410_v57 = vsel %vm1069_vm1, %v1388_v56, 0.0  ;;  %vm1764_vm1 = vcmask 1046534  }
 0x2de   : > { %1411 = vadd.xlane.f32.xlu1 %v1410_v57 }
 0x319   : > { %v1391_v59 = vpop.xlane.xlu0 %1390 }
 0x31a   : > { %v1417_v46 = vadd.f32 %v2558_v58, %v1391_v59 }
 0x31c   : > { %v1433_v60 = vsel %vm1425_vm2, %v1417_v46, -1e+30  ;;  %vm1766_vm2 = vcmask 1047559  }
 0x31d   : > { %v1442_v61 = vsel %vm1441_vm3, %v1433_v60, -inf }
 0x31e   : > { %v1443_v62 = vrot.slane %v1442_v61, 4 }
 0x320   : > { %v1444_v0 = vmax.f32 %v1442_v61, %v1443_v62 }
 0x321   : > { %v1394_v1 = vpop.xlane.xlu0 %1393 }
 0x322   : > { %v1445_v2 = vrot.slane %v1444_v0, 2  ;;  %v1418_v3 = vadd.f32 %v2558_v58, %v1394_v1 }
 0x324   : > { %v1446_v4 = vmax.f32 %v1444_v0, %v1445_v2  ;;  %v1434_v5 = vsel %vm1426_vm4, %v1418_v3, -1e+30 }
 0x325   : > { %v1449_v6 = vsel %vm1441_vm3, %v1434_v5, -inf  ;;  %v2591_v5 = vld [vmem:[%s2555_s1 + $0x28] sm:$0xff] }
 0x326   : > { %v1447_v7 = vrot.slane %v1446_v4, 1  ;;  %v1450_v8 = vrot.slane %v1449_v6, 4  ;;  %vm1430_vm8 = vcmp.gt.f32.partialorder %v2591_v5, 0.0 }
 0x328   : > { %v1448_v10 = vmax.f32 %v1446_v4, %v1447_v7  ;;  %v1451_v11 = vmax.f32 %v1449_v6, %v1450_v8 }
 0x329   : > { %v1397_v12 = vpop.xlane.xlu1 %1396 }
 0x32a   : > { %v1498_v13 = vsub.f32 %v1417_v46, %v1448_v10  ;;  %v1452_v14 = vrot.slane %v1451_v11, 2  ;;  %v1419_v15 = vadd.f32 %v2558_v58, %v1397_v12 }
 0x32c   : > { %v1506_v16 = vmin.f32 %v1498_v13, 0.0  ;;  %v1453_v17 = vmax.f32 %v1451_v11, %v1452_v14  ;;  %v1435_v18 = vsel %vm1427_vm5, %v1419_v15, -1e+30 }
 0x32d   : > { %v1456_v19 = vsel %vm1441_vm3, %v1435_v18, -inf }
 0x32e   : > { %v1514_v20 = vmul.f32 1.442695, %v1506_v16  ;;  %v1454_v21 = vrot.slane %v1453_v17, 1  ;;  %v1457_v22 = vrot.slane %v1456_v19, 4 }
 0x330   : > { %2169 = vpow2.f32 %v1514_v20  ;;  %v1455_v24 = vmax.f32 %v1453_v17, %v1454_v21  ;;  %v1458_v25 = vmax.f32 %v1456_v19, %v1457_v22 }
 0x331   : > { %v1400_v26 = vpop.xlane.xlu1 %1399 }
 0x332   : > { %v1499_v28 = vsub.f32 %v1418_v3, %v1455_v24  ;;  %v1459_v29 = vrot.slane %v1458_v25, 2  ;;  %v1420_v31 = vadd.f32 %v2558_v58, %v1400_v26 }
 0x334   : > { %v1507_v35 = vmin.f32 %v1499_v28, 0.0  ;;  %v1460_v37 = vmax.f32 %v1458_v25, %v1459_v29  ;;  %v1436_v39 = vsel %vm1428_vm6, %v1420_v31, -1e+30  ;;  %v2602_v28 = vld [vmem:[%s2555_s1 + $0x30] sm:$0xff] }
 0x335   : > { %v1463_v41 = vsel %vm1441_vm3, %v1436_v39, -inf  ;;  %vm1431_vm9 = vcmp.gt.f32.partialorder %v2602_v28, 0.0 }
 0x336   : > { %v2170_v44 = vpop.eup %2169  ;;  %v1516_v45 = vmul.f32 1.442695, %v1507_v35  ;;  %v1461_v47 = vrot.slane %v1460_v37, 1  ;;  %v1464_v48 = vrot.slane %v1463_v41, 4 }
 0x337   : > { %v2583_v50 = vmul.f32 %v2170_v44, %v765_v55 }
 0x338   : > { %2171 = vpow2.f32 %v1516_v45  ;;  %v1462_v51 = vmax.f32 %v1460_v37, %v1461_v47  ;;  %v1465_v52 = vmax.f32 %v1463_v41, %v1464_v48 }
 0x339   : > { %v1538_v53 = vsel %vm1441_vm3, %v2583_v50, 0.0  ;;  %v1403_v43 = vpop.xlane.xlu2 %1402 }
 0x33a   : > { %v1539_v54 = vrot.slane %v1538_v53, 4  ;;  %v1500_v56 = vsub.f32 %v1419_v15, %v1462_v51  ;;  %v1466_v57 = vrot.slane %v1465_v52, 2  ;;  %v1421_v59 = vadd.f32 %v2558_v58, %v1403_v43 }
 0x33c   : > { %v1540_v46 = vadd.f32 %v1539_v54, %v1538_v53  ;;  %v1508_v60 = vmin.f32 %v1500_v56, 0.0  ;;  %v1467_v61 = vmax.f32 %v1465_v52, %v1466_v57  ;;  %v1437_v55 = vsel %vm1429_vm7, %v1421_v59, -1e+30 }
 0x33d   : > { %v1470_v62 = vsel %vm1441_vm3, %v1437_v55, -inf }
 0x33e   : > { %v2172_v0 = vpop.eup %2171  ;;  %v1541_v1 = vrot.slane %v1540_v46, 2  ;;  %v1518_v2 = vmul.f32 1.442695, %v1508_v60  ;;  %v1468_v3 = vrot.slane %v1467_v61, 1  ;;  %v1471_v4 = vrot.slane %v1470_v62, 4  ;;  %v2613_v60 = vld [vmem:[%s2555_s1 + $0x38] sm:$0xff] }
 0x33f   : > { %v2594_v6 = vmul.f32 %v2172_v0, %v2563_v63  ;;  %vm1432_vm10 = vcmp.gt.f32.partialorder %v2613_v60, 0.0  ;;  %s1854_s1 = sshll.u32 %s1850_s24, 4  ;;  %s1855_s1 = int_to_ptr.hbm [resolvable:$true] %s1854_s1 }
 0x340   : > { %v1542_v7 = vadd.f32 %v1541_v1, %v1540_v46  ;;  %2173 = vpow2.f32 %v1518_v2  ;;  %v1469_v8 = vmax.f32 %v1467_v61, %v1468_v3  ;;  %v1472_v10 = vmax.f32 %v1470_v62, %v1471_v4  ;;  %s2215_s7 = sshra.s32 %s1855_s1, 4  ;;  %s2216_s7 = int_to_ptr.hbm [resolvable:$true] %s2215_s7 }
 0x341   : > { %v1545_v11 = vsel %vm1441_vm3, %v2594_v6, 0.0  ;;  %v1406_v12 = vpop.xlane.xlu2 %1405  ;;  %s2217_s8 = scalar_lea.hbm %s2216_s7, 8  ;;  %p2222_p1 = scmp.lt.s32.totalorder %s2216_s7, %s2738_s22 }
 0x342   : > { %v1543_v13 = vrot.slane %v1542_v7, 1  ;;  %v1546_v14 = vrot.slane %v1545_v11, 4  ;;  %v1501_v15 = vsub.f32 %v1420_v31, %v1469_v8  ;;  %v1473_v16 = vrot.slane %v1472_v10, 2  ;;  %p2218_p12 = scmp.ne.s32.totalorder %s2216_s7, %s2217_s8  ;;  %p2223_p2 = scmp.lt.s32.totalorder %s2221_s4, %s2217_s8 }
 0x343   : > { %v1422_v17 = vadd.f32 %v2558_v58, %v1406_v12 }
 0x344   : > { %v1547_v18 = vadd.f32 %v1546_v14, %v1545_v11  ;;  %v1509_v63 = vmin.f32 %v1501_v15, 0.0  ;;  %v1474_v19 = vmax.f32 %v1472_v10, %v1473_v16  ;;  %v1544_v20 = vadd.f32 %v1543_v13, %v1542_v7  ;;  %p2219_p13 = pnand %p2218_p12, %p2422_p5  ;;  %p2224_p3 = por %p2223_p2, %p2222_p1 }
 0x345   : > { %v1438_v21 = vsel %vm1430_vm8, %v1422_v17, -1e+30 }
 0x346   : > { %v2174_v22 = vpop.eup %2173  ;;  %v1548_v24 = vrot.slane %v1547_v18, 2  ;;  %v1520_v25 = vmul.f32 1.442695, %v1509_v63  ;;  %v1475_v26 = vrot.slane %v1474_v19, 1  ;;  %v1477_v27 = vsel %vm1441_vm3, %v1438_v21, -inf  ;;  %p2220_p0 = pneg %p2219_p13 }
 0x347   : > { %v2605_v29 = vmul.f32 %v2174_v22, %v2569_v9  ;;  %v1478_v31 = vrot.slane %v1477_v27, 4  ;;  %v1594_v35 = vadd.f32 1e-10, %v1544_v20 }
 0x348   : > { %v1549_v37 = vadd.f32 %v1548_v24, %v1547_v18  ;;  %2175 = vpow2.f32 %v1520_v25  ;;  %v1476_v39 = vmax.f32 %v1474_v19, %v1475_v26  ;;  %p2225_p4 = pnand %p2224_p3, %p2220_p0 }
 0x349   : > { %v1552_v41 = vsel %vm1441_vm3, %v2605_v29, 0.0  ;;  %v1479_v44 = vmax.f32 %v1477_v27, %v1478_v31  ;;  %v1409_v45 = vpop.xlane.xlu0 %1408  ;;  %2177 = vrcp.f32 %v1594_v35 }
 0x34a   : > { %v1550_v47 = vrot.slane %v1549_v37, 1  ;;  %v1553_v48 = vrot.slane %v1552_v41, 4  ;;  %v1502_v51 = vsub.f32 %v1421_v59, %v1476_v39  ;;  %v1423_v9 = vadd.f32 %v2558_v58, %v1409_v45 }
 0x34b   : > { %v1480_v52 = vrot.slane %v1479_v44, 2 }
 0x34c   : > { %v1554_v53 = vadd.f32 %v1553_v48, %v1552_v41  ;;  %v1510_v43 = vmin.f32 %v1502_v51, 0.0  ;;  %v1439_v54 = vsel %vm1431_vm9, %v1423_v9, -1e+30  ;;  %v1551_v56 = vadd.f32 %v1550_v47, %v1549_v37 }
 0x34d   : > { %v1481_v57 = vmax.f32 %v1479_v44, %v1480_v52  ;;  %v1484_v46 = vsel %vm1441_vm3, %v1439_v54, -inf }
 0x34e   : > { %v2176_v61 = vpop.eup %2175  ;;  %v1555_v55 = vrot.slane %v1554_v53, 2  ;;  %v1522_v62 = vmul.f32 1.442695, %v1510_v43  ;;  %v1485_v0 = vrot.slane %v1484_v46, 4  ;;  %v1595_v1 = vadd.f32 1e-10, %v1551_v56 }
 0x34f   : > { %v2178_v2 = vpop.eup %2177  ;;  %v2616_v59 = vmul.f32 %v2176_v61, %v2575_v23  ;;  %v1482_v3 = vrot.slane %v1481_v57, 1 }
 0x350   : > { %v1556_v4 = vadd.f32 %v1555_v55, %v1554_v53  ;;  %2179 = vpow2.f32 %v1522_v62  ;;  %v1486_v7 = vmax.f32 %v1484_v46, %v1485_v0  ;;  %v1610_v8 = vmul.f32 %v2178_v2, %v2583_v50 }
 0x351   : > { %v1559_v10 = vsel %vm1441_vm3, %v2616_v59, 0.0  ;;  %v1483_v11 = vmax.f32 %v1481_v57, %v1482_v3  ;;  %v1412_v12 = vpop.xlane.xlu1 %1411  ;;  %2181 = vrcp.f32 %v1595_v1 }
 0x352   : > { %v1557_v13 = vrot.slane %v1556_v4, 1  ;;  %v1560_v14 = vrot.slane %v1559_v10, 4  ;;  %v1487_v15 = vrot.slane %v1486_v7, 2  ;;  %v1424_v23 = vadd.f32 %v2558_v58, %v1412_v12  ;;  %1620 = vperm.xlu2 %2157, %v1610_v8  }
 0x353   : > { %v1503_v16 = vsub.f32 %v1422_v17, %v1483_v11 }
 0x354   : > { %v1561_v18 = vadd.f32 %v1560_v14, %v1559_v10  ;;  %v1488_v63 = vmax.f32 %v1486_v7, %v1487_v15  ;;  %v1440_v19 = vsel %vm1432_vm10, %v1424_v23, -1e+30  ;;  %v1558_v20 = vadd.f32 %v1557_v13, %v1556_v4 }
 0x355   : > { %v1511_v50 = vmin.f32 %v1503_v16, 0.0  ;;  %v1491_v21 = vsel %vm1441_vm3, %v1440_v19, -inf }
 0x356   : > { %v2180_v22 = vpop.eup %2179  ;;  %v1562_v24 = vrot.slane %v1561_v18, 2  ;;  %v1489_v25 = vrot.slane %v1488_v63, 1  ;;  %v1492_v26 = vrot.slane %v1491_v21, 4  ;;  %v1596_v37 = vadd.f32 1e-10, %v1558_v20 }
 0x357   : > { %v2182_v27 = vpop.eup %2181  ;;  %v1534_v31 = vmul.f32 %v2180_v22, %v2581_v49  ;;  %v1524_v35 = vmul.f32 1.442695, %v1511_v50 }
 0x358   : > { %v1563_v39 = vadd.f32 %v1562_v24, %v1561_v18  ;;  %v1490_v58 = vmax.f32 %v1488_v63, %v1489_v25  ;;  %v1493_v41 = vmax.f32 %v1491_v21, %v1492_v26  ;;  %v1611_v17 = vmul.f32 %v2182_v27, %v2594_v6 }
 0x359   : > { %v1566_v44 = vsel %vm1441_vm3, %v1534_v31, 0.0  ;;  %2183 = vpow2.f32 %v1524_v35 }
 0x35a   : > { %v1564_v45 = vrot.slane %v1563_v39, 1  ;;  %v1567_v47 = vrot.slane %v1566_v44, 4  ;;  %v1504_v48 = vsub.f32 %v1423_v9, %v1490_v58  ;;  %v1494_v51 = vrot.slane %v1493_v41, 2  ;;  %1625 = vperm.xlu0 %2158, %v1611_v17  }
 0x35b   : > { %2185 = vrcp.f32 %v1596_v37 }
 0x35c   : > { %v1568_v52 = vadd.f32 %v1567_v47, %v1566_v44  ;;  %v1512_v53 = vmin.f32 %v1504_v48, 0.0  ;;  %v1495_v43 = vmax.f32 %v1493_v41, %v1494_v51  ;;  %v1565_v49 = vadd.f32 %v1564_v45, %v1563_v39 }
 0x35e   : > { %v1569_v54 = vrot.slane %v1568_v52, 2  ;;  %v1526_v56 = vmul.f32 1.442695, %v1512_v53  ;;  %v1496_v57 = vrot.slane %v1495_v43, 1  ;;  %v1597_v46 = vadd.f32 1e-10, %v1565_v49 }
 0x35f   : > { %v2184_v61 = vpop.eup %2183 }
 0x360   : > { %v1570_v55 = vadd.f32 %v1569_v54, %v1568_v52  ;;  %v1535_v6 = vmul.f32 %v2184_v61, %v2591_v5  ;;  %2187 = vpow2.f32 %v1526_v56  ;;  %v1497_v62 = vmax.f32 %v1495_v43, %v1496_v57  ;;  %v2638_v43 = vld [vmem:[%s2726_s10] ss:$0 sm:$0xff] }
 0x361   : > { %v2186_v0 = vpop.eup %2185  ;;  %2189 = vrcp.f32 %v1597_v46  ;;  %v1092_v54 = vadd.f32 %v2638_v43, %v2508_v30  ;;  %v2110_v46 = vld [vmem:[%s2734_s18 + $0x8] sm:$0xff]  ;;  %v1094_v30 = vadd.f32 %v2638_v43, %v2513_v32 }
 0x362   : > { %v1571_v9 = vrot.slane %v1570_v55, 1  ;;  %v1573_v1 = vsel %vm1441_vm3, %v1535_v6, 0.0  ;;  %v1505_v2 = vsub.f32 %v1424_v23, %v1497_v62  ;;  %v1612_v3 = vmul.f32 %v2186_v0, %v2605_v29  ;;  %1790 = vmatpush.bf16.msra.mxu2 %v2110_v46 }
 0x363   : > { %v1574_v4 = vrot.slane %v1573_v1, 4 }
 0x364   : > { %v1513_v7 = vmin.f32 %v1505_v2, 0.0  ;;  %1630 = vperm.xlu1 %2159, %v1612_v3   ;;  %v1572_v8 = vadd.f32 %v1571_v9, %v1570_v55  ;;  %v1099_v55 = vadd.f32 %v2638_v43, %v2517_v34  ;;  %v1102_v2 = vadd.f32 %v2638_v43, %v2522_v36 }
 0x365   : > { %v1575_v10 = vadd.f32 %v1574_v4, %v1573_v1  ;;  %v1097_v36 = vadd.f32 %v2638_v43, %v2515_v33 }
 0x366   : > { %v2188_v11 = vpop.eup %2187  ;;  %v1528_v12 = vmul.f32 1.442695, %v1513_v7  ;;  %v1598_v13 = vadd.f32 1e-10, %v1572_v8 }
 0x367   : > { %v2190_v14 = vpop.eup %2189  ;;  %v1576_v5 = vrot.slane %v1575_v10, 2  ;;  %v1536_v15 = vmul.f32 %v2188_v11, %v2602_v28 }
 0x368   : > { %2191 = vpow2.f32 %v1528_v12  ;;  %v1613_v16 = vmul.f32 %v2190_v14, %v2616_v59 }
 0x369   : > { %v1577_v18 = vadd.f32 %v1576_v5, %v1575_v10  ;;  %v1580_v23 = vsel %vm1441_vm3, %v1536_v15, 0.0  ;;  %2193 = vrcp.f32 %v1598_v13 }
 0x36a   : > { %v1581_v29 = vrot.slane %v1580_v23, 4  ;;  %1635 = vperm.xlu2 %2157, %v1613_v16  }
 0x36b   : > { %v1578_v63 = vrot.slane %v1577_v18, 1 }
 0x36c   : > { %v1582_v19 = vadd.f32 %v1581_v29, %v1580_v23 }
 0x36d   : > { %v1579_v20 = vadd.f32 %v1578_v63, %v1577_v18 }
 0x36e   : > { %v2192_v50 = vpop.eup %2191  ;;  %v1583_v21 = vrot.slane %v1582_v19, 2 }
 0x36f   : > { %v2194_v22 = vpop.eup %2193  ;;  %v1537_v24 = vmul.f32 %v2192_v50, %v2613_v60  ;;  %v1599_v25 = vadd.f32 1e-10, %v1579_v20 }
 0x370   : > { %v1584_v26 = vadd.f32 %v1583_v21, %v1582_v19  ;;  %v1614_v28 = vmul.f32 %v2194_v22, %v1534_v31  ;;  %v1107_v22 = vadd.f32 %v2638_v43, %v2526_v40 }
 0x371   : > { %v1587_v27 = vsel %vm1441_vm3, %v1537_v24, 0.0  ;;  %2195 = vrcp.f32 %v1599_v25 }
 0x372   : > { %v1585_v59 = vrot.slane %v1584_v26, 1  ;;  %v1588_v35 = vrot.slane %v1587_v27, 4  ;;  %1640 = vperm.xlu2 %2157, %v1614_v28  }
 0x374   : > { %v1589_v37 = vadd.f32 %v1588_v35, %v1587_v27  ;;  %v1586_v39 = vadd.f32 %v1585_v59, %v1584_v26 }
 0x376   : > { %v1590_v58 = vrot.slane %v1589_v37, 2  ;;  %v1600_v41 = vadd.f32 1e-10, %v1586_v39 }
 0x377   : > { %v2196_v17 = vpop.eup %2195 }
 0x378   : > { %v1591_v44 = vadd.f32 %v1590_v58, %v1589_v37  ;;  %v1615_v45 = vmul.f32 %v2196_v17, %v1535_v6  ;;  %2197 = vrcp.f32 %v1600_v41 }
 0x37a   : > { %v1592_v47 = vrot.slane %v1591_v44, 1  ;;  %1645 = vperm.xlu1 %2159, %v1615_v45  }
 0x37c   : > { %v1593_v60 = vadd.f32 %v1592_v47, %v1591_v44 }
 0x37e   : > { %v2198_v48 = vpop.eup %2197  ;;  %v1601_v51 = vadd.f32 1e-10, %v1593_v60 }
 0x37f   : > { %v1616_v31 = vmul.f32 %v2198_v48, %v1536_v15  ;;  %v2109_v48 = vld [vmem:[%s2734_s18] sm:$0xff] }
 0x380   : > { %2199 = vrcp.f32 %v1601_v51  ;;  %1791 = vmatpush.bf16.msra.mxu2 %v2109_v48 }
 0x381   : > { %1650 = vperm.xlu2 %2157, %v1616_v31  }
 0x386   : > { %v2200_v52 = vpop.eup %2199 }
 0x387   : > { %v1617_v53 = vmul.f32 %v2200_v52, %v1537_v24 }
 0x389   : > { %1655 = vperm.xlu1 %2159, %v1617_v53  }
 0x3ac   : > { %v1621_v49 = vpop.permute.xlu2 %1620 }
 0x3ad   : > { %v1658_v56 = vmul.f32 %v1621_v49, %v1092_v54 }
 0x3af   : > { %v1666_v57 = vsel %vm813_vm0, %v1658_v56, 0.0 }
 0x3b0   : > { %v1667_v61 = vrot.slane %v1666_v57, 4 }
 0x3b2   : > { %v1668_v62 = vadd.f32 %v1667_v61, %v1666_v57 }
 0x3b4   : > { %v1669_v9 = vrot.slane %v1668_v62, 2 }
 0x3b6   : > { %v1670_v11 = vadd.f32 %v1669_v9, %v1668_v62 }
 0x3b8   : > { %v1671_v15 = vrot.slane %v1670_v11, 1 }
 0x3ba   : > { %v1672_v29 = vadd.f32 %v1671_v15, %v1670_v11  ;;  %v2112_v11 = vld [vmem:[%s2736_s20 + $0x8] sm:$0xff]  ;;  %v1109_v15 = vadd.f32 %v2638_v43, %v2528_v42 }
 0x3bb   : > { %1830 = vmatpush.bf16.msrb.mxu3 %v2112_v11 }
 0x3bc   : > { %v1722_v26 = vpack.c.bf16 %v1672_v29, %v1672_v29 }
 0x3be   : > { %v1746_v41 = vunpack.c.l.b16 %v1722_v26 }
 0x3c4   : > { %v1636_v6 = vpop.permute.xlu2 %1635 }
 0x3c5   : > { %v1661_v0 = vmul.f32 %v1636_v6, %v1099_v55 }
 0x3c7   : > { %v1687_v1 = vsel %vm813_vm0, %v1661_v0, 0.0  ;;  %v1104_v0 = vadd.f32 %v2638_v43, %v2524_v38  ;;  %v2111_v38 = vld [vmem:[%s2736_s20] sm:$0xff] }
 0x3c8   : > { %v1688_v7 = vrot.slane %v1687_v1, 4  ;;  %1831 = vmatpush.bf16.msrb.mxu3 %v2111_v38 }
 0x3ca   : > { %v1689_v5 = vadd.f32 %v1688_v7, %v1687_v1 }
 0x3cc   : > { %v1641_v3 = vpop.permute.xlu2 %1640  ;;  %v1626_v4 = vpop.permute.xlu0 %1625  ;;  %v1690_v23 = vrot.slane %v1689_v5, 2 }
 0x3cd   : > { %v1662_v8 = vmul.f32 %v1641_v3, %v1102_v2  ;;  %v1659_v10 = vmul.f32 %v1626_v4, %v1094_v30 }
 0x3ce   : > { %v1691_v24 = vadd.f32 %v1690_v23, %v1689_v5 }
 0x3cf   : > { %v1694_v34 = vsel %vm813_vm0, %v1662_v8, 0.0  ;;  %v1673_v12 = vsel %vm813_vm0, %v1659_v10, 0.0 }
 0x3d0   : > { %v1695_v13 = vrot.slane %v1694_v34, 4  ;;  %v1674_v14 = vrot.slane %v1673_v12, 4  ;;  %v1692_v58 = vrot.slane %v1691_v24, 1 }
 0x3d2   : > { %v1696_v16 = vadd.f32 %v1695_v13, %v1694_v34  ;;  %v1675_v18 = vadd.f32 %v1674_v14, %v1673_v12  ;;  %v1693_v51 = vadd.f32 %v1692_v58, %v1691_v24 }
 0x3d4   : > { %v1676_v32 = vrot.slane %v1675_v18, 2  ;;  %v1697_v63 = vrot.slane %v1696_v16, 2  ;;  %v1725_v54 = vpack.c.bf16 %v1693_v51, %v1693_v51 }
 0x3d6   : > { %v1677_v19 = vadd.f32 %v1676_v32, %v1675_v18  ;;  %v1631_v20 = vpop.permute.xlu1 %1630  ;;  %v1698_v28 = vadd.f32 %v1697_v63, %v1696_v16  ;;  %v1749_v55 = vunpack.c.l.b16 %v1725_v54 }
 0x3d7   : > { %v1660_v50 = vmul.f32 %v1631_v20, %v1097_v36 }
 0x3d8   : > { %v1678_v21 = vrot.slane %v1677_v19, 1  ;;  %v1699_v17 = vrot.slane %v1698_v28, 1 }
 0x3d9   : > { %v1680_v25 = vsel %vm813_vm0, %v1660_v50, 0.0 }
 0x3da   : > { %v1679_v27 = vadd.f32 %v1678_v21, %v1677_v19  ;;  %v1681_v59 = vrot.slane %v1680_v25, 4  ;;  %v1700_v31 = vadd.f32 %v1699_v17, %v1698_v28  ;;  %v2168_v17 = vld [vmem:[%s2737_s21] ss:$0 sm:$0xff] }
 0x3db   : > { %v1651_v35 = vpop.permute.xlu2 %1650 }
 0x3dc   : > { %v1723_v37 = vpack.c.bf16 %v1679_v27, %v1679_v27  ;;  %v1682_v33 = vadd.f32 %v1681_v59, %v1680_v25  ;;  %v1664_v39 = vmul.f32 %v1651_v35, %v1107_v22  ;;  %v1726_v56 = vpack.c.bf16 %v1700_v31, %v1700_v31  ;;  %v2167_v35 = vld [vmem:[%s2735_s19] ss:$0 sm:$0xff] }
 0x3de   : > { %v1747_v44 = vunpack.c.l.b16 %v1723_v37  ;;  %v1683_v45 = vrot.slane %v1682_v33, 2  ;;  %v1708_v40 = vsel %vm813_vm0, %v1664_v39, 0.0  ;;  %v1750_v6 = vunpack.c.l.b16 %v1726_v56 }
 0x3df   : > { %v1709_v53 = vrot.slane %v1708_v40, 4 }
 0x3e0   : > { %v1755_v47 = vsel %vm1754_vm11, %v1747_v44, %v1746_v41  ;;  %v1684_v60 = vadd.f32 %v1683_v45, %v1682_v33 }
 0x3e1   : > { %v1710_v46 = vadd.f32 %v1709_v53, %v1708_v40 }
 0x3e2   : > { %v1685_v52 = vrot.slane %v1684_v60, 1 }
 0x3e3   : > { %v1711_v1 = vrot.slane %v1710_v46, 2 }
 0x3e4   : > { %v1686_v49 = vadd.f32 %v1685_v52, %v1684_v60 }
 0x3e5   : > { %v1712_v4 = vadd.f32 %v1711_v1, %v1710_v46 }
 0x3e6   : > { %v1724_v57 = vpack.c.bf16 %v1686_v49, %v1686_v49 }
 0x3e7   : > { %v1713_v34 = vrot.slane %v1712_v4, 1 }
 0x3e8   : > { %v1748_v61 = vunpack.c.l.b16 %v1724_v57 }
 0x3e9   : > { %v1714_v14 = vadd.f32 %v1713_v34, %v1712_v4 }
 0x3ea   : > { %v1757_v62 = vsel %vm1756_vm12, %v1748_v61, %v1755_v47 }
 0x3eb   : > { %v1759_v9 = vsel %vm1758_vm13, %v1749_v55, %v1757_v62  ;;  %v1728_v18 = vpack.c.bf16 %v1714_v14, %v1714_v14 }
 0x3ec   : > { %v1646_v30 = vpop.permute.xlu1 %1645  ;;  %v1761_v2 = vsel %vm1760_vm14, %v1750_v6, %v1759_v9 }
 0x3ed   : > { %v1663_v3 = vmul.f32 %v1646_v30, %v1104_v0  ;;  %v1752_v19 = vunpack.c.l.b16 %v1728_v18 }
 0x3ef   : > { %v1701_v7 = vsel %vm813_vm0, %v1663_v3, 0.0 }
 0x3f0   : > { %v1702_v8 = vrot.slane %v1701_v7, 4 }
 0x3f2   : > { %v1703_v10 = vadd.f32 %v1702_v8, %v1701_v7 }
 0x3f4   : > { %v1704_v12 = vrot.slane %v1703_v10, 2 }
 0x3f6   : > { %v1705_v13 = vadd.f32 %v1704_v12, %v1703_v10 }
 0x3f8   : > { %v1706_v5 = vrot.slane %v1705_v13, 1 }
 0x3fa   : > { %v1707_v16 = vadd.f32 %v1706_v5, %v1705_v13 }
 0x3fb   : > { %v1656_v32 = vpop.permute.xlu1 %1655 }
 0x3fc   : > { %v1727_v36 = vpack.c.bf16 %v1707_v16, %v1707_v16  ;;  %v1665_v23 = vmul.f32 %v1656_v32, %v1109_v15 }
 0x3fe   : > { %v1751_v29 = vunpack.c.l.b16 %v1727_v36  ;;  %v1715_v63 = vsel %vm813_vm0, %v1665_v23, 0.0 }
 0x3ff   : > { %v1716_v20 = vrot.slane %v1715_v63, 4 }
 0x400   : > { %v1763_v50 = vsel %vm1762_vm15, %v1751_v29, %v1761_v2 }
 0x401   : > { %v1717_v21 = vadd.f32 %v1716_v20, %v1715_v63  ;;  %v1765_v22 = vsel %vm1764_vm1, %v1752_v19, %v1763_v50 }
 0x403   : > { %v1718_v24 = vrot.slane %v1717_v21, 2 }
 0x405   : > { %v1719_v25 = vadd.f32 %v1718_v24, %v1717_v21 }
 0x407   : > { %v1720_v26 = vrot.slane %v1719_v25, 1 }
 0x409   : > { %v1721_v42 = vadd.f32 %v1720_v26, %v1719_v25 }
 0x40b   : > { %v1729_v43 = vpack.c.bf16 %v1721_v42, %v1721_v42 }
 0x40d   : > { %v1753_v28 = vunpack.c.l.b16 %v1729_v43 }
 0x40f   : > { %v1767_v27 = vsel %vm1766_vm2, %v1753_v28, %v1765_v22 }
 0x410   : > { %v1768_v59 = vpack.c.b16 %v1767_v27, %v1767_v27 }
 0x412   : > { %2075 = vmatmul.msk.bf16.vlgmr.msra.gmra.mxu2 %vm813_vm0, %v1768_v59 }
 0x495   : > { %v1793_v37 = vpop.f32.mrf.mxu2 }
 0x496   : > { %v1794_v33 = vadd.f32 %v2167_v35, %v1793_v37 }
 0x498   : > { %v1799_v39 = vmax.f32 %v1794_v33, 0.0 }
 0x49a   : > { %v1800_v58 = vpack.c.bf16 %v1799_v39, %v1799_v39 }
 0x49c   : > { %2084 = vmatmul.msk.bf16.vlgmr.msrb.gmra.mxu3 %vm813_vm0, %v1800_v58 }
 0x49d   : > { %v1795_v41 = vpop.f32.mrf.mxu2 }
 0x51f   : > { %v1833_v44 = vpop.f32.mrf.mxu3 }
 0x520   : > { %v1834_v45 = vadd.f32 %v2168_v17, %v1833_v44 }
 0x522   : > { %v1837_v47 = vmax.f32 %v1834_v45, 0.0 }
 0x524   : > { %1838 = vst [vmem:[%s724_s17] sm:$0xff] %v1837_v47 }
 0x525   : > { %2228 = shalt.err (!%p2225_p4)
}
 0x526   : > { %2117 = dma.vmem_to_hbm [thread:$0]  (%p2422_p5), %s1853_s5, 128, %s1855_s1, %s1840_s2  }
 0x527   : > { %v1835_v60 = vpop.f32.mrf.mxu3 }
 0x528 PF: > { %p2123_p7 = scmp.ge.s32.totalorder %s2263_s0, 2  ;;  %s1866_s23 = sand.u32 1, %s2251_s29  }
 0x529   : > { %s1867_s24 = scalar_lea.sflag [#allocation4], %s1866_s23 }
 0x52a   : > { %p2120_p8 = pnand %p2123_p7, %p2426_p6 }
 0x52c   : > { %p2121_p9 = pneg %p2120_p8 }
 0x52e   : > { %2246 = dma.done.wait (%p2121_p9), %s1867_s24, 128  }
 0x52f   : > { %2248 = vsyncadd (%p2121_p9), %s1867_s24, 4294967168  ;;  %s2772_s0 = sld [smem:[#allocation7_spill]]  ;;  %s2775_s29 = smov %s2255_s30 }
 0x530   : > { %s2773_s7 = sld [smem:[#allocation6_spill]] }
 0x531   : > { %s2774_s4 = sld [smem:[#allocation8_spill]] }
 0x535   : > { %p34_p10 = scmp.ge.s32.totalorder %s2772_s0, 4  }
 0x536   : > { %s2776_s30 = smov %s2773_s7 }
 0x537   :  { %36 = sbr.rel (!%p34_p10) target bundleno = 13 (0xd), region = 152 }
 0x53c   :  { %1873 = vsyncpa [#allocation4], 1 }
 0x53d   :  { %1875 = vsyncpa [#allocation4 + $0x1], 1 }

</bundles_post_ra>
